<compile_context>
chip_gen: v5e
topology: v5e:2x2
jax: 0.10.0
libtpu: 0.0.40
codegen_flags: <defaults>
</compile_context>

<pallas_src>
import math

import numpy as np
import jax
import jax.numpy as jnp
from jax import lax
from jax.experimental import pallas as pl
from jax.experimental.pallas import tpu as pltpu

# ---------------- hyper-parameters (small, consistent with the module) -------
VOCAB = 50
D_MODEL = 32
N_HEADS = 4
HEAD_DIM = D_MODEL // N_HEADS
FF_DIM = 64
N_LAYERS = 2
MAX_LEN = 9            # -> target length T = MAX_LEN - 1 = 8
PAD_ID = 0
NEG_INF = -1e30        # finite "-inf" (NaN-proof on fully masked rows)

# ---------------- packed weight-slab layout -----------------------------------
MAT_LANES = 64         # widest matrix is W1: [D, FF_DIM=64]
VEC_LANES = 64         # widest vector is b1: [FF_DIM=64]

# per-layer matrix row offsets (all matrices pre-transposed to [in, out], bf16)
M_SA_Q, M_SA_K, M_SA_V, M_SA_O = 0, 32, 64, 96
M_CA_Q, M_CA_K, M_CA_V, M_CA_O = 128, 160, 192, 224
M_W1, M_W2 = 256, 288
MAT_ROWS = 352         # 8*32 + 32 + 64

# per-layer vector rows (f32): biases + LayerNorm params
(V_SA_QB, V_SA_KB, V_SA_VB, V_SA_OB,
 V_CA_QB, V_CA_KB, V_CA_VB, V_CA_OB,
 V_B1, V_B2, V_N1G, V_N1B, V_N2G, V_N2B, V_N3G, V_N3B) = range(16)
VEC_ROWS = 16


# ---------------- in-kernel helpers (traced inside the Pallas body) ----------
def _layer_norm(v, g, b, eps=1e-5):
    mu = jnp.mean(v, axis=-1, keepdims=True)
    var = jnp.mean((v - mu) ** 2, axis=-1, keepdims=True)
    return (v - mu) * lax.rsqrt(var + eps) * g + b


def _split_heads(x2d):
    """[N, D] f32 -> [H, N, HEAD_DIM] bf16 (head-batched layout, leading batch dim)."""
    parts = [x2d[:, h * HEAD_DIM:(h + 1) * HEAD_DIM] for h in range(N_HEADS)]
    return jnp.stack(parts, axis=0).astype(jnp.bfloat16)


def _mha(q, k, v, out_w, out_b, add_mask_b, want_weights):
    """Multi-head attention core (nn.MultiheadAttention semantics, eval mode).

    q: [Nq, D], k/v: [Nk, D] (f32, 1/sqrt(hd) already folded into the Q proj),
    out_w: [D, D] bf16 (= out_proj.weight.T), out_b: [1, D] f32,
    add_mask_b: [H, Nq, Nk] additive f32.

    All H heads go through ONE batched einsum for QK^T and PV (leading batch dim)
    and ONE softmax chain.  Returns (out [Nq, D] f32, w_dense [Nq, H*Nk] f32 | None).
    """
    qh, kh, vh = _split_heads(q), _split_heads(k), _split_heads(v)   # [H, N, hd] bf16

    s = jnp.einsum('hqd,hkd->hqk', qh, kh,
                   preferred_element_type=jnp.float32) + add_mask_b  # [H, Nq, Nk] f32
    m = jnp.max(s, axis=-1, keepdims=True)
    e = jnp.exp(s - m)
    w = e / jnp.sum(e, axis=-1, keepdims=True)       # exact softmax (user-visible output)

    ctx = jnp.einsum('hqk,hkd->hqd', w.astype(jnp.bfloat16), vh,
                     preferred_element_type=jnp.float32)             # [H, Nq, hd] f32
    # re-assemble heads on the lane axis -> one output-projection matmul
    ctx2 = jnp.concatenate([ctx[h] for h in range(N_HEADS)], axis=-1)  # [Nq, D]
    out = jnp.dot(ctx2.astype(jnp.bfloat16), out_w,
                  preferred_element_type=jnp.float32) + out_b          # [Nq, D]

    w_dense = None
    if want_weights:
        # lane-dense attention weights: [Nq, H*Nk] (head h occupies lanes h*Nk:(h+1)*Nk)
        w_dense = jnp.concatenate([w[h] for h in range(N_HEADS)], axis=-1)
    return out, w_dense


# ---------------- the fused whole-Decoder Pallas kernel -----------------------
def decoder_kernel(x_ref, src_ref, smask_ref, cmask_ref, wmat_ref, wvec_ref,
                   out_ref, attn_ref):
    D, FF = D_MODEL, FF_DIM
    BT = x_ref.shape[0]
    BS = src_ref.shape[0]

    x = x_ref[...]                                   # [BT, D] f32 (stays resident)
    src_b = src_ref[...].astype(jnp.bfloat16)        # [BS, D] bf16 (matmul input only)

    # hoist mask broadcasts out of the (unrolled) layer loop -- JAX does not CSE them
    smask_b = jnp.broadcast_to(smask_ref[...], (N_HEADS, BT, BT))
    cmask_b = jnp.broadcast_to(cmask_ref[...], (N_HEADS, BT, BS))

    for layer in range(N_LAYERS):                    # static unroll: no HBM round trip
        mb = layer * MAT_ROWS
        vb = layer * VEC_ROWS

        def mat(off, rows, cols):                    # bf16 weight block, lane offset 0
            return wmat_ref[mb + off: mb + off + rows, 0:cols]

        def vec(idx, n):                             # f32 bias / LN row, [1, n]
            return wvec_ref[vb + idx: vb + idx + 1, 0:n]

        # --- masked multi-head self-attention + residual + LayerNorm ---------
        xb = x.astype(jnp.bfloat16)
        q = jnp.dot(xb, mat(M_SA_Q, D, D), preferred_element_type=jnp.float32) + vec(V_SA_QB, D)
        k = jnp.dot(xb, mat(M_SA_K, D, D), preferred_element_type=jnp.float32) + vec(V_SA_KB, D)
        v = jnp.dot(xb, mat(M_SA_V, D, D), preferred_element_type=jnp.float32) + vec(V_SA_VB, D)
        sa, _ = _mha(q, k, v, mat(M_SA_O, D, D), vec(V_SA_OB, D), smask_b,
                     want_weights=False)
        x = _layer_norm(x + sa, vec(V_N1G, D), vec(V_N1B, D))

        # --- cross-attention over encoded image + residual + LayerNorm -------
        xb = x.astype(jnp.bfloat16)
        qc = jnp.dot(xb, mat(M_CA_Q, D, D), preferred_element_type=jnp.float32) + vec(V_CA_QB, D)
        kc = jnp.dot(src_b, mat(M_CA_K, D, D), preferred_element_type=jnp.float32) + vec(V_CA_KB, D)
        vc = jnp.dot(src_b, mat(M_CA_V, D, D), preferred_element_type=jnp.float32) + vec(V_CA_VB, D)
        ca, w_dense = _mha(qc, kc, vc, mat(M_CA_O, D, D), vec(V_CA_OB, D), cmask_b,
                           want_weights=True)
        attn_ref[layer] = w_dense                    # ONE dense [BT, H*BS] store per layer
        x = _layer_norm(x + ca, vec(V_N2G, D), vec(V_N2B, D))

        # --- position-wise feed-forward + residual + LayerNorm ---------------
        xb = x.astype(jnp.bfloat16)
        h1 = jnp.maximum(
            jnp.dot(xb, mat(M_W1, D, FF), preferred_element_type=jnp.float32) + vec(V_B1, FF),
            0.0)
        ff = jnp.dot(h1.astype(jnp.bfloat16), mat(M_W2, FF, D),
                     preferred_element_type=jnp.float32) + vec(V_B2, D)
        x = _layer_norm(x + ff, vec(V_N3G, D), vec(V_N3B, D))

    out_ref[...] = x


# ---------------- full Decoder forward (glue + one fused kernel launch) ------
def decoder_forward(params, tgt_cptn, src_img):
    """tgt_cptn: [B, T] int32 ; src_img: [S, B, D] (matches PyTorch layout)."""
    B, T = tgt_cptn.shape
    S = src_img.shape[0]
    BT, BS = B * T, B * S

    # embedding (padding_idx row zeroed) + sinusoidal positional encoding.
    # dropout: eval mode -> identity.
    x = params["emb"][tgt_cptn] + params["pe"][:T][None, :, :]          # [B, T, D]
    x_flat = x.reshape(BT, D_MODEL)
    src_flat = jnp.transpose(src_img, (1, 0, 2)).reshape(BS, D_MODEL)   # [B*S, D]

    # additive masks:
    #   self : causal + key-padding + batch-block isolation
    #   cross: batch-block isolation only
    q_batch = jnp.arange(BT, dtype=jnp.int32) // T
    q_pos = jnp.arange(BT, dtype=jnp.int32) % T
    k_batch_src = jnp.arange(BS, dtype=jnp.int32) // S
    pad_keys = (tgt_cptn == PAD_ID).reshape(BT)

    same_b = q_batch[:, None] == q_batch[None, :]
    causal_ok = q_pos[None, :] <= q_pos[:, None]
    self_allowed = same_b & causal_ok & jnp.logical_not(pad_keys)[None, :]
    self_mask = jnp.where(self_allowed, 0.0, NEG_INF).astype(jnp.float32)

    cross_allowed = q_batch[:, None] == k_batch_src[None, :]
    cross_mask = jnp.where(cross_allowed, 0.0, NEG_INF).astype(jnp.float32)

    vmem = pl.BlockSpec(memory_space=pltpu.MemorySpace.VMEM)
    out_flat, attn_full = pl.pallas_call(
        decoder_kernel,
        out_shape=(jax.ShapeDtypeStruct((BT, D_MODEL), jnp.float32),
                   jax.ShapeDtypeStruct((N_LAYERS, BT, N_HEADS * BS), jnp.float32)),
        in_specs=[vmem] * 6,
        out_specs=(vmem, vmem),
    )(x_flat, src_flat, self_mask, cross_mask, params["wmat"], params["wvec"])
    # TODO(synk): if B grows, switch to a grid=(B,) 'parallel' formulation
    # (per-batch [T,S] blocks) to drop the O(B^2) masked cross-batch work and
    # feed v7x's second TensorCore; at B=2 the folded-batch single shot wins.

    out = out_flat.reshape(B, T, D_MODEL).transpose(1, 0, 2)            # [T, B, D]

    # attn_full[l, bq*T+t, h*B*S + bk*S + s] -> [L, B, H, T, S] (diagonal bq == bk)
    a = attn_full.reshape(N_LAYERS, B, T, N_HEADS, B, S)
    attns_all = jnp.stack([a[:, b, :, :, b, :] for b in range(B)], axis=1)  # [L,B,T,H,S]
    attns_all = attns_all.transpose(0, 1, 3, 2, 4)                          # [L,B,H,T,S]
    return out, attns_all


# ---------------- weight packing (pre-transpose + scale fold + bf16 slab) ----
def _pad_lanes(a, lanes):
    a = jnp.asarray(a, jnp.float32)
    if a.ndim == 1:
        a = a[None, :]
    return jnp.pad(a, ((0, 0), (0, lanes - a.shape[-1])))


def pack_params(layer_params):
    """Pre-transpose every weight (kernel computes x @ W), fold the 1/sqrt(hd)
    attention scale into the Q projections, and pack:
      - all matrices into one bf16 slab  [N_LAYERS*MAT_ROWS, MAT_LANES]
      - all biases / LayerNorm params into one f32 slab [N_LAYERS*VEC_ROWS, VEC_LANES]."""
    D = D_MODEL
    scale = 1.0 / math.sqrt(HEAD_DIM)
    mats, vecs = [], []
    for p in layer_params:
        mats.append(jnp.concatenate([
            _pad_lanes(p["sa_w"][:D].T * scale, MAT_LANES),      # self-attn Wq (scaled)
            _pad_lanes(p["sa_w"][D:2 * D].T, MAT_LANES),         # self-attn Wk
            _pad_lanes(p["sa_w"][2 * D:].T, MAT_LANES),          # self-attn Wv
            _pad_lanes(p["sa_ow"].T, MAT_LANES),                 # self-attn Wo
            _pad_lanes(p["ca_w"][:D].T * scale, MAT_LANES),      # cross-attn Wq (scaled)
            _pad_lanes(p["ca_w"][D:2 * D].T, MAT_LANES),         # cross-attn Wk
            _pad_lanes(p["ca_w"][2 * D:].T, MAT_LANES),          # cross-attn Wv
            _pad_lanes(p["ca_ow"].T, MAT_LANES),                 # cross-attn Wo
            _pad_lanes(p["w1"].T, MAT_LANES),                    # FFN W1  [D, FF]
            _pad_lanes(p["w2"].T, MAT_LANES),                    # FFN W2  [FF, D]
        ], axis=0))
        vecs.append(jnp.concatenate([
            _pad_lanes(p["sa_b"][:D] * scale, VEC_LANES),
            _pad_lanes(p["sa_b"][D:2 * D], VEC_LANES),
            _pad_lanes(p["sa_b"][2 * D:], VEC_LANES),
            _pad_lanes(p["sa_ob"], VEC_LANES),
            _pad_lanes(p["ca_b"][:D] * scale, VEC_LANES),
            _pad_lanes(p["ca_b"][D:2 * D], VEC_LANES),
            _pad_lanes(p["ca_b"][2 * D:], VEC_LANES),
            _pad_lanes(p["ca_ob"], VEC_LANES),
            _pad_lanes(p["b1"], VEC_LANES),
            _pad_lanes(p["b2"], VEC_LANES),
            _pad_lanes(p["n1g"], VEC_LANES), _pad_lanes(p["n1b"], VEC_LANES),
            _pad_lanes(p["n2g"], VEC_LANES), _pad_lanes(p["n2b"], VEC_LANES),
            _pad_lanes(p["n3g"], VEC_LANES), _pad_lanes(p["n3b"], VEC_LANES),
        ], axis=0))
    wmat = jnp.concatenate(mats, axis=0).astype(jnp.bfloat16)
    wvec = jnp.concatenate(vecs, axis=0)
    assert wmat.shape == (N_LAYERS * MAT_ROWS, MAT_LANES)
    assert wvec.shape == (N_LAYERS * VEC_ROWS, VEC_LANES)
    return wmat, wvec


# ---------------- deterministic parameter init --------------------------------
def init_params(key):
    keys = jax.random.split(key, 1 + N_LAYERS)
    emb = 0.02 * jax.random.normal(keys[0], (VOCAB, D_MODEL), jnp.float32)
    emb = emb.at[PAD_ID].set(0.0)                       # nn.Embedding padding_idx

    pos = np.arange(MAX_LEN, dtype=np.float32)[:, None]
    div = np.exp(np.arange(0, D_MODEL, 2, dtype=np.float32)
                 * (-math.log(10000.0) / D_MODEL))
    pe = np.zeros((MAX_LEN, D_MODEL), np.float32)
    pe[:, 0::2] = np.sin(pos * div)
    pe[:, 1::2] = np.cos(pos * div)

    def init_layer(k):
        ks = jax.random.split(k, 6)
        s = 0.05
        return dict(
            sa_w=s * jax.random.normal(ks[0], (3 * D_MODEL, D_MODEL), jnp.float32),
            sa_b=jnp.zeros((3 * D_MODEL,), jnp.float32),
            sa_ow=s * jax.random.normal(ks[1], (D_MODEL, D_MODEL), jnp.float32),
            sa_ob=jnp.zeros((D_MODEL,), jnp.float32),
            ca_w=s * jax.random.normal(ks[2], (3 * D_MODEL, D_MODEL), jnp.float32),
            ca_b=jnp.zeros((3 * D_MODEL,), jnp.float32),
            ca_ow=s * jax.random.normal(ks[3], (D_MODEL, D_MODEL), jnp.float32),
            ca_ob=jnp.zeros((D_MODEL,), jnp.float32),
            n1g=jnp.ones((D_MODEL,), jnp.float32), n1b=jnp.zeros((D_MODEL,), jnp.float32),
            n2g=jnp.ones((D_MODEL,), jnp.float32), n2b=jnp.zeros((D_MODEL,), jnp.float32),
            w1=s * jax.random.normal(ks[4], (FF_DIM, D_MODEL), jnp.float32),
            b1=jnp.zeros((FF_DIM,), jnp.float32),
            w2=s * jax.random.normal(ks[5], (D_MODEL, FF_DIM), jnp.float32),
            b2=jnp.zeros((D_MODEL,), jnp.float32),
            n3g=jnp.ones((D_MODEL,), jnp.float32), n3b=jnp.zeros((D_MODEL,), jnp.float32),
        )

    layers = [init_layer(keys[1 + i]) for i in range(N_LAYERS)]
    wmat, wvec = pack_params(layers)
    return dict(emb=emb, pe=jnp.asarray(pe), wmat=wmat, wvec=wvec)


# ---------------- main --------------------------------------------------------
if __name__ == "__main__":
    key = jax.random.PRNGKey(0)
    pkey, tkey, skey = jax.random.split(key, 3)
    params = init_params(pkey)

    B = 2
    T = MAX_LEN - 1          # 8
    S = 16                   # encode_size^2 = 4^2

    tgt_cptn = jax.random.randint(tkey, (B, T), 1, VOCAB, dtype=jnp.int32)
    tgt_cptn = tgt_cptn.at[:, -2:].set(PAD_ID)          # trailing padding tokens
    src_img = jax.random.normal(skey, (S, B, D_MODEL), jnp.float32)

    fwd = jax.jit(decoder_forward)
    out, attns = fwd(params, tgt_cptn, src_img)
    out, attns = jax.block_until_ready((out, attns))

    assert out.shape == (T, B, D_MODEL)
    assert attns.shape == (N_LAYERS, B, N_HEADS, T, S)
    assert bool(jnp.all(jnp.isfinite(out))) and bool(jnp.all(jnp.isfinite(attns)))
    # attention rows are exact softmax outputs -> must sum to 1
    assert bool(jnp.allclose(attns.sum(-1), 1.0, atol=1e-2))
    print("KERNEL_OK")
</pallas_src>

<mosaic_0001>
module attributes {stable_mosaic.version = 11 : i64} {
  func.func @decoder_kernel(%arg0: memref<16x32xf32, #tpu.memory_space<vmem>>, %arg1: memref<32x32xf32, #tpu.memory_space<vmem>>, %arg2: memref<16x16xf32, #tpu.memory_space<vmem>>, %arg3: memref<16x32xf32, #tpu.memory_space<vmem>>, %arg4: memref<704x64xbf16, #tpu.memory_space<vmem>>, %arg5: memref<32x64xf32, #tpu.memory_space<vmem>>, %arg6: memref<16x32xf32, #tpu.memory_space<vmem>>, %arg7: memref<2x16x128xf32, #tpu.memory_space<vmem>>) attributes {dimension_semantics = [], scalar_prefetch = 0 : i64, scratch_operands = 0 : i64, tpu.core_type = #tpu.core_type<tc>} {
    %c0 = arith.constant 0 : index
    %c0_0 = arith.constant 0 : index
    %0 = vector.load %arg0[%c0, %c0_0] : memref<16x32xf32, #tpu.memory_space<vmem>>, vector<16x32xf32>
    %c0_1 = arith.constant 0 : index
    %c0_2 = arith.constant 0 : index
    %1 = vector.load %arg1[%c0_1, %c0_2] : memref<32x32xf32, #tpu.memory_space<vmem>>, vector<32x32xf32>
    %2 = arith.truncf %1 : vector<32x32xf32> to vector<32x32xbf16>
    %c0_3 = arith.constant 0 : index
    %c0_4 = arith.constant 0 : index
    %3 = vector.load %arg2[%c0_3, %c0_4] : memref<16x16xf32, #tpu.memory_space<vmem>>, vector<16x16xf32>
    %4 = vector.shape_cast %3 : vector<16x16xf32> to vector<1x16x16xf32>
    %5 = vector.broadcast %4 : vector<1x16x16xf32> to vector<4x16x16xf32>
    %c0_5 = arith.constant 0 : index
    %c0_6 = arith.constant 0 : index
    %6 = vector.load %arg3[%c0_5, %c0_6] : memref<16x32xf32, #tpu.memory_space<vmem>>, vector<16x32xf32>
    %7 = vector.shape_cast %6 : vector<16x32xf32> to vector<1x16x32xf32>
    %8 = vector.broadcast %7 : vector<1x16x32xf32> to vector<4x16x32xf32>
    %9 = arith.truncf %0 : vector<16x32xf32> to vector<16x32xbf16>
    %c0_7 = arith.constant 0 : index
    %c0_8 = arith.constant 0 : index
    %10 = vector.load %arg4[%c0_7, %c0_8] : memref<704x64xbf16, #tpu.memory_space<vmem>>, vector<32x32xbf16>
    %cst = arith.constant dense<0.000000e+00> : vector<16x32xf32>
    %11 = tpu.matmul %9, %10, %cst {dimension_numbers = #tpu.dot_dimension_numbers<[1], [0], [0], [1], [0, 0, 1, 1], [], []>} : vector<16x32xbf16>, vector<32x32xbf16>, vector<16x32xf32> -> vector<16x32xf32>
    %c0_9 = arith.constant 0 : index
    %c0_10 = arith.constant 0 : index
    %12 = vector.load %arg5[%c0_9, %c0_10] : memref<32x64xf32, #tpu.memory_space<vmem>>, vector<1x32xf32>
    %13 = vector.broadcast %12 : vector<1x32xf32> to vector<16x32xf32>
    %14 = arith.addf %11, %13 : vector<16x32xf32>
    %c32 = arith.constant 32 : index
    %c0_11 = arith.constant 0 : index
    %15 = vector.load %arg4[%c32, %c0_11] : memref<704x64xbf16, #tpu.memory_space<vmem>>, vector<32x32xbf16>
    %cst_12 = arith.constant dense<0.000000e+00> : vector<16x32xf32>
    %16 = tpu.matmul %9, %15, %cst_12 {dimension_numbers = #tpu.dot_dimension_numbers<[1], [0], [0], [1], [0, 0, 1, 1], [], []>} : vector<16x32xbf16>, vector<32x32xbf16>, vector<16x32xf32> -> vector<16x32xf32>
    %c1 = arith.constant 1 : index
    %c0_13 = arith.constant 0 : index
    %17 = vector.load %arg5[%c1, %c0_13] : memref<32x64xf32, #tpu.memory_space<vmem>>, vector<1x32xf32>
    %18 = vector.broadcast %17 : vector<1x32xf32> to vector<16x32xf32>
    %19 = arith.addf %16, %18 : vector<16x32xf32>
    %c64 = arith.constant 64 : index
    %c0_14 = arith.constant 0 : index
    %20 = vector.load %arg4[%c64, %c0_14] : memref<704x64xbf16, #tpu.memory_space<vmem>>, vector<32x32xbf16>
    %cst_15 = arith.constant dense<0.000000e+00> : vector<16x32xf32>
    %21 = tpu.matmul %9, %20, %cst_15 {dimension_numbers = #tpu.dot_dimension_numbers<[1], [0], [0], [1], [0, 0, 1, 1], [], []>} : vector<16x32xbf16>, vector<32x32xbf16>, vector<16x32xf32> -> vector<16x32xf32>
    %c2 = arith.constant 2 : index
    %c0_16 = arith.constant 0 : index
    %22 = vector.load %arg5[%c2, %c0_16] : memref<32x64xf32, #tpu.memory_space<vmem>>, vector<1x32xf32>
    %23 = vector.broadcast %22 : vector<1x32xf32> to vector<16x32xf32>
    %24 = arith.addf %21, %23 : vector<16x32xf32>
    %c96 = arith.constant 96 : index
    %c0_17 = arith.constant 0 : index
    %25 = vector.load %arg4[%c96, %c0_17] : memref<704x64xbf16, #tpu.memory_space<vmem>>, vector<32x32xbf16>
    %c3 = arith.constant 3 : index
    %c0_18 = arith.constant 0 : index
    %26 = vector.load %arg5[%c3, %c0_18] : memref<32x64xf32, #tpu.memory_space<vmem>>, vector<1x32xf32>
    %27 = vector.extract_strided_slice %14 {offsets = [0, 0], sizes = [16, 8], strides = [1, 1]} : vector<16x32xf32> to vector<16x8xf32>
    %28 = vector.extract_strided_slice %14 {offsets = [0, 8], sizes = [16, 8], strides = [1, 1]} : vector<16x32xf32> to vector<16x8xf32>
    %29 = vector.extract_strided_slice %14 {offsets = [0, 16], sizes = [16, 8], strides = [1, 1]} : vector<16x32xf32> to vector<16x8xf32>
    %30 = vector.extract_strided_slice %14 {offsets = [0, 24], sizes = [16, 8], strides = [1, 1]} : vector<16x32xf32> to vector<16x8xf32>
    %31 = vector.shape_cast %27 : vector<16x8xf32> to vector<1x16x8xf32>
    %32 = vector.shape_cast %28 : vector<16x8xf32> to vector<1x16x8xf32>
    %33 = vector.shape_cast %29 : vector<16x8xf32> to vector<1x16x8xf32>
    %34 = vector.shape_cast %30 : vector<16x8xf32> to vector<1x16x8xf32>
    %35 = tpu.concatenate %31, %32, %33, %34 in 0 : vector<1x16x8xf32>, vector<1x16x8xf32>, vector<1x16x8xf32>, vector<1x16x8xf32> -> vector<4x16x8xf32>
    %36 = arith.truncf %35 : vector<4x16x8xf32> to vector<4x16x8xbf16>
    %37 = vector.extract_strided_slice %19 {offsets = [0, 0], sizes = [16, 8], strides = [1, 1]} : vector<16x32xf32> to vector<16x8xf32>
    %38 = vector.extract_strided_slice %19 {offsets = [0, 8], sizes = [16, 8], strides = [1, 1]} : vector<16x32xf32> to vector<16x8xf32>
    %39 = vector.extract_strided_slice %19 {offsets = [0, 16], sizes = [16, 8], strides = [1, 1]} : vector<16x32xf32> to vector<16x8xf32>
    %40 = vector.extract_strided_slice %19 {offsets = [0, 24], sizes = [16, 8], strides = [1, 1]} : vector<16x32xf32> to vector<16x8xf32>
    %41 = vector.shape_cast %37 : vector<16x8xf32> to vector<1x16x8xf32>
    %42 = vector.shape_cast %38 : vector<16x8xf32> to vector<1x16x8xf32>
    %43 = vector.shape_cast %39 : vector<16x8xf32> to vector<1x16x8xf32>
    %44 = vector.shape_cast %40 : vector<16x8xf32> to vector<1x16x8xf32>
    %45 = tpu.concatenate %41, %42, %43, %44 in 0 : vector<1x16x8xf32>, vector<1x16x8xf32>, vector<1x16x8xf32>, vector<1x16x8xf32> -> vector<4x16x8xf32>
    %46 = arith.truncf %45 : vector<4x16x8xf32> to vector<4x16x8xbf16>
    %47 = vector.extract_strided_slice %24 {offsets = [0, 0], sizes = [16, 8], strides = [1, 1]} : vector<16x32xf32> to vector<16x8xf32>
    %48 = vector.extract_strided_slice %24 {offsets = [0, 8], sizes = [16, 8], strides = [1, 1]} : vector<16x32xf32> to vector<16x8xf32>
    %49 = vector.extract_strided_slice %24 {offsets = [0, 16], sizes = [16, 8], strides = [1, 1]} : vector<16x32xf32> to vector<16x8xf32>
    %50 = vector.extract_strided_slice %24 {offsets = [0, 24], sizes = [16, 8], strides = [1, 1]} : vector<16x32xf32> to vector<16x8xf32>
    %51 = vector.shape_cast %47 : vector<16x8xf32> to vector<1x16x8xf32>
    %52 = vector.shape_cast %48 : vector<16x8xf32> to vector<1x16x8xf32>
    %53 = vector.shape_cast %49 : vector<16x8xf32> to vector<1x16x8xf32>
    %54 = vector.shape_cast %50 : vector<16x8xf32> to vector<1x16x8xf32>
    %55 = tpu.concatenate %51, %52, %53, %54 in 0 : vector<1x16x8xf32>, vector<1x16x8xf32>, vector<1x16x8xf32>, vector<1x16x8xf32> -> vector<4x16x8xf32>
    %56 = arith.truncf %55 : vector<4x16x8xf32> to vector<4x16x8xbf16>
    "tpu.trace_start"() <{level = 10 : i32, message = "hqd,hkd->hqk"}> : () -> ()
    %cst_19 = arith.constant dense<0.000000e+00> : vector<4x16x16xf32>
    %57 = tpu.matmul %36, %46, %cst_19 {dimension_numbers = #tpu.dot_dimension_numbers<[2], [2], [1], [1], [0, 0, 0, 1, 1, 1], [0], [0]>} : vector<4x16x8xbf16>, vector<4x16x8xbf16>, vector<4x16x16xf32> -> vector<4x16x16xf32>
    "tpu.trace_stop"() : () -> ()
    %58 = arith.addf %57, %5 : vector<4x16x16xf32>
    %cst_20 = arith.constant dense<0xFF800000> : vector<4x16xf32>
    %59 = vector.multi_reduction <maximumf>, %58, %cst_20 [2] : vector<4x16x16xf32> to vector<4x16xf32>
    %60 = vector.shape_cast %59 : vector<4x16xf32> to vector<4x16x1xf32>
    %61 = vector.broadcast %60 : vector<4x16x1xf32> to vector<4x16x16xf32>
    %62 = arith.subf %58, %61 : vector<4x16x16xf32>
    %63 = math.exp %62 : vector<4x16x16xf32>
    %cst_21 = arith.constant dense<0.000000e+00> : vector<4x16xf32>
    %64 = vector.multi_reduction <add>, %63, %cst_21 [2] : vector<4x16x16xf32> to vector<4x16xf32>
    %65 = vector.shape_cast %64 : vector<4x16xf32> to vector<4x16x1xf32>
    %66 = vector.broadcast %65 : vector<4x16x1xf32> to vector<4x16x16xf32>
    %67 = arith.divf %63, %66 : vector<4x16x16xf32>
    %68 = arith.truncf %67 : vector<4x16x16xf32> to vector<4x16x16xbf16>
    "tpu.trace_start"() <{level = 10 : i32, message = "hqk,hkd->hqd"}> : () -> ()
    %cst_22 = arith.constant dense<0.000000e+00> : vector<4x16x8xf32>
    %69 = tpu.matmul %68, %56, %cst_22 {dimension_numbers = #tpu.dot_dimension_numbers<[2], [1], [1], [2], [0, 0, 0, 1, 1, 2], [0], [0]>} : vector<4x16x16xbf16>, vector<4x16x8xbf16>, vector<4x16x8xf32> -> vector<4x16x8xf32>
    "tpu.trace_stop"() : () -> ()
    %70 = vector.extract_strided_slice %69 {offsets = [0, 0, 0], sizes = [1, 16, 8], strides = [1, 1, 1]} : vector<4x16x8xf32> to vector<1x16x8xf32>
    %71 = vector.shape_cast %70 : vector<1x16x8xf32> to vector<16x8xf32>
    %72 = vector.extract_strided_slice %69 {offsets = [1, 0, 0], sizes = [1, 16, 8], strides = [1, 1, 1]} : vector<4x16x8xf32> to vector<1x16x8xf32>
    %73 = vector.shape_cast %72 : vector<1x16x8xf32> to vector<16x8xf32>
    %74 = vector.extract_strided_slice %69 {offsets = [2, 0, 0], sizes = [1, 16, 8], strides = [1, 1, 1]} : vector<4x16x8xf32> to vector<1x16x8xf32>
    %75 = vector.shape_cast %74 : vector<1x16x8xf32> to vector<16x8xf32>
    %76 = vector.extract_strided_slice %69 {offsets = [3, 0, 0], sizes = [1, 16, 8], strides = [1, 1, 1]} : vector<4x16x8xf32> to vector<1x16x8xf32>
    %77 = vector.shape_cast %76 : vector<1x16x8xf32> to vector<16x8xf32>
    %78 = tpu.concatenate %71, %73, %75, %77 in 1 : vector<16x8xf32>, vector<16x8xf32>, vector<16x8xf32>, vector<16x8xf32> -> vector<16x32xf32>
    %79 = arith.truncf %78 : vector<16x32xf32> to vector<16x32xbf16>
    %cst_23 = arith.constant dense<0.000000e+00> : vector<16x32xf32>
    %80 = tpu.matmul %79, %25, %cst_23 {dimension_numbers = #tpu.dot_dimension_numbers<[1], [0], [0], [1], [0, 0, 1, 1], [], []>} : vector<16x32xbf16>, vector<32x32xbf16>, vector<16x32xf32> -> vector<16x32xf32>
    %81 = vector.broadcast %26 : vector<1x32xf32> to vector<16x32xf32>
    %82 = arith.addf %80, %81 : vector<16x32xf32>
    %83 = arith.addf %0, %82 : vector<16x32xf32>
    %c10 = arith.constant 10 : index
    %c0_24 = arith.constant 0 : index
    %84 = vector.load %arg5[%c10, %c0_24] : memref<32x64xf32, #tpu.memory_space<vmem>>, vector<1x32xf32>
    %c11 = arith.constant 11 : index
    %c0_25 = arith.constant 0 : index
    %85 = vector.load %arg5[%c11, %c0_25] : memref<32x64xf32, #tpu.memory_space<vmem>>, vector<1x32xf32>
    %cst_26 = arith.constant dense<0.000000e+00> : vector<16xf32>
    %86 = vector.multi_reduction <add>, %83, %cst_26 [1] : vector<16x32xf32> to vector<16xf32>
    %87 = vector.shape_cast %86 : vector<16xf32> to vector<16x1xf32>
    %cst_27 = arith.constant 3.200000e+01 : f32
    %88 = vector.broadcast %cst_27 : f32 to vector<16x1xf32>
    %89 = arith.divf %87, %88 : vector<16x1xf32>
    %90 = vector.broadcast %89 : vector<16x1xf32> to vector<16x32xf32>
    %91 = arith.subf %83, %90 : vector<16x32xf32>
    %92 = arith.mulf %91, %91 : vector<16x32xf32>
    %cst_28 = arith.constant dense<0.000000e+00> : vector<16xf32>
    %93 = vector.multi_reduction <add>, %92, %cst_28 [1] : vector<16x32xf32> to vector<16xf32>
    %94 = vector.shape_cast %93 : vector<16xf32> to vector<16x1xf32>
    %cst_29 = arith.constant 3.200000e+01 : f32
    %95 = vector.broadcast %cst_29 : f32 to vector<16x1xf32>
    %96 = arith.divf %94, %95 : vector<16x1xf32>
    %97 = vector.broadcast %89 : vector<16x1xf32> to vector<16x32xf32>
    %98 = arith.subf %83, %97 : vector<16x32xf32>
    %cst_30 = arith.constant 9.99999974E-6 : f32
    %99 = vector.broadcast %cst_30 : f32 to vector<16x1xf32>
    %100 = arith.addf %96, %99 : vector<16x1xf32>
    %101 = math.rsqrt %100 : vector<16x1xf32>
    %102 = vector.broadcast %101 : vector<16x1xf32> to vector<16x32xf32>
    %103 = arith.mulf %98, %102 : vector<16x32xf32>
    %104 = vector.broadcast %84 : vector<1x32xf32> to vector<16x32xf32>
    %105 = arith.mulf %103, %104 : vector<16x32xf32>
    %106 = vector.broadcast %85 : vector<1x32xf32> to vector<16x32xf32>
    %107 = arith.addf %105, %106 : vector<16x32xf32>
    %108 = arith.truncf %107 : vector<16x32xf32> to vector<16x32xbf16>
    %c128 = arith.constant 128 : index
    %c0_31 = arith.constant 0 : index
    %109 = vector.load %arg4[%c128, %c0_31] : memref<704x64xbf16, #tpu.memory_space<vmem>>, vector<32x32xbf16>
    %cst_32 = arith.constant dense<0.000000e+00> : vector<16x32xf32>
    %110 = tpu.matmul %108, %109, %cst_32 {dimension_numbers = #tpu.dot_dimension_numbers<[1], [0], [0], [1], [0, 0, 1, 1], [], []>} : vector<16x32xbf16>, vector<32x32xbf16>, vector<16x32xf32> -> vector<16x32xf32>
    %c4 = arith.constant 4 : index
    %c0_33 = arith.constant 0 : index
    %111 = vector.load %arg5[%c4, %c0_33] : memref<32x64xf32, #tpu.memory_space<vmem>>, vector<1x32xf32>
    %112 = vector.broadcast %111 : vector<1x32xf32> to vector<16x32xf32>
    %113 = arith.addf %110, %112 : vector<16x32xf32>
    %c160 = arith.constant 160 : index
    %c0_34 = arith.constant 0 : index
    %114 = vector.load %arg4[%c160, %c0_34] : memref<704x64xbf16, #tpu.memory_space<vmem>>, vector<32x32xbf16>
    %cst_35 = arith.constant dense<0.000000e+00> : vector<32x32xf32>
    %115 = tpu.matmul %2, %114, %cst_35 {dimension_numbers = #tpu.dot_dimension_numbers<[1], [0], [0], [1], [0, 0, 1, 1], [], []>} : vector<32x32xbf16>, vector<32x32xbf16>, vector<32x32xf32> -> vector<32x32xf32>
    %c5 = arith.constant 5 : index
    %c0_36 = arith.constant 0 : index
    %116 = vector.load %arg5[%c5, %c0_36] : memref<32x64xf32, #tpu.memory_space<vmem>>, vector<1x32xf32>
    %117 = vector.broadcast %116 : vector<1x32xf32> to vector<32x32xf32>
    %118 = arith.addf %115, %117 : vector<32x32xf32>
    %c192 = arith.constant 192 : index
    %c0_37 = arith.constant 0 : index
    %119 = vector.load %arg4[%c192, %c0_37] : memref<704x64xbf16, #tpu.memory_space<vmem>>, vector<32x32xbf16>
    %cst_38 = arith.constant dense<0.000000e+00> : vector<32x32xf32>
    %120 = tpu.matmul %2, %119, %cst_38 {dimension_numbers = #tpu.dot_dimension_numbers<[1], [0], [0], [1], [0, 0, 1, 1], [], []>} : vector<32x32xbf16>, vector<32x32xbf16>, vector<32x32xf32> -> vector<32x32xf32>
    %c6 = arith.constant 6 : index
    %c0_39 = arith.constant 0 : index
    %121 = vector.load %arg5[%c6, %c0_39] : memref<32x64xf32, #tpu.memory_space<vmem>>, vector<1x32xf32>
    %122 = vector.broadcast %121 : vector<1x32xf32> to vector<32x32xf32>
    %123 = arith.addf %120, %122 : vector<32x32xf32>
    %c224 = arith.constant 224 : index
    %c0_40 = arith.constant 0 : index
    %124 = vector.load %arg4[%c224, %c0_40] : memref<704x64xbf16, #tpu.memory_space<vmem>>, vector<32x32xbf16>
    %c7 = arith.constant 7 : index
    %c0_41 = arith.constant 0 : index
    %125 = vector.load %arg5[%c7, %c0_41] : memref<32x64xf32, #tpu.memory_space<vmem>>, vector<1x32xf32>
    %126 = vector.extract_strided_slice %113 {offsets = [0, 0], sizes = [16, 8], strides = [1, 1]} : vector<16x32xf32> to vector<16x8xf32>
    %127 = vector.extract_strided_slice %113 {offsets = [0, 8], sizes = [16, 8], strides = [1, 1]} : vector<16x32xf32> to vector<16x8xf32>
    %128 = vector.extract_strided_slice %113 {offsets = [0, 16], sizes = [16, 8], strides = [1, 1]} : vector<16x32xf32> to vector<16x8xf32>
    %129 = vector.extract_strided_slice %113 {offsets = [0, 24], sizes = [16, 8], strides = [1, 1]} : vector<16x32xf32> to vector<16x8xf32>
    %130 = vector.shape_cast %126 : vector<16x8xf32> to vector<1x16x8xf32>
    %131 = vector.shape_cast %127 : vector<16x8xf32> to vector<1x16x8xf32>
    %132 = vector.shape_cast %128 : vector<16x8xf32> to vector<1x16x8xf32>
    %133 = vector.shape_cast %129 : vector<16x8xf32> to vector<1x16x8xf32>
    %134 = tpu.concatenate %130, %131, %132, %133 in 0 : vector<1x16x8xf32>, vector<1x16x8xf32>, vector<1x16x8xf32>, vector<1x16x8xf32> -> vector<4x16x8xf32>
    %135 = arith.truncf %134 : vector<4x16x8xf32> to vector<4x16x8xbf16>
    %136 = vector.extract_strided_slice %118 {offsets = [0, 0], sizes = [32, 8], strides = [1, 1]} : vector<32x32xf32> to vector<32x8xf32>
    %137 = vector.extract_strided_slice %118 {offsets = [0, 8], sizes = [32, 8], strides = [1, 1]} : vector<32x32xf32> to vector<32x8xf32>
    %138 = vector.extract_strided_slice %118 {offsets = [0, 16], sizes = [32, 8], strides = [1, 1]} : vector<32x32xf32> to vector<32x8xf32>
    %139 = vector.extract_strided_slice %118 {offsets = [0, 24], sizes = [32, 8], strides = [1, 1]} : vector<32x32xf32> to vector<32x8xf32>
    %140 = vector.shape_cast %136 : vector<32x8xf32> to vector<1x32x8xf32>
    %141 = vector.shape_cast %137 : vector<32x8xf32> to vector<1x32x8xf32>
    %142 = vector.shape_cast %138 : vector<32x8xf32> to vector<1x32x8xf32>
    %143 = vector.shape_cast %139 : vector<32x8xf32> to vector<1x32x8xf32>
    %144 = tpu.concatenate %140, %141, %142, %143 in 0 : vector<1x32x8xf32>, vector<1x32x8xf32>, vector<1x32x8xf32>, vector<1x32x8xf32> -> vector<4x32x8xf32>
    %145 = arith.truncf %144 : vector<4x32x8xf32> to vector<4x32x8xbf16>
    %146 = vector.extract_strided_slice %123 {offsets = [0, 0], sizes = [32, 8], strides = [1, 1]} : vector<32x32xf32> to vector<32x8xf32>
    %147 = vector.extract_strided_slice %123 {offsets = [0, 8], sizes = [32, 8], strides = [1, 1]} : vector<32x32xf32> to vector<32x8xf32>
    %148 = vector.extract_strided_slice %123 {offsets = [0, 16], sizes = [32, 8], strides = [1, 1]} : vector<32x32xf32> to vector<32x8xf32>
    %149 = vector.extract_strided_slice %123 {offsets = [0, 24], sizes = [32, 8], strides = [1, 1]} : vector<32x32xf32> to vector<32x8xf32>
    %150 = vector.shape_cast %146 : vector<32x8xf32> to vector<1x32x8xf32>
    %151 = vector.shape_cast %147 : vector<32x8xf32> to vector<1x32x8xf32>
    %152 = vector.shape_cast %148 : vector<32x8xf32> to vector<1x32x8xf32>
    %153 = vector.shape_cast %149 : vector<32x8xf32> to vector<1x32x8xf32>
    %154 = tpu.concatenate %150, %151, %152, %153 in 0 : vector<1x32x8xf32>, vector<1x32x8xf32>, vector<1x32x8xf32>, vector<1x32x8xf32> -> vector<4x32x8xf32>
    %155 = arith.truncf %154 : vector<4x32x8xf32> to vector<4x32x8xbf16>
    "tpu.trace_start"() <{level = 10 : i32, message = "hqd,hkd->hqk"}> : () -> ()
    %cst_42 = arith.constant dense<0.000000e+00> : vector<4x16x32xf32>
    %156 = tpu.matmul %135, %145, %cst_42 {dimension_numbers = #tpu.dot_dimension_numbers<[2], [2], [1], [1], [0, 0, 0, 1, 1, 1], [0], [0]>} : vector<4x16x8xbf16>, vector<4x32x8xbf16>, vector<4x16x32xf32> -> vector<4x16x32xf32>
    "tpu.trace_stop"() : () -> ()
    %157 = arith.addf %156, %8 : vector<4x16x32xf32>
    %cst_43 = arith.constant dense<0xFF800000> : vector<4x16xf32>
    %158 = vector.multi_reduction <maximumf>, %157, %cst_43 [2] : vector<4x16x32xf32> to vector<4x16xf32>
    %159 = vector.shape_cast %158 : vector<4x16xf32> to vector<4x16x1xf32>
    %160 = vector.broadcast %159 : vector<4x16x1xf32> to vector<4x16x32xf32>
    %161 = arith.subf %157, %160 : vector<4x16x32xf32>
    %162 = math.exp %161 : vector<4x16x32xf32>
    %cst_44 = arith.constant dense<0.000000e+00> : vector<4x16xf32>
    %163 = vector.multi_reduction <add>, %162, %cst_44 [2] : vector<4x16x32xf32> to vector<4x16xf32>
    %164 = vector.shape_cast %163 : vector<4x16xf32> to vector<4x16x1xf32>
    %165 = vector.broadcast %164 : vector<4x16x1xf32> to vector<4x16x32xf32>
    %166 = arith.divf %162, %165 : vector<4x16x32xf32>
    %167 = arith.truncf %166 : vector<4x16x32xf32> to vector<4x16x32xbf16>
    "tpu.trace_start"() <{level = 10 : i32, message = "hqk,hkd->hqd"}> : () -> ()
    %cst_45 = arith.constant dense<0.000000e+00> : vector<4x16x8xf32>
    %168 = tpu.matmul %167, %155, %cst_45 {dimension_numbers = #tpu.dot_dimension_numbers<[2], [1], [1], [2], [0, 0, 0, 1, 1, 2], [0], [0]>} : vector<4x16x32xbf16>, vector<4x32x8xbf16>, vector<4x16x8xf32> -> vector<4x16x8xf32>
    "tpu.trace_stop"() : () -> ()
    %169 = vector.extract_strided_slice %168 {offsets = [0, 0, 0], sizes = [1, 16, 8], strides = [1, 1, 1]} : vector<4x16x8xf32> to vector<1x16x8xf32>
    %170 = vector.shape_cast %169 : vector<1x16x8xf32> to vector<16x8xf32>
    %171 = vector.extract_strided_slice %168 {offsets = [1, 0, 0], sizes = [1, 16, 8], strides = [1, 1, 1]} : vector<4x16x8xf32> to vector<1x16x8xf32>
    %172 = vector.shape_cast %171 : vector<1x16x8xf32> to vector<16x8xf32>
    %173 = vector.extract_strided_slice %168 {offsets = [2, 0, 0], sizes = [1, 16, 8], strides = [1, 1, 1]} : vector<4x16x8xf32> to vector<1x16x8xf32>
    %174 = vector.shape_cast %173 : vector<1x16x8xf32> to vector<16x8xf32>
    %175 = vector.extract_strided_slice %168 {offsets = [3, 0, 0], sizes = [1, 16, 8], strides = [1, 1, 1]} : vector<4x16x8xf32> to vector<1x16x8xf32>
    %176 = vector.shape_cast %175 : vector<1x16x8xf32> to vector<16x8xf32>
    %177 = tpu.concatenate %170, %172, %174, %176 in 1 : vector<16x8xf32>, vector<16x8xf32>, vector<16x8xf32>, vector<16x8xf32> -> vector<16x32xf32>
    %178 = arith.truncf %177 : vector<16x32xf32> to vector<16x32xbf16>
    %cst_46 = arith.constant dense<0.000000e+00> : vector<16x32xf32>
    %179 = tpu.matmul %178, %124, %cst_46 {dimension_numbers = #tpu.dot_dimension_numbers<[1], [0], [0], [1], [0, 0, 1, 1], [], []>} : vector<16x32xbf16>, vector<32x32xbf16>, vector<16x32xf32> -> vector<16x32xf32>
    %180 = vector.broadcast %125 : vector<1x32xf32> to vector<16x32xf32>
    %181 = arith.addf %179, %180 : vector<16x32xf32>
    %182 = vector.extract_strided_slice %166 {offsets = [0, 0, 0], sizes = [1, 16, 32], strides = [1, 1, 1]} : vector<4x16x32xf32> to vector<1x16x32xf32>
    %183 = vector.shape_cast %182 : vector<1x16x32xf32> to vector<16x32xf32>
    %184 = vector.extract_strided_slice %166 {offsets = [1, 0, 0], sizes = [1, 16, 32], strides = [1, 1, 1]} : vector<4x16x32xf32> to vector<1x16x32xf32>
    %185 = vector.shape_cast %184 : vector<1x16x32xf32> to vector<16x32xf32>
    %186 = vector.extract_strided_slice %166 {offsets = [2, 0, 0], sizes = [1, 16, 32], strides = [1, 1, 1]} : vector<4x16x32xf32> to vector<1x16x32xf32>
    %187 = vector.shape_cast %186 : vector<1x16x32xf32> to vector<16x32xf32>
    %188 = vector.extract_strided_slice %166 {offsets = [3, 0, 0], sizes = [1, 16, 32], strides = [1, 1, 1]} : vector<4x16x32xf32> to vector<1x16x32xf32>
    %189 = vector.shape_cast %188 : vector<1x16x32xf32> to vector<16x32xf32>
    %190 = tpu.concatenate %183, %185, %187, %189 in 1 : vector<16x32xf32>, vector<16x32xf32>, vector<16x32xf32>, vector<16x32xf32> -> vector<16x128xf32>
    %c0_47 = arith.constant 0 : index
    %c0_48 = arith.constant 0 : index
    %c0_49 = arith.constant 0 : index
    %191 = vector.load %arg7[%c0_47, %c0_48, %c0_49] : memref<2x16x128xf32, #tpu.memory_space<vmem>>, vector<1x16x128xf32>
    %192 = vector.shape_cast %191 : vector<1x16x128xf32> to vector<16x128xf32>
    %193 = vector.shape_cast %190 : vector<16x128xf32> to vector<1x16x128xf32>
    tpu.vector_store %arg7[%c0_47, %c0_48, %c0_49], %193 {strides = array<i32>} : memref<2x16x128xf32, #tpu.memory_space<vmem>>, vector<1x16x128xf32>,
    %194 = arith.addf %107, %181 : vector<16x32xf32>
    %c12 = arith.constant 12 : index
    %c0_50 = arith.constant 0 : index
    %195 = vector.load %arg5[%c12, %c0_50] : memref<32x64xf32, #tpu.memory_space<vmem>>, vector<1x32xf32>
    %c13 = arith.constant 13 : index
    %c0_51 = arith.constant 0 : index
    %196 = vector.load %arg5[%c13, %c0_51] : memref<32x64xf32, #tpu.memory_space<vmem>>, vector<1x32xf32>
    %cst_52 = arith.constant dense<0.000000e+00> : vector<16xf32>
    %197 = vector.multi_reduction <add>, %194, %cst_52 [1] : vector<16x32xf32> to vector<16xf32>
    %198 = vector.shape_cast %197 : vector<16xf32> to vector<16x1xf32>
    %cst_53 = arith.constant 3.200000e+01 : f32
    %199 = vector.broadcast %cst_53 : f32 to vector<16x1xf32>
    %200 = arith.divf %198, %199 : vector<16x1xf32>
    %201 = vector.broadcast %200 : vector<16x1xf32> to vector<16x32xf32>
    %202 = arith.subf %194, %201 : vector<16x32xf32>
    %203 = arith.mulf %202, %202 : vector<16x32xf32>
    %cst_54 = arith.constant dense<0.000000e+00> : vector<16xf32>
    %204 = vector.multi_reduction <add>, %203, %cst_54 [1] : vector<16x32xf32> to vector<16xf32>
    %205 = vector.shape_cast %204 : vector<16xf32> to vector<16x1xf32>
    %cst_55 = arith.constant 3.200000e+01 : f32
    %206 = vector.broadcast %cst_55 : f32 to vector<16x1xf32>
    %207 = arith.divf %205, %206 : vector<16x1xf32>
    %208 = vector.broadcast %200 : vector<16x1xf32> to vector<16x32xf32>
    %209 = arith.subf %194, %208 : vector<16x32xf32>
    %cst_56 = arith.constant 9.99999974E-6 : f32
    %210 = vector.broadcast %cst_56 : f32 to vector<16x1xf32>
    %211 = arith.addf %207, %210 : vector<16x1xf32>
    %212 = math.rsqrt %211 : vector<16x1xf32>
    %213 = vector.broadcast %212 : vector<16x1xf32> to vector<16x32xf32>
    %214 = arith.mulf %209, %213 : vector<16x32xf32>
    %215 = vector.broadcast %195 : vector<1x32xf32> to vector<16x32xf32>
    %216 = arith.mulf %214, %215 : vector<16x32xf32>
    %217 = vector.broadcast %196 : vector<1x32xf32> to vector<16x32xf32>
    %218 = arith.addf %216, %217 : vector<16x32xf32>
    %219 = arith.truncf %218 : vector<16x32xf32> to vector<16x32xbf16>
    %c256 = arith.constant 256 : index
    %c0_57 = arith.constant 0 : index
    %220 = vector.load %arg4[%c256, %c0_57] : memref<704x64xbf16, #tpu.memory_space<vmem>>, vector<32x64xbf16>
    %cst_58 = arith.constant dense<0.000000e+00> : vector<16x64xf32>
    %221 = tpu.matmul %219, %220, %cst_58 {dimension_numbers = #tpu.dot_dimension_numbers<[1], [0], [0], [1], [0, 0, 1, 1], [], []>} : vector<16x32xbf16>, vector<32x64xbf16>, vector<16x64xf32> -> vector<16x64xf32>
    %c8 = arith.constant 8 : index
    %c0_59 = arith.constant 0 : index
    %222 = vector.load %arg5[%c8, %c0_59] : memref<32x64xf32, #tpu.memory_space<vmem>>, vector<1x64xf32>
    %223 = vector.broadcast %222 : vector<1x64xf32> to vector<16x64xf32>
    %224 = arith.addf %221, %223 : vector<16x64xf32>
    %cst_60 = arith.constant 0.000000e+00 : f32
    %225 = vector.broadcast %cst_60 : f32 to vector<16x64xf32>
    %226 = arith.maximumf %224, %225 : vector<16x64xf32>
    %227 = arith.truncf %226 : vector<16x64xf32> to vector<16x64xbf16>
    %c288 = arith.constant 288 : index
    %c0_61 = arith.constant 0 : index
    %228 = vector.load %arg4[%c288, %c0_61] : memref<704x64xbf16, #tpu.memory_space<vmem>>, vector<64x32xbf16>
    %cst_62 = arith.constant dense<0.000000e+00> : vector<16x32xf32>
    %229 = tpu.matmul %227, %228, %cst_62 {dimension_numbers = #tpu.dot_dimension_numbers<[1], [0], [0], [1], [0, 0, 1, 1], [], []>} : vector<16x64xbf16>, vector<64x32xbf16>, vector<16x32xf32> -> vector<16x32xf32>
    %c9 = arith.constant 9 : index
    %c0_63 = arith.constant 0 : index
    %230 = vector.load %arg5[%c9, %c0_63] : memref<32x64xf32, #tpu.memory_space<vmem>>, vector<1x32xf32>
    %231 = vector.broadcast %230 : vector<1x32xf32> to vector<16x32xf32>
    %232 = arith.addf %229, %231 : vector<16x32xf32>
    %233 = arith.addf %218, %232 : vector<16x32xf32>
    %c14 = arith.constant 14 : index
    %c0_64 = arith.constant 0 : index
    %234 = vector.load %arg5[%c14, %c0_64] : memref<32x64xf32, #tpu.memory_space<vmem>>, vector<1x32xf32>
    %c15 = arith.constant 15 : index
    %c0_65 = arith.constant 0 : index
    %235 = vector.load %arg5[%c15, %c0_65] : memref<32x64xf32, #tpu.memory_space<vmem>>, vector<1x32xf32>
    %cst_66 = arith.constant dense<0.000000e+00> : vector<16xf32>
    %236 = vector.multi_reduction <add>, %233, %cst_66 [1] : vector<16x32xf32> to vector<16xf32>
    %237 = vector.shape_cast %236 : vector<16xf32> to vector<16x1xf32>
    %cst_67 = arith.constant 3.200000e+01 : f32
    %238 = vector.broadcast %cst_67 : f32 to vector<16x1xf32>
    %239 = arith.divf %237, %238 : vector<16x1xf32>
    %240 = vector.broadcast %239 : vector<16x1xf32> to vector<16x32xf32>
    %241 = arith.subf %233, %240 : vector<16x32xf32>
    %242 = arith.mulf %241, %241 : vector<16x32xf32>
    %cst_68 = arith.constant dense<0.000000e+00> : vector<16xf32>
    %243 = vector.multi_reduction <add>, %242, %cst_68 [1] : vector<16x32xf32> to vector<16xf32>
    %244 = vector.shape_cast %243 : vector<16xf32> to vector<16x1xf32>
    %cst_69 = arith.constant 3.200000e+01 : f32
    %245 = vector.broadcast %cst_69 : f32 to vector<16x1xf32>
    %246 = arith.divf %244, %245 : vector<16x1xf32>
    %247 = vector.broadcast %239 : vector<16x1xf32> to vector<16x32xf32>
    %248 = arith.subf %233, %247 : vector<16x32xf32>
    %cst_70 = arith.constant 9.99999974E-6 : f32
    %249 = vector.broadcast %cst_70 : f32 to vector<16x1xf32>
    %250 = arith.addf %246, %249 : vector<16x1xf32>
    %251 = math.rsqrt %250 : vector<16x1xf32>
    %252 = vector.broadcast %251 : vector<16x1xf32> to vector<16x32xf32>
    %253 = arith.mulf %248, %252 : vector<16x32xf32>
    %254 = vector.broadcast %234 : vector<1x32xf32> to vector<16x32xf32>
    %255 = arith.mulf %253, %254 : vector<16x32xf32>
    %256 = vector.broadcast %235 : vector<1x32xf32> to vector<16x32xf32>
    %257 = arith.addf %255, %256 : vector<16x32xf32>
    %258 = arith.truncf %257 : vector<16x32xf32> to vector<16x32xbf16>
    %c352 = arith.constant 352 : index
    %c0_71 = arith.constant 0 : index
    %259 = vector.load %arg4[%c352, %c0_71] : memref<704x64xbf16, #tpu.memory_space<vmem>>, vector<32x32xbf16>
    %cst_72 = arith.constant dense<0.000000e+00> : vector<16x32xf32>
    %260 = tpu.matmul %258, %259, %cst_72 {dimension_numbers = #tpu.dot_dimension_numbers<[1], [0], [0], [1], [0, 0, 1, 1], [], []>} : vector<16x32xbf16>, vector<32x32xbf16>, vector<16x32xf32> -> vector<16x32xf32>
    %c16 = arith.constant 16 : index
    %c0_73 = arith.constant 0 : index
    %261 = vector.load %arg5[%c16, %c0_73] : memref<32x64xf32, #tpu.memory_space<vmem>>, vector<1x32xf32>
    %262 = vector.broadcast %261 : vector<1x32xf32> to vector<16x32xf32>
    %263 = arith.addf %260, %262 : vector<16x32xf32>
    %c384 = arith.constant 384 : index
    %c0_74 = arith.constant 0 : index
    %264 = vector.load %arg4[%c384, %c0_74] : memref<704x64xbf16, #tpu.memory_space<vmem>>, vector<32x32xbf16>
    %cst_75 = arith.constant dense<0.000000e+00> : vector<16x32xf32>
    %265 = tpu.matmul %258, %264, %cst_75 {dimension_numbers = #tpu.dot_dimension_numbers<[1], [0], [0], [1], [0, 0, 1, 1], [], []>} : vector<16x32xbf16>, vector<32x32xbf16>, vector<16x32xf32> -> vector<16x32xf32>
    %c17 = arith.constant 17 : index
    %c0_76 = arith.constant 0 : index
    %266 = vector.load %arg5[%c17, %c0_76] : memref<32x64xf32, #tpu.memory_space<vmem>>, vector<1x32xf32>
    %267 = vector.broadcast %266 : vector<1x32xf32> to vector<16x32xf32>
    %268 = arith.addf %265, %267 : vector<16x32xf32>
    %c416 = arith.constant 416 : index
    %c0_77 = arith.constant 0 : index
    %269 = vector.load %arg4[%c416, %c0_77] : memref<704x64xbf16, #tpu.memory_space<vmem>>, vector<32x32xbf16>
    %cst_78 = arith.constant dense<0.000000e+00> : vector<16x32xf32>
    %270 = tpu.matmul %258, %269, %cst_78 {dimension_numbers = #tpu.dot_dimension_numbers<[1], [0], [0], [1], [0, 0, 1, 1], [], []>} : vector<16x32xbf16>, vector<32x32xbf16>, vector<16x32xf32> -> vector<16x32xf32>
    %c18 = arith.constant 18 : index
    %c0_79 = arith.constant 0 : index
    %271 = vector.load %arg5[%c18, %c0_79] : memref<32x64xf32, #tpu.memory_space<vmem>>, vector<1x32xf32>
    %272 = vector.broadcast %271 : vector<1x32xf32> to vector<16x32xf32>
    %273 = arith.addf %270, %272 : vector<16x32xf32>
    %c448 = arith.constant 448 : index
    %c0_80 = arith.constant 0 : index
    %274 = vector.load %arg4[%c448, %c0_80] : memref<704x64xbf16, #tpu.memory_space<vmem>>, vector<32x32xbf16>
    %c19 = arith.constant 19 : index
    %c0_81 = arith.constant 0 : index
    %275 = vector.load %arg5[%c19, %c0_81] : memref<32x64xf32, #tpu.memory_space<vmem>>, vector<1x32xf32>
    %276 = vector.extract_strided_slice %263 {offsets = [0, 0], sizes = [16, 8], strides = [1, 1]} : vector<16x32xf32> to vector<16x8xf32>
    %277 = vector.extract_strided_slice %263 {offsets = [0, 8], sizes = [16, 8], strides = [1, 1]} : vector<16x32xf32> to vector<16x8xf32>
    %278 = vector.extract_strided_slice %263 {offsets = [0, 16], sizes = [16, 8], strides = [1, 1]} : vector<16x32xf32> to vector<16x8xf32>
    %279 = vector.extract_strided_slice %263 {offsets = [0, 24], sizes = [16, 8], strides = [1, 1]} : vector<16x32xf32> to vector<16x8xf32>
    %280 = vector.shape_cast %276 : vector<16x8xf32> to vector<1x16x8xf32>
    %281 = vector.shape_cast %277 : vector<16x8xf32> to vector<1x16x8xf32>
    %282 = vector.shape_cast %278 : vector<16x8xf32> to vector<1x16x8xf32>
    %283 = vector.shape_cast %279 : vector<16x8xf32> to vector<1x16x8xf32>
    %284 = tpu.concatenate %280, %281, %282, %283 in 0 : vector<1x16x8xf32>, vector<1x16x8xf32>, vector<1x16x8xf32>, vector<1x16x8xf32> -> vector<4x16x8xf32>
    %285 = arith.truncf %284 : vector<4x16x8xf32> to vector<4x16x8xbf16>
    %286 = vector.extract_strided_slice %268 {offsets = [0, 0], sizes = [16, 8], strides = [1, 1]} : vector<16x32xf32> to vector<16x8xf32>
    %287 = vector.extract_strided_slice %268 {offsets = [0, 8], sizes = [16, 8], strides = [1, 1]} : vector<16x32xf32> to vector<16x8xf32>
    %288 = vector.extract_strided_slice %268 {offsets = [0, 16], sizes = [16, 8], strides = [1, 1]} : vector<16x32xf32> to vector<16x8xf32>
    %289 = vector.extract_strided_slice %268 {offsets = [0, 24], sizes = [16, 8], strides = [1, 1]} : vector<16x32xf32> to vector<16x8xf32>
    %290 = vector.shape_cast %286 : vector<16x8xf32> to vector<1x16x8xf32>
    %291 = vector.shape_cast %287 : vector<16x8xf32> to vector<1x16x8xf32>
    %292 = vector.shape_cast %288 : vector<16x8xf32> to vector<1x16x8xf32>
    %293 = vector.shape_cast %289 : vector<16x8xf32> to vector<1x16x8xf32>
    %294 = tpu.concatenate %290, %291, %292, %293 in 0 : vector<1x16x8xf32>, vector<1x16x8xf32>, vector<1x16x8xf32>, vector<1x16x8xf32> -> vector<4x16x8xf32>
    %295 = arith.truncf %294 : vector<4x16x8xf32> to vector<4x16x8xbf16>
    %296 = vector.extract_strided_slice %273 {offsets = [0, 0], sizes = [16, 8], strides = [1, 1]} : vector<16x32xf32> to vector<16x8xf32>
    %297 = vector.extract_strided_slice %273 {offsets = [0, 8], sizes = [16, 8], strides = [1, 1]} : vector<16x32xf32> to vector<16x8xf32>
    %298 = vector.extract_strided_slice %273 {offsets = [0, 16], sizes = [16, 8], strides = [1, 1]} : vector<16x32xf32> to vector<16x8xf32>
    %299 = vector.extract_strided_slice %273 {offsets = [0, 24], sizes = [16, 8], strides = [1, 1]} : vector<16x32xf32> to vector<16x8xf32>
    %300 = vector.shape_cast %296 : vector<16x8xf32> to vector<1x16x8xf32>
    %301 = vector.shape_cast %297 : vector<16x8xf32> to vector<1x16x8xf32>
    %302 = vector.shape_cast %298 : vector<16x8xf32> to vector<1x16x8xf32>
    %303 = vector.shape_cast %299 : vector<16x8xf32> to vector<1x16x8xf32>
    %304 = tpu.concatenate %300, %301, %302, %303 in 0 : vector<1x16x8xf32>, vector<1x16x8xf32>, vector<1x16x8xf32>, vector<1x16x8xf32> -> vector<4x16x8xf32>
    %305 = arith.truncf %304 : vector<4x16x8xf32> to vector<4x16x8xbf16>
    "tpu.trace_start"() <{level = 10 : i32, message = "hqd,hkd->hqk"}> : () -> ()
    %cst_82 = arith.constant dense<0.000000e+00> : vector<4x16x16xf32>
    %306 = tpu.matmul %285, %295, %cst_82 {dimension_numbers = #tpu.dot_dimension_numbers<[2], [2], [1], [1], [0, 0, 0, 1, 1, 1], [0], [0]>} : vector<4x16x8xbf16>, vector<4x16x8xbf16>, vector<4x16x16xf32> -> vector<4x16x16xf32>
    "tpu.trace_stop"() : () -> ()
    %307 = arith.addf %306, %5 : vector<4x16x16xf32>
    %cst_83 = arith.constant dense<0xFF800000> : vector<4x16xf32>
    %308 = vector.multi_reduction <maximumf>, %307, %cst_83 [2] : vector<4x16x16xf32> to vector<4x16xf32>
    %309 = vector.shape_cast %308 : vector<4x16xf32> to vector<4x16x1xf32>
    %310 = vector.broadcast %309 : vector<4x16x1xf32> to vector<4x16x16xf32>
    %311 = arith.subf %307, %310 : vector<4x16x16xf32>
    %312 = math.exp %311 : vector<4x16x16xf32>
    %cst_84 = arith.constant dense<0.000000e+00> : vector<4x16xf32>
    %313 = vector.multi_reduction <add>, %312, %cst_84 [2] : vector<4x16x16xf32> to vector<4x16xf32>
    %314 = vector.shape_cast %313 : vector<4x16xf32> to vector<4x16x1xf32>
    %315 = vector.broadcast %314 : vector<4x16x1xf32> to vector<4x16x16xf32>
    %316 = arith.divf %312, %315 : vector<4x16x16xf32>
    %317 = arith.truncf %316 : vector<4x16x16xf32> to vector<4x16x16xbf16>
    "tpu.trace_start"() <{level = 10 : i32, message = "hqk,hkd->hqd"}> : () -> ()
    %cst_85 = arith.constant dense<0.000000e+00> : vector<4x16x8xf32>
    %318 = tpu.matmul %317, %305, %cst_85 {dimension_numbers = #tpu.dot_dimension_numbers<[2], [1], [1], [2], [0, 0, 0, 1, 1, 2], [0], [0]>} : vector<4x16x16xbf16>, vector<4x16x8xbf16>, vector<4x16x8xf32> -> vector<4x16x8xf32>
    "tpu.trace_stop"() : () -> ()
    %319 = vector.extract_strided_slice %318 {offsets = [0, 0, 0], sizes = [1, 16, 8], strides = [1, 1, 1]} : vector<4x16x8xf32> to vector<1x16x8xf32>
    %320 = vector.shape_cast %319 : vector<1x16x8xf32> to vector<16x8xf32>
    %321 = vector.extract_strided_slice %318 {offsets = [1, 0, 0], sizes = [1, 16, 8], strides = [1, 1, 1]} : vector<4x16x8xf32> to vector<1x16x8xf32>
    %322 = vector.shape_cast %321 : vector<1x16x8xf32> to vector<16x8xf32>
    %323 = vector.extract_strided_slice %318 {offsets = [2, 0, 0], sizes = [1, 16, 8], strides = [1, 1, 1]} : vector<4x16x8xf32> to vector<1x16x8xf32>
    %324 = vector.shape_cast %323 : vector<1x16x8xf32> to vector<16x8xf32>
    %325 = vector.extract_strided_slice %318 {offsets = [3, 0, 0], sizes = [1, 16, 8], strides = [1, 1, 1]} : vector<4x16x8xf32> to vector<1x16x8xf32>
    %326 = vector.shape_cast %325 : vector<1x16x8xf32> to vector<16x8xf32>
    %327 = tpu.concatenate %320, %322, %324, %326 in 1 : vector<16x8xf32>, vector<16x8xf32>, vector<16x8xf32>, vector<16x8xf32> -> vector<16x32xf32>
    %328 = arith.truncf %327 : vector<16x32xf32> to vector<16x32xbf16>
    %cst_86 = arith.constant dense<0.000000e+00> : vector<16x32xf32>
    %329 = tpu.matmul %328, %274, %cst_86 {dimension_numbers = #tpu.dot_dimension_numbers<[1], [0], [0], [1], [0, 0, 1, 1], [], []>} : vector<16x32xbf16>, vector<32x32xbf16>, vector<16x32xf32> -> vector<16x32xf32>
    %330 = vector.broadcast %275 : vector<1x32xf32> to vector<16x32xf32>
    %331 = arith.addf %329, %330 : vector<16x32xf32>
    %332 = arith.addf %257, %331 : vector<16x32xf32>
    %c26 = arith.constant 26 : index
    %c0_87 = arith.constant 0 : index
    %333 = vector.load %arg5[%c26, %c0_87] : memref<32x64xf32, #tpu.memory_space<vmem>>, vector<1x32xf32>
    %c27 = arith.constant 27 : index
    %c0_88 = arith.constant 0 : index
    %334 = vector.load %arg5[%c27, %c0_88] : memref<32x64xf32, #tpu.memory_space<vmem>>, vector<1x32xf32>
    %cst_89 = arith.constant dense<0.000000e+00> : vector<16xf32>
    %335 = vector.multi_reduction <add>, %332, %cst_89 [1] : vector<16x32xf32> to vector<16xf32>
    %336 = vector.shape_cast %335 : vector<16xf32> to vector<16x1xf32>
    %cst_90 = arith.constant 3.200000e+01 : f32
    %337 = vector.broadcast %cst_90 : f32 to vector<16x1xf32>
    %338 = arith.divf %336, %337 : vector<16x1xf32>
    %339 = vector.broadcast %338 : vector<16x1xf32> to vector<16x32xf32>
    %340 = arith.subf %332, %339 : vector<16x32xf32>
    %341 = arith.mulf %340, %340 : vector<16x32xf32>
    %cst_91 = arith.constant dense<0.000000e+00> : vector<16xf32>
    %342 = vector.multi_reduction <add>, %341, %cst_91 [1] : vector<16x32xf32> to vector<16xf32>
    %343 = vector.shape_cast %342 : vector<16xf32> to vector<16x1xf32>
    %cst_92 = arith.constant 3.200000e+01 : f32
    %344 = vector.broadcast %cst_92 : f32 to vector<16x1xf32>
    %345 = arith.divf %343, %344 : vector<16x1xf32>
    %346 = vector.broadcast %338 : vector<16x1xf32> to vector<16x32xf32>
    %347 = arith.subf %332, %346 : vector<16x32xf32>
    %cst_93 = arith.constant 9.99999974E-6 : f32
    %348 = vector.broadcast %cst_93 : f32 to vector<16x1xf32>
    %349 = arith.addf %345, %348 : vector<16x1xf32>
    %350 = math.rsqrt %349 : vector<16x1xf32>
    %351 = vector.broadcast %350 : vector<16x1xf32> to vector<16x32xf32>
    %352 = arith.mulf %347, %351 : vector<16x32xf32>
    %353 = vector.broadcast %333 : vector<1x32xf32> to vector<16x32xf32>
    %354 = arith.mulf %352, %353 : vector<16x32xf32>
    %355 = vector.broadcast %334 : vector<1x32xf32> to vector<16x32xf32>
    %356 = arith.addf %354, %355 : vector<16x32xf32>
    %357 = arith.truncf %356 : vector<16x32xf32> to vector<16x32xbf16>
    %c480 = arith.constant 480 : index
    %c0_94 = arith.constant 0 : index
    %358 = vector.load %arg4[%c480, %c0_94] : memref<704x64xbf16, #tpu.memory_space<vmem>>, vector<32x32xbf16>
    %cst_95 = arith.constant dense<0.000000e+00> : vector<16x32xf32>
    %359 = tpu.matmul %357, %358, %cst_95 {dimension_numbers = #tpu.dot_dimension_numbers<[1], [0], [0], [1], [0, 0, 1, 1], [], []>} : vector<16x32xbf16>, vector<32x32xbf16>, vector<16x32xf32> -> vector<16x32xf32>
    %c20 = arith.constant 20 : index
    %c0_96 = arith.constant 0 : index
    %360 = vector.load %arg5[%c20, %c0_96] : memref<32x64xf32, #tpu.memory_space<vmem>>, vector<1x32xf32>
    %361 = vector.broadcast %360 : vector<1x32xf32> to vector<16x32xf32>
    %362 = arith.addf %359, %361 : vector<16x32xf32>
    %c512 = arith.constant 512 : index
    %c0_97 = arith.constant 0 : index
    %363 = vector.load %arg4[%c512, %c0_97] : memref<704x64xbf16, #tpu.memory_space<vmem>>, vector<32x32xbf16>
    %cst_98 = arith.constant dense<0.000000e+00> : vector<32x32xf32>
    %364 = tpu.matmul %2, %363, %cst_98 {dimension_numbers = #tpu.dot_dimension_numbers<[1], [0], [0], [1], [0, 0, 1, 1], [], []>} : vector<32x32xbf16>, vector<32x32xbf16>, vector<32x32xf32> -> vector<32x32xf32>
    %c21 = arith.constant 21 : index
    %c0_99 = arith.constant 0 : index
    %365 = vector.load %arg5[%c21, %c0_99] : memref<32x64xf32, #tpu.memory_space<vmem>>, vector<1x32xf32>
    %366 = vector.broadcast %365 : vector<1x32xf32> to vector<32x32xf32>
    %367 = arith.addf %364, %366 : vector<32x32xf32>
    %c544 = arith.constant 544 : index
    %c0_100 = arith.constant 0 : index
    %368 = vector.load %arg4[%c544, %c0_100] : memref<704x64xbf16, #tpu.memory_space<vmem>>, vector<32x32xbf16>
    %cst_101 = arith.constant dense<0.000000e+00> : vector<32x32xf32>
    %369 = tpu.matmul %2, %368, %cst_101 {dimension_numbers = #tpu.dot_dimension_numbers<[1], [0], [0], [1], [0, 0, 1, 1], [], []>} : vector<32x32xbf16>, vector<32x32xbf16>, vector<32x32xf32> -> vector<32x32xf32>
    %c22 = arith.constant 22 : index
    %c0_102 = arith.constant 0 : index
    %370 = vector.load %arg5[%c22, %c0_102] : memref<32x64xf32, #tpu.memory_space<vmem>>, vector<1x32xf32>
    %371 = vector.broadcast %370 : vector<1x32xf32> to vector<32x32xf32>
    %372 = arith.addf %369, %371 : vector<32x32xf32>
    %c576 = arith.constant 576 : index
    %c0_103 = arith.constant 0 : index
    %373 = vector.load %arg4[%c576, %c0_103] : memref<704x64xbf16, #tpu.memory_space<vmem>>, vector<32x32xbf16>
    %c23 = arith.constant 23 : index
    %c0_104 = arith.constant 0 : index
    %374 = vector.load %arg5[%c23, %c0_104] : memref<32x64xf32, #tpu.memory_space<vmem>>, vector<1x32xf32>
    %375 = vector.extract_strided_slice %362 {offsets = [0, 0], sizes = [16, 8], strides = [1, 1]} : vector<16x32xf32> to vector<16x8xf32>
    %376 = vector.extract_strided_slice %362 {offsets = [0, 8], sizes = [16, 8], strides = [1, 1]} : vector<16x32xf32> to vector<16x8xf32>
    %377 = vector.extract_strided_slice %362 {offsets = [0, 16], sizes = [16, 8], strides = [1, 1]} : vector<16x32xf32> to vector<16x8xf32>
    %378 = vector.extract_strided_slice %362 {offsets = [0, 24], sizes = [16, 8], strides = [1, 1]} : vector<16x32xf32> to vector<16x8xf32>
    %379 = vector.shape_cast %375 : vector<16x8xf32> to vector<1x16x8xf32>
    %380 = vector.shape_cast %376 : vector<16x8xf32> to vector<1x16x8xf32>
    %381 = vector.shape_cast %377 : vector<16x8xf32> to vector<1x16x8xf32>
    %382 = vector.shape_cast %378 : vector<16x8xf32> to vector<1x16x8xf32>
    %383 = tpu.concatenate %379, %380, %381, %382 in 0 : vector<1x16x8xf32>, vector<1x16x8xf32>, vector<1x16x8xf32>, vector<1x16x8xf32> -> vector<4x16x8xf32>
    %384 = arith.truncf %383 : vector<4x16x8xf32> to vector<4x16x8xbf16>
    %385 = vector.extract_strided_slice %367 {offsets = [0, 0], sizes = [32, 8], strides = [1, 1]} : vector<32x32xf32> to vector<32x8xf32>
    %386 = vector.extract_strided_slice %367 {offsets = [0, 8], sizes = [32, 8], strides = [1, 1]} : vector<32x32xf32> to vector<32x8xf32>
    %387 = vector.extract_strided_slice %367 {offsets = [0, 16], sizes = [32, 8], strides = [1, 1]} : vector<32x32xf32> to vector<32x8xf32>
    %388 = vector.extract_strided_slice %367 {offsets = [0, 24], sizes = [32, 8], strides = [1, 1]} : vector<32x32xf32> to vector<32x8xf32>
    %389 = vector.shape_cast %385 : vector<32x8xf32> to vector<1x32x8xf32>
    %390 = vector.shape_cast %386 : vector<32x8xf32> to vector<1x32x8xf32>
    %391 = vector.shape_cast %387 : vector<32x8xf32> to vector<1x32x8xf32>
    %392 = vector.shape_cast %388 : vector<32x8xf32> to vector<1x32x8xf32>
    %393 = tpu.concatenate %389, %390, %391, %392 in 0 : vector<1x32x8xf32>, vector<1x32x8xf32>, vector<1x32x8xf32>, vector<1x32x8xf32> -> vector<4x32x8xf32>
    %394 = arith.truncf %393 : vector<4x32x8xf32> to vector<4x32x8xbf16>
    %395 = vector.extract_strided_slice %372 {offsets = [0, 0], sizes = [32, 8], strides = [1, 1]} : vector<32x32xf32> to vector<32x8xf32>
    %396 = vector.extract_strided_slice %372 {offsets = [0, 8], sizes = [32, 8], strides = [1, 1]} : vector<32x32xf32> to vector<32x8xf32>
    %397 = vector.extract_strided_slice %372 {offsets = [0, 16], sizes = [32, 8], strides = [1, 1]} : vector<32x32xf32> to vector<32x8xf32>
    %398 = vector.extract_strided_slice %372 {offsets = [0, 24], sizes = [32, 8], strides = [1, 1]} : vector<32x32xf32> to vector<32x8xf32>
    %399 = vector.shape_cast %395 : vector<32x8xf32> to vector<1x32x8xf32>
    %400 = vector.shape_cast %396 : vector<32x8xf32> to vector<1x32x8xf32>
    %401 = vector.shape_cast %397 : vector<32x8xf32> to vector<1x32x8xf32>
    %402 = vector.shape_cast %398 : vector<32x8xf32> to vector<1x32x8xf32>
    %403 = tpu.concatenate %399, %400, %401, %402 in 0 : vector<1x32x8xf32>, vector<1x32x8xf32>, vector<1x32x8xf32>, vector<1x32x8xf32> -> vector<4x32x8xf32>
    %404 = arith.truncf %403 : vector<4x32x8xf32> to vector<4x32x8xbf16>
    "tpu.trace_start"() <{level = 10 : i32, message = "hqd,hkd->hqk"}> : () -> ()
    %cst_105 = arith.constant dense<0.000000e+00> : vector<4x16x32xf32>
    %405 = tpu.matmul %384, %394, %cst_105 {dimension_numbers = #tpu.dot_dimension_numbers<[2], [2], [1], [1], [0, 0, 0, 1, 1, 1], [0], [0]>} : vector<4x16x8xbf16>, vector<4x32x8xbf16>, vector<4x16x32xf32> -> vector<4x16x32xf32>
    "tpu.trace_stop"() : () -> ()
    %406 = arith.addf %405, %8 : vector<4x16x32xf32>
    %cst_106 = arith.constant dense<0xFF800000> : vector<4x16xf32>
    %407 = vector.multi_reduction <maximumf>, %406, %cst_106 [2] : vector<4x16x32xf32> to vector<4x16xf32>
    %408 = vector.shape_cast %407 : vector<4x16xf32> to vector<4x16x1xf32>
    %409 = vector.broadcast %408 : vector<4x16x1xf32> to vector<4x16x32xf32>
    %410 = arith.subf %406, %409 : vector<4x16x32xf32>
    %411 = math.exp %410 : vector<4x16x32xf32>
    %cst_107 = arith.constant dense<0.000000e+00> : vector<4x16xf32>
    %412 = vector.multi_reduction <add>, %411, %cst_107 [2] : vector<4x16x32xf32> to vector<4x16xf32>
    %413 = vector.shape_cast %412 : vector<4x16xf32> to vector<4x16x1xf32>
    %414 = vector.broadcast %413 : vector<4x16x1xf32> to vector<4x16x32xf32>
    %415 = arith.divf %411, %414 : vector<4x16x32xf32>
    %416 = arith.truncf %415 : vector<4x16x32xf32> to vector<4x16x32xbf16>
    "tpu.trace_start"() <{level = 10 : i32, message = "hqk,hkd->hqd"}> : () -> ()
    %cst_108 = arith.constant dense<0.000000e+00> : vector<4x16x8xf32>
    %417 = tpu.matmul %416, %404, %cst_108 {dimension_numbers = #tpu.dot_dimension_numbers<[2], [1], [1], [2], [0, 0, 0, 1, 1, 2], [0], [0]>} : vector<4x16x32xbf16>, vector<4x32x8xbf16>, vector<4x16x8xf32> -> vector<4x16x8xf32>
    "tpu.trace_stop"() : () -> ()
    %418 = vector.extract_strided_slice %417 {offsets = [0, 0, 0], sizes = [1, 16, 8], strides = [1, 1, 1]} : vector<4x16x8xf32> to vector<1x16x8xf32>
    %419 = vector.shape_cast %418 : vector<1x16x8xf32> to vector<16x8xf32>
    %420 = vector.extract_strided_slice %417 {offsets = [1, 0, 0], sizes = [1, 16, 8], strides = [1, 1, 1]} : vector<4x16x8xf32> to vector<1x16x8xf32>
    %421 = vector.shape_cast %420 : vector<1x16x8xf32> to vector<16x8xf32>
    %422 = vector.extract_strided_slice %417 {offsets = [2, 0, 0], sizes = [1, 16, 8], strides = [1, 1, 1]} : vector<4x16x8xf32> to vector<1x16x8xf32>
    %423 = vector.shape_cast %422 : vector<1x16x8xf32> to vector<16x8xf32>
    %424 = vector.extract_strided_slice %417 {offsets = [3, 0, 0], sizes = [1, 16, 8], strides = [1, 1, 1]} : vector<4x16x8xf32> to vector<1x16x8xf32>
    %425 = vector.shape_cast %424 : vector<1x16x8xf32> to vector<16x8xf32>
    %426 = tpu.concatenate %419, %421, %423, %425 in 1 : vector<16x8xf32>, vector<16x8xf32>, vector<16x8xf32>, vector<16x8xf32> -> vector<16x32xf32>
    %427 = arith.truncf %426 : vector<16x32xf32> to vector<16x32xbf16>
    %cst_109 = arith.constant dense<0.000000e+00> : vector<16x32xf32>
    %428 = tpu.matmul %427, %373, %cst_109 {dimension_numbers = #tpu.dot_dimension_numbers<[1], [0], [0], [1], [0, 0, 1, 1], [], []>} : vector<16x32xbf16>, vector<32x32xbf16>, vector<16x32xf32> -> vector<16x32xf32>
    %429 = vector.broadcast %374 : vector<1x32xf32> to vector<16x32xf32>
    %430 = arith.addf %428, %429 : vector<16x32xf32>
    %431 = vector.extract_strided_slice %415 {offsets = [0, 0, 0], sizes = [1, 16, 32], strides = [1, 1, 1]} : vector<4x16x32xf32> to vector<1x16x32xf32>
    %432 = vector.shape_cast %431 : vector<1x16x32xf32> to vector<16x32xf32>
    %433 = vector.extract_strided_slice %415 {offsets = [1, 0, 0], sizes = [1, 16, 32], strides = [1, 1, 1]} : vector<4x16x32xf32> to vector<1x16x32xf32>
    %434 = vector.shape_cast %433 : vector<1x16x32xf32> to vector<16x32xf32>
    %435 = vector.extract_strided_slice %415 {offsets = [2, 0, 0], sizes = [1, 16, 32], strides = [1, 1, 1]} : vector<4x16x32xf32> to vector<1x16x32xf32>
    %436 = vector.shape_cast %435 : vector<1x16x32xf32> to vector<16x32xf32>
    %437 = vector.extract_strided_slice %415 {offsets = [3, 0, 0], sizes = [1, 16, 32], strides = [1, 1, 1]} : vector<4x16x32xf32> to vector<1x16x32xf32>
    %438 = vector.shape_cast %437 : vector<1x16x32xf32> to vector<16x32xf32>
    %439 = tpu.concatenate %432, %434, %436, %438 in 1 : vector<16x32xf32>, vector<16x32xf32>, vector<16x32xf32>, vector<16x32xf32> -> vector<16x128xf32>
    %c1_110 = arith.constant 1 : index
    %c0_111 = arith.constant 0 : index
    %c0_112 = arith.constant 0 : index
    %440 = vector.load %arg7[%c1_110, %c0_111, %c0_112] : memref<2x16x128xf32, #tpu.memory_space<vmem>>, vector<1x16x128xf32>
    %441 = vector.shape_cast %440 : vector<1x16x128xf32> to vector<16x128xf32>
    %442 = vector.shape_cast %439 : vector<16x128xf32> to vector<1x16x128xf32>
    tpu.vector_store %arg7[%c1_110, %c0_111, %c0_112], %442 {strides = array<i32>} : memref<2x16x128xf32, #tpu.memory_space<vmem>>, vector<1x16x128xf32>,
    %443 = arith.addf %356, %430 : vector<16x32xf32>
    %c28 = arith.constant 28 : index
    %c0_113 = arith.constant 0 : index
    %444 = vector.load %arg5[%c28, %c0_113] : memref<32x64xf32, #tpu.memory_space<vmem>>, vector<1x32xf32>
    %c29 = arith.constant 29 : index
    %c0_114 = arith.constant 0 : index
    %445 = vector.load %arg5[%c29, %c0_114] : memref<32x64xf32, #tpu.memory_space<vmem>>, vector<1x32xf32>
    %cst_115 = arith.constant dense<0.000000e+00> : vector<16xf32>
    %446 = vector.multi_reduction <add>, %443, %cst_115 [1] : vector<16x32xf32> to vector<16xf32>
    %447 = vector.shape_cast %446 : vector<16xf32> to vector<16x1xf32>
    %cst_116 = arith.constant 3.200000e+01 : f32
    %448 = vector.broadcast %cst_116 : f32 to vector<16x1xf32>
    %449 = arith.divf %447, %448 : vector<16x1xf32>
    %450 = vector.broadcast %449 : vector<16x1xf32> to vector<16x32xf32>
    %451 = arith.subf %443, %450 : vector<16x32xf32>
    %452 = arith.mulf %451, %451 : vector<16x32xf32>
    %cst_117 = arith.constant dense<0.000000e+00> : vector<16xf32>
    %453 = vector.multi_reduction <add>, %452, %cst_117 [1] : vector<16x32xf32> to vector<16xf32>
    %454 = vector.shape_cast %453 : vector<16xf32> to vector<16x1xf32>
    %cst_118 = arith.constant 3.200000e+01 : f32
    %455 = vector.broadcast %cst_118 : f32 to vector<16x1xf32>
    %456 = arith.divf %454, %455 : vector<16x1xf32>
    %457 = vector.broadcast %449 : vector<16x1xf32> to vector<16x32xf32>
    %458 = arith.subf %443, %457 : vector<16x32xf32>
    %cst_119 = arith.constant 9.99999974E-6 : f32
    %459 = vector.broadcast %cst_119 : f32 to vector<16x1xf32>
    %460 = arith.addf %456, %459 : vector<16x1xf32>
    %461 = math.rsqrt %460 : vector<16x1xf32>
    %462 = vector.broadcast %461 : vector<16x1xf32> to vector<16x32xf32>
    %463 = arith.mulf %458, %462 : vector<16x32xf32>
    %464 = vector.broadcast %444 : vector<1x32xf32> to vector<16x32xf32>
    %465 = arith.mulf %463, %464 : vector<16x32xf32>
    %466 = vector.broadcast %445 : vector<1x32xf32> to vector<16x32xf32>
    %467 = arith.addf %465, %466 : vector<16x32xf32>
    %468 = arith.truncf %467 : vector<16x32xf32> to vector<16x32xbf16>
    %c608 = arith.constant 608 : index
    %c0_120 = arith.constant 0 : index
    %469 = vector.load %arg4[%c608, %c0_120] : memref<704x64xbf16, #tpu.memory_space<vmem>>, vector<32x64xbf16>
    %cst_121 = arith.constant dense<0.000000e+00> : vector<16x64xf32>
    %470 = tpu.matmul %468, %469, %cst_121 {dimension_numbers = #tpu.dot_dimension_numbers<[1], [0], [0], [1], [0, 0, 1, 1], [], []>} : vector<16x32xbf16>, vector<32x64xbf16>, vector<16x64xf32> -> vector<16x64xf32>
    %c24 = arith.constant 24 : index
    %c0_122 = arith.constant 0 : index
    %471 = vector.load %arg5[%c24, %c0_122] : memref<32x64xf32, #tpu.memory_space<vmem>>, vector<1x64xf32>
    %472 = vector.broadcast %471 : vector<1x64xf32> to vector<16x64xf32>
    %473 = arith.addf %470, %472 : vector<16x64xf32>
    %cst_123 = arith.constant 0.000000e+00 : f32
    %474 = vector.broadcast %cst_123 : f32 to vector<16x64xf32>
    %475 = arith.maximumf %473, %474 : vector<16x64xf32>
    %476 = arith.truncf %475 : vector<16x64xf32> to vector<16x64xbf16>
    %c640 = arith.constant 640 : index
    %c0_124 = arith.constant 0 : index
    %477 = vector.load %arg4[%c640, %c0_124] : memref<704x64xbf16, #tpu.memory_space<vmem>>, vector<64x32xbf16>
    %cst_125 = arith.constant dense<0.000000e+00> : vector<16x32xf32>
    %478 = tpu.matmul %476, %477, %cst_125 {dimension_numbers = #tpu.dot_dimension_numbers<[1], [0], [0], [1], [0, 0, 1, 1], [], []>} : vector<16x64xbf16>, vector<64x32xbf16>, vector<16x32xf32> -> vector<16x32xf32>
    %c25 = arith.constant 25 : index
    %c0_126 = arith.constant 0 : index
    %479 = vector.load %arg5[%c25, %c0_126] : memref<32x64xf32, #tpu.memory_space<vmem>>, vector<1x32xf32>
    %480 = vector.broadcast %479 : vector<1x32xf32> to vector<16x32xf32>
    %481 = arith.addf %478, %480 : vector<16x32xf32>
    %482 = arith.addf %467, %481 : vector<16x32xf32>
    %c30 = arith.constant 30 : index
    %c0_127 = arith.constant 0 : index
    %483 = vector.load %arg5[%c30, %c0_127] : memref<32x64xf32, #tpu.memory_space<vmem>>, vector<1x32xf32>
    %c31 = arith.constant 31 : index
    %c0_128 = arith.constant 0 : index
    %484 = vector.load %arg5[%c31, %c0_128] : memref<32x64xf32, #tpu.memory_space<vmem>>, vector<1x32xf32>
    %cst_129 = arith.constant dense<0.000000e+00> : vector<16xf32>
    %485 = vector.multi_reduction <add>, %482, %cst_129 [1] : vector<16x32xf32> to vector<16xf32>
    %486 = vector.shape_cast %485 : vector<16xf32> to vector<16x1xf32>
    %cst_130 = arith.constant 3.200000e+01 : f32
    %487 = vector.broadcast %cst_130 : f32 to vector<16x1xf32>
    %488 = arith.divf %486, %487 : vector<16x1xf32>
    %489 = vector.broadcast %488 : vector<16x1xf32> to vector<16x32xf32>
    %490 = arith.subf %482, %489 : vector<16x32xf32>
    %491 = arith.mulf %490, %490 : vector<16x32xf32>
    %cst_131 = arith.constant dense<0.000000e+00> : vector<16xf32>
    %492 = vector.multi_reduction <add>, %491, %cst_131 [1] : vector<16x32xf32> to vector<16xf32>
    %493 = vector.shape_cast %492 : vector<16xf32> to vector<16x1xf32>
    %cst_132 = arith.constant 3.200000e+01 : f32
    %494 = vector.broadcast %cst_132 : f32 to vector<16x1xf32>
    %495 = arith.divf %493, %494 : vector<16x1xf32>
    %496 = vector.broadcast %488 : vector<16x1xf32> to vector<16x32xf32>
    %497 = arith.subf %482, %496 : vector<16x32xf32>
    %cst_133 = arith.constant 9.99999974E-6 : f32
    %498 = vector.broadcast %cst_133 : f32 to vector<16x1xf32>
    %499 = arith.addf %495, %498 : vector<16x1xf32>
    %500 = math.rsqrt %499 : vector<16x1xf32>
    %501 = vector.broadcast %500 : vector<16x1xf32> to vector<16x32xf32>
    %502 = arith.mulf %497, %501 : vector<16x32xf32>
    %503 = vector.broadcast %483 : vector<1x32xf32> to vector<16x32xf32>
    %504 = arith.mulf %502, %503 : vector<16x32xf32>
    %505 = vector.broadcast %484 : vector<1x32xf32> to vector<16x32xf32>
    %506 = arith.addf %504, %505 : vector<16x32xf32>
    %c0_134 = arith.constant 0 : index
    %c0_135 = arith.constant 0 : index
    %507 = vector.load %arg6[%c0_134, %c0_135] : memref<16x32xf32, #tpu.memory_space<vmem>>, vector<16x32xf32>
    tpu.vector_store %arg6[%c0_134, %c0_135], %506 {strides = array<i32>} : memref<16x32xf32, #tpu.memory_space<vmem>>, vector<16x32xf32>,
    return
  }
}

</mosaic_0001>

<bundles_post_ra>
// kernel: decoder_forward.1
= control target key start
LH: loop header
LB: loop body
LE: loop exit
PB: predicated region body
PF: predicated region fallthrough
CT: control target
= control target key end

     0   :  { %vm57_vm0 = vcmask 261120   ;;  %s4387_s17 = smov 104   ;;  %vm238_vm1 = vcmask 64512   ;;  %s4388_s18 = smov 112   ;;  %vm349_vm2 = vcmask 130048   ;;  %s5572_s4 = inlined_call_operand.vmem [shape: bf16[704,64], index: 4, kind: input, shape index: {}]   ;;  %s5573_s0 = inlined_call_operand.vmem [shape: f32[16,32], index: 0, kind: input, shape index: {}]   ;;  %s5574_s5 = inlined_call_operand.vmem [shape: f32[32,64], index: 5, kind: input, shape index: {}]   ;;  %s5575_s2 = inlined_call_operand.vmem [shape: f32[16,16], index: 2, kind: input, shape index: {}]   ;;  %s5576_s1 = inlined_call_operand.vmem [shape: f32[32,32], index: 1, kind: input, shape index: {}]   ;;  %s5577_s3 = inlined_call_operand.vmem [shape: f32[16,32], index: 3, kind: input, shape index: {}]   ;;  %s5578_s7 = inlined_call_operand.vmem [shape: f32[2,16,128], index: 7, kind: output, shape index: {1}]   ;;  %s5579_s6 = inlined_call_operand.vmem [shape: f32[16,32], index: 6, kind: output, shape index: {0}]  }
   0x1   :  { %v3843_v0 = vld [vmem:[%s5572_s4 + $0x8] sm:$0xff]  ;;  %v3845_v1 = vld [vmem:[%s5572_s4 + $0x18] sm:$0xff]  ;;  %v3842_v2 = vld [vmem:[%s5572_s4] sm:$0xff]  ;;  %s4389_s29 = smov 8   ;;  %s4390_s30 = smov 16  }
   0x2   :  { %v3844_v3 = vld [vmem:[%s5572_s4 + $0x10] sm:$0xff]  ;;  %v4451_v4 = vld [vmem:[%s5573_s0] sm:$0xff]  ;;  %67 = vmatpush.bf16.msra.mxu0 %v3843_v0  ;;  %99 = vmatpush.bf16.msra.mxu1 %v3845_v1  ;;  %v4456_v5 = vld [vmem:[%s5573_s0 + $0x8] sm:$0xff]  ;;  %s4386_s0 = smov 120   ;;  %s4391_s8 = smov 24  }
   0x3   :  { %v38_v6 = vpack.c.bf16 %v4456_v5, %v4451_v4  ;;  %v4197_v9 = vld [vmem:[%s5574_s5 + $0x1] ss:$0 sm:$0xff]  ;;  %v4196_v10 = vld [vmem:[%s5574_s5] ss:$0 sm:$0xff]  ;;  %v3847_v30 = vld [vmem:[%s5572_s4 + $0x28] sm:$0xff]  ;;  %s4394_s19 = smov 64  }
   0x4   :  { %131 = vmatpush.bf16.msra.mxu2 %v3847_v30  ;;  %v3846_v31 = vld [vmem:[%s5572_s4 + $0x20] sm:$0xff]  ;;  %s4395_s20 = smov 96  }
   0x6   :  { %68 = vmatpush.bf16.msra.mxu0 %v3842_v2  ;;  %100 = vmatpush.bf16.msra.mxu1 %v3844_v3 }
   0x8   :  { %132 = vmatpush.bf16.msra.mxu2 %v3846_v31 }
   0x9   :  { %3616 = vmatmul.msk.bf16.vlgmr.msra.gmra.mxu0 %vm57_vm0, %v38_v6  ;;  %3625 = vmatmul.msk.bf16.vlgmr.msra.gmra.mxu1 %vm57_vm0, %v38_v6 }
   0xb   :  { %3634 = vmatmul.msk.bf16.vlgmr.msra.gmra.mxu2 %vm57_vm0, %v38_v6 }
  0x86   :  { %v70_v7 = vpop.f32.mrf.mxu0  ;;  %v102_v8 = vpop.f32.mrf.mxu1 }
  0x87   :  { %v103_v11 = vadd.f32 %v4197_v9, %v102_v8  ;;  %v71_v12 = vadd.f32 %v4196_v10, %v70_v7 }
  0x89   :  { %v192_v17 = vpack.c.bf16 %v103_v11, %v103_v11  ;;  %v164_v24 = vpack.c.bf16 %v71_v12, %v71_v12 }
  0x8b   :  { %v235_v21 = vunpack.c.l.b16 %v192_v17  ;;  %v230_v27 = vunpack.c.l.b16 %v164_v24 }
  0x8e   :  { %v72_v13 = vpop.f32.mrf.mxu0  ;;  %v104_v14 = vpop.f32.mrf.mxu1 }
  0x8f   :  { %v73_v15 = vadd.f32 %v4196_v10, %v72_v13  ;;  %v105_v16 = vadd.f32 %v4197_v9, %v104_v14 }
  0x91   :  { %v3906_v18 = vpack.i.bf16 %v105_v16, %v103_v11  ;;  %v3916_v19 = vpack.i.bf16 %v73_v15, %v71_v12  ;;  %v193_v20 = vpack.c.bf16 %v105_v16, %v105_v16  ;;  %v165_v25 = vpack.c.bf16 %v73_v15, %v73_v15 }
  0x93   :  { %3907 = vrot.lane.b32.xlu1 %v3906_v18, %s4386_s0  ;;  %3897 = vrot.lane.b32.xlu0 %v3906_v18, %s4387_s17  ;;  %v236_v22 = vunpack.c.l.b16 %v193_v20  ;;  %v231_v28 = vunpack.c.l.b16 %v165_v25 }
  0x94   :  { %3917 = vrot.lane.b32.xlu2 %v3916_v19, %s4386_s0 }
  0x95   :  { %v237_v23 = vpack.c.b16 %v236_v22, %v235_v21  ;;  %v232_v29 = vpack.c.b16 %v231_v28, %v230_v27  ;;  %v4198_v21 = vld [vmem:[%s5574_s5 + $0x2] ss:$0 sm:$0xff]  ;;  %v134_v22 = vpop.f32.mrf.mxu2 }
  0x97   :  { %v243_v26 = vsel %vm238_vm1, %v237_v23, 0  ;;  %v135_v23 = vadd.f32 %v4198_v21, %v134_v22 }
  0x98   :  { %252 = vmatpush.bf16.xpose.msra.mxu3 %v243_v26 }
  0x99   :  { %v220_v24 = vpack.c.bf16 %v135_v23, %v135_v23 }
  0x9b   :  { %3912 = vrot.lane.b32.xlu1 %v3906_v18, %s4388_s18  ;;  %3902 = vrot.lane.b32.xlu0 %v3916_v19, %s4387_s17  ;;  %v557_v28 = vunpack.c.l.b16 %v220_v24 }
  0x9c   :  { %3922 = vrot.lane.b32.xlu2 %v3916_v19, %s4388_s18 }
  0x9d   :  { %v136_v25 = vpop.f32.mrf.mxu2 }
  0x9e   :  { %v137_v26 = vadd.f32 %v4198_v21, %v136_v25 }
  0x9f   :  { %3635 = vmatmul.msk.bf16.vlgmr.msra.gmra.mxu3 %vm238_vm1, %v232_v29 }
  0xa0   :  { %v221_v27 = vpack.c.bf16 %v137_v26, %v137_v26  ;;  %v4492_v30 = vpack.i.bf16 %v137_v26, %v135_v23 }
  0xa2   :  { %v558_v29 = vunpack.c.l.b16 %v221_v27 }
  0xa4   :  { %v559_v31 = vpack.c.b16 %v558_v29, %v557_v28 }
  0xa6   :  { %571 = vmatpush.bf16.msrb.mxu3 %v559_v31 }
  0xee   :  { %v3918_v32 = vpop.permute.xlu2 %3917 }
  0xef   :  { %v3920_v43 = vunpack.i.h.bf16 %v3918_v32  ;;  %v3919_v44 = vunpack.i.l.bf16 %v3918_v32  ;;  %v34_v32 = vld [vmem:[%s5575_s2] sm:$0xff] }
  0xf1   :  { %v167_v52 = vpack.c.bf16 %v3920_v43, %v3920_v43  ;;  %v166_v53 = vpack.c.bf16 %v3919_v44, %v3919_v44 }
  0xf3   :  { %v262_v6 = vunpack.c.l.b16 %v167_v52  ;;  %v261_v7 = vunpack.c.l.b16 %v166_v53 }
  0xf5   :  { %v263_v16 = vpack.c.b16 %v262_v6, %v261_v7 }
  0xf6   :  { %v3923_v49 = vpop.permute.xlu2 %3922 }
  0xf7   :  { %v3925_v60 = vunpack.i.h.bf16 %v3923_v49  ;;  %v3924_v61 = vunpack.i.l.bf16 %v3923_v49 }
  0xf9   :  { %v169_v12 = vpack.c.bf16 %v3925_v60, %v3925_v60  ;;  %v168_v13 = vpack.c.bf16 %v3924_v61, %v3924_v61 }
  0xfb   :  { %v292_v18 = vunpack.c.l.b16 %v169_v12  ;;  %v291_v19 = vunpack.c.l.b16 %v168_v13 }
  0xfd   :  { %v293_v20 = vpack.c.b16 %v292_v18, %v291_v19 }
 0x105   :  { %v3908_v33 = vpop.permute.xlu1 %3907  ;;  %v3898_v34 = vpop.permute.xlu0 %3897 }
 0x106   :  { %v3910_v35 = vunpack.i.h.bf16 %v3908_v33  ;;  %v3909_v36 = vunpack.i.l.bf16 %v3908_v33  ;;  %v3900_v37 = vunpack.i.h.bf16 %v3898_v34  ;;  %v3899_v38 = vunpack.i.l.bf16 %v3898_v34 }
 0x108   :  { %v195_v39 = vpack.c.bf16 %v3910_v35, %v3910_v35  ;;  %v194_v40 = vpack.c.bf16 %v3909_v36, %v3909_v36  ;;  %v199_v41 = vpack.c.bf16 %v3900_v37, %v3900_v37  ;;  %v198_v42 = vpack.c.bf16 %v3899_v38, %v3899_v38  ;;  %v35_v37 = vld [vmem:[%s5575_s2 + $0x8] sm:$0xff] }
 0x10a   :  { %v266_v45 = vunpack.c.l.b16 %v194_v40  ;;  %v267_v46 = vunpack.c.l.b16 %v195_v39  ;;  %v326_v47 = vunpack.c.l.b16 %v198_v42  ;;  %v327_v48 = vunpack.c.l.b16 %v199_v41 }
 0x10c   :  { %v268_v50 = vpack.c.b16 %v267_v46, %v266_v45  ;;  %v328_v51 = vpack.c.b16 %v327_v48, %v326_v47 }
 0x10d   :  { %v3913_v54 = vpop.permute.xlu1 %3912  ;;  %v3903_v55 = vpop.permute.xlu0 %3902 }
 0x10e   :  { %v3915_v56 = vunpack.i.h.bf16 %v3913_v54  ;;  %v3914_v57 = vunpack.i.l.bf16 %v3913_v54  ;;  %v3905_v58 = vunpack.i.h.bf16 %v3903_v55  ;;  %v3904_v59 = vunpack.i.l.bf16 %v3903_v55 }
 0x10f   :  { %v273_v62 = vsel %vm238_vm1, %v268_v50, 0  ;;  %v333_v63 = vsel %vm238_vm1, %v328_v51, 0 }
 0x110   :  { %v197_v0 = vpack.c.bf16 %v3915_v56, %v3915_v56  ;;  %v196_v1 = vpack.c.bf16 %v3914_v57, %v3914_v57  ;;  %v171_v2 = vpack.c.bf16 %v3905_v58, %v3905_v58  ;;  %v170_v3 = vpack.c.bf16 %v3904_v59, %v3904_v59  ;;  %282 = vmatpush.bf16.xpose.msrb.mxu0 %v273_v62 }
 0x111   :  { %342 = vmatpush.bf16.xpose.msrb.mxu2 %v333_v63 }
 0x112   :  { %v322_v8 = vunpack.c.l.b16 %v171_v2  ;;  %v321_v9 = vunpack.c.l.b16 %v170_v3  ;;  %v296_v10 = vunpack.c.l.b16 %v196_v1  ;;  %v297_v11 = vunpack.c.l.b16 %v197_v0 }
 0x114   :  { %v323_v14 = vpack.c.b16 %v322_v8, %v321_v9  ;;  %v298_v15 = vpack.c.b16 %v297_v11, %v296_v10 }
 0x116   :  { %v303_v17 = vsel %vm238_vm1, %v298_v15, 0 }
 0x117   :  { %3636 = vmatmul.msk.bf16.vlgmr.msrb.gmra.mxu0 %vm238_vm1, %v263_v16  ;;  %312 = vmatpush.bf16.xpose.msrb.mxu1 %v303_v17 }
 0x118   :  { %3638 = vmatmul.msk.bf16.vlgmr.msrb.gmra.mxu2 %vm238_vm1, %v323_v14 }
 0x11e   :  { %3637 = vmatmul.msk.bf16.vlgmr.msrb.gmra.mxu1 %vm238_vm1, %v293_v20 }
 0x122   :  { %v254_v40 = vpop.f32.mrf.mxu3 }
 0x123   :  { %v4503_v46 = vadd.f32 %v254_v40, %v34_v32 }
 0x125   :  { %v350_v53 = vsel %vm349_vm2, %v4503_v46, -inf }
 0x12a   :  { %v256_v51 = vpop.f32.mrf.mxu3 }
 0x12b   :  { %v257_v54 = vadd.f32 %v256_v51, %v35_v37 }
 0x12d   :  { %v353_v57 = vsel %vm349_vm2, %v257_v54, -inf }
 0x194   :  { %v284_v33 = vpop.f32.mrf.mxu0 }
 0x195   :  { %v285_v34 = vadd.f32 %v284_v33, %v34_v32 }
 0x197   :  { %v356_v35 = vsel %vm349_vm2, %v285_v34, -inf }
 0x198   :  { %357 = vmax.xlane.f32.xlu2 %v356_v35 }
 0x19b   :  { %v344_v36 = vpop.f32.mrf.mxu2  ;;  %v314_v42 = vpop.f32.mrf.mxu1 }
 0x19c   :  { %v345_v38 = vadd.f32 %v344_v36, %v34_v32  ;;  %v286_v39 = vpop.f32.mrf.mxu0  ;;  %v315_v45 = vadd.f32 %v314_v42, %v34_v32 }
 0x19d   :  { %v287_v41 = vadd.f32 %v286_v39, %v35_v37 }
 0x19e   :  { %v368_v43 = vsel %vm349_vm2, %v345_v38, -inf  ;;  %v362_v50 = vsel %vm349_vm2, %v315_v45, -inf }
 0x19f   :  { %369 = vmax.xlane.f32.xlu0 %v368_v43  ;;  %v359_v44 = vsel %vm349_vm2, %v287_v41, -inf }
 0x1a0   :  { %360 = vmax.xlane.f32.xlu2 %v359_v44 }
 0x1a3   :  { %v346_v47 = vpop.f32.mrf.mxu2  ;;  %v316_v52 = vpop.f32.mrf.mxu1 }
 0x1a4   :  { %v347_v48 = vadd.f32 %v346_v47, %v35_v37  ;;  %v317_v55 = vadd.f32 %v316_v52, %v35_v37 }
 0x1a6   :  { %v371_v49 = vsel %vm349_vm2, %v347_v48, -inf  ;;  %v365_v56 = vsel %vm349_vm2, %v317_v55, -inf }
 0x1a7   :  { %372 = vmax.xlane.f32.xlu1 %v371_v49  ;;  %363 = vmax.xlane.f32.xlu0 %v362_v50 }
 0x1a8   :  { %351 = vmax.xlane.f32.xlu2 %v350_v53 }
 0x1af   :  { %366 = vmax.xlane.f32.xlu1 %v365_v56  ;;  %354 = vmax.xlane.f32.xlu0 %v353_v57 }
 0x20b   :  { %v358_v58 = vpop.xlane.xlu2 %357 }
 0x20c   :  { %v376_v59 = vsub.f32 %v285_v34, %v358_v58 }
 0x20e   :  { %v386_v60 = vmul.f32 1.442695, %v376_v59 }
 0x210   :  { %4228 = vpow2.f32 %v386_v60 }
 0x212   :  { %v370_v61 = vpop.xlane.xlu0 %369 }
 0x213   :  { %v380_v62 = vsub.f32 %v345_v38, %v370_v61  ;;  %v361_v63 = vpop.xlane.xlu2 %360 }
 0x214   :  { %v377_v1 = vsub.f32 %v287_v41, %v361_v63 }
 0x215   :  { %v394_v0 = vmul.f32 1.442695, %v380_v62 }
 0x216   :  { %v4511_v2 = vpop.eup %4228  ;;  %v388_v6 = vmul.f32 1.442695, %v377_v1 }
 0x217   :  { %4230 = vpow2.f32 %v394_v0  ;;  %v404_v3 = vsel %vm349_vm2, %v4511_v2, 0.0 }
 0x218   :  { %405 = vadd.xlane.f32.xlu0 %v404_v3  ;;  %4232 = vpow2.f32 %v388_v6 }
 0x21a   :  { %v373_v7 = vpop.xlane.xlu1 %372  ;;  %v364_v8 = vpop.xlane.xlu0 %363 }
 0x21b   :  { %v378_v9 = vsub.f32 %v315_v45, %v364_v8  ;;  %v381_v12 = vsub.f32 %v347_v48, %v373_v7  ;;  %v352_v26 = vpop.xlane.xlu2 %351 }
 0x21c   :  { %v374_v27 = vsub.f32 %v4503_v46, %v352_v26 }
 0x21d   :  { %v4515_v10 = vpop.eup %4230  ;;  %v390_v11 = vmul.f32 1.442695, %v378_v9  ;;  %v396_v14 = vmul.f32 1.442695, %v381_v12 }
 0x21e   :  { %v416_v13 = vsel %vm349_vm2, %v4515_v10, 0.0  ;;  %v4519_v16 = vpop.eup %4232  ;;  %v382_v31 = vmul.f32 1.442695, %v374_v27 }
 0x21f   :  { %417 = vadd.xlane.f32.xlu1 %v416_v13  ;;  %4234 = vpow2.f32 %v390_v11  ;;  %v407_v20 = vsel %vm349_vm2, %v4519_v16, 0.0 }
 0x220   :  { %4236 = vpow2.f32 %v396_v14 }
 0x222   :  { %v367_v15 = vpop.xlane.xlu1 %366  ;;  %v355_v28 = vpop.xlane.xlu0 %354 }
 0x223   :  { %v379_v17 = vsub.f32 %v317_v55, %v367_v15  ;;  %v375_v29 = vsub.f32 %v257_v54, %v355_v28 }
 0x225   :  { %v392_v18 = vmul.f32 1.442695, %v379_v17  ;;  %v4521_v19 = vpop.eup %4234  ;;  %v384_v32 = vmul.f32 1.442695, %v375_v29 }
 0x226   :  { %v410_v21 = vsel %vm349_vm2, %v4521_v19, 0.0  ;;  %v4527_v22 = vpop.eup %4236 }
 0x227   :  { %4238 = vpow2.f32 %v392_v18  ;;  %408 = vadd.xlane.f32.xlu1 %v407_v20  ;;  %411 = vadd.xlane.f32.xlu2 %v410_v21  ;;  %v419_v25 = vsel %vm349_vm2, %v4527_v22, 0.0 }
 0x228   :  { %4240 = vpow2.f32 %v382_v31 }
 0x229   :  { %4242 = vpow2.f32 %v384_v32 }
 0x22d   :  { %v4529_v23 = vpop.eup %4238 }
 0x22e   :  { %v413_v24 = vsel %vm349_vm2, %v4529_v23, 0.0  ;;  %v4542_v33 = vpop.eup %4240 }
 0x22f   :  { %414 = vadd.xlane.f32.xlu0 %v413_v24  ;;  %420 = vadd.xlane.f32.xlu2 %v419_v25  ;;  %v4544_v34 = vpop.eup %4242  ;;  %v398_v35 = vsel %vm349_vm2, %v4542_v33, 0.0 }
 0x240   :  { %3927 = vrot.lane.b32.xlu1 %v4492_v30, %s4387_s17 }
 0x243   :  { %3937 = vrot.lane.b32.xlu0 %v4492_v30, %s4388_s18 }
 0x247   :  { %3932 = vrot.lane.b32.xlu2 %v4492_v30, %s4386_s0  ;;  %v401_v30 = vsel %vm349_vm2, %v4544_v34, 0.0 }
 0x26a   :  { %399 = vadd.xlane.f32.xlu1 %v398_v35 }
 0x26d   :  { %402 = vadd.xlane.f32.xlu0 %v401_v30 }
 0x28b   :  { %v406_v36 = vpop.xlane.xlu0 %405 }
 0x28c   :  { %4244 = vrcp.f32 %v406_v36  ;;  %v463_v42 = vand.u32 2147483648, %v406_v36  ;;  %vm457_vm4 = vweird.f32 %v406_v36  ;;  %v461_v45 = vand.u32 2147483647, %v406_v36 }
 0x28e   :  { %v464_v50 = vor.u32 1.1754944e-38, %v463_v42  ;;  %vm462_vm6 = vcmp.eq.f32.partialorder %v461_v45, 8.507059e+37 }
 0x292   :  { %v4245_v37 = vpop.eup %4244  ;;  %v418_v38 = vpop.xlane.xlu1 %417 }
 0x293   :  { %v453_v39 = vmul.f32 %v4245_v37, %v406_v36  ;;  %4246 = vrcp.f32 %v418_v38  ;;  %vm458_vm3 = vweird.f32 %v4245_v37  ;;  %v523_v54 = vand.u32 2147483648, %v418_v38 }
 0x294   :  { %vm459_vm5 = vmor %vm457_vm4, %vm458_vm3  ;;  %vm517_vm8 = vweird.f32 %v418_v38  ;;  %v521_v59 = vand.u32 2147483647, %v418_v38 }
 0x295   :  { %v454_v40 = vsub.f32 1.0, %v453_v39  ;;  %v524_v63 = vor.u32 1.1754944e-38, %v523_v54 }
 0x296   :  { %vm522_vm10 = vcmp.eq.f32.partialorder %v521_v59, 8.507059e+37 }
 0x297   :  { %v455_v41 = vmul.f32 %v4245_v37, %v454_v40 }
 0x299   :  { %v4247_v43 = vpop.eup %4246  ;;  %v456_v44 = vadd.f32 %v4245_v37, %v455_v41 }
 0x29a   :  { %v513_v46 = vmul.f32 %v4247_v43, %v418_v38  ;;  %v409_v47 = vpop.xlane.xlu1 %408  ;;  %v4550_v49 = vpop.xlane.xlu2 %411  ;;  %vm518_vm7 = vweird.f32 %v4247_v43 }
 0x29b   :  { %v460_v48 = vsel %vm459_vm5, %v4245_v37, %v456_v44  ;;  %4248 = vrcp.f32 %v409_v47  ;;  %vm4556_vm9 = vmor %vm517_vm8, %vm518_vm7  ;;  %v476_v0 = vand.u32 2147483647, %v409_v47  ;;  %v478_v7 = vand.u32 2147483648, %v409_v47 }
 0x29c   :  { %v514_v51 = vsub.f32 1.0, %v513_v46  ;;  %4250 = vrcp.f32 %v4550_v49  ;;  %v465_v52 = vsel %vm462_vm6, %v464_v50, %v460_v48  ;;  %v491_v8 = vand.u32 2147483647, %v4550_v49 }
 0x29d   :  { %v466_v57 = vmul.f32 %v4511_v2, %v465_v52  ;;  %v493_v11 = vand.u32 2147483648, %v4550_v49  ;;  %vm472_vm12 = vweird.f32 %v409_v47  ;;  %vm477_vm13 = vcmp.eq.f32.partialorder %v476_v0, 8.507059e+37 }
 0x29e   :  { %v515_v53 = vmul.f32 %v4247_v43, %v514_v51  ;;  %vm487_vm14 = vweird.f32 %v4550_v49  ;;  %v479_v20 = vor.u32 1.1754944e-38, %v478_v7  ;;  %vm4571_vm3 = vcmp.eq.f32.partialorder %v491_v8, 8.507059e+37 }
 0x29f   :  { %v544_v12 = vpack.c.bf16 %v466_v57, %v466_v57  ;;  %v494_v24 = vor.u32 1.1754944e-38, %v493_v11 }
 0x2a0   :  { %v516_v55 = vadd.f32 %v4247_v43, %v515_v53 }
 0x2a1   :  { %v4249_v56 = vpop.eup %4248  ;;  %v4575_v25 = vunpack.c.l.b16 %v544_v12 }
 0x2a2   :  { %v4554_v58 = vpop.eup %4250  ;;  %v468_v60 = vmul.f32 %v4249_v56, %v409_v47  ;;  %v415_v61 = vpop.xlane.xlu0 %414  ;;  %v520_v2 = vsel %vm4556_vm9, %v4247_v43, %v516_v55  ;;  %vm473_vm11 = vweird.f32 %v4249_v56 }
 0x2a3   :  { %v483_v1 = vmul.f32 %v4554_v58, %v4550_v49  ;;  %4252 = vrcp.f32 %v415_v61  ;;  %v4562_v3 = vpop.xlane.xlu2 %420  ;;  %v525_v14 = vsel %vm522_vm10, %v524_v63, %v520_v2  ;;  %vm474_vm15 = vmor %vm472_vm12, %vm473_vm11  ;;  %vm488_vm4 = vweird.f32 %v4554_v58 }
 0x2a4   :  { %v469_v6 = vsub.f32 1.0, %v468_v60  ;;  %4254 = vrcp.f32 %v4562_v3  ;;  %v4578_v26 = vmul.f32 %v4515_v10, %v525_v14  ;;  %vm502_vm5 = vweird.f32 %v415_v61  ;;  %vm4590_vm7 = vmor %vm487_vm14, %vm488_vm4 }
 0x2a5   :  { %v484_v9 = vsub.f32 1.0, %v483_v1  ;;  %v506_v35 = vand.u32 2147483647, %v415_v61  ;;  %v508_v38 = vand.u32 2147483648, %v415_v61  ;;  %vm532_vm6 = vweird.f32 %v4562_v3 }
 0x2a6   :  { %v470_v13 = vmul.f32 %v4249_v56, %v469_v6  ;;  %v538_v10 = vand.u32 2147483648, %v4562_v3  ;;  %v536_v49 = vand.u32 2147483647, %v4562_v3  ;;  %v548_v1 = vpack.c.bf16 %v4578_v26, %v4578_v26 }
 0x2a7   :  { %v485_v15 = vmul.f32 %v4554_v58, %v484_v9  ;;  %vm4597_vm9 = vcmp.eq.f32.partialorder %v506_v35, 8.507059e+37  ;;  %v509_v52 = vor.u32 1.1754944e-38, %v508_v38 }
 0x2a8   :  { %v471_v17 = vadd.f32 %v4249_v56, %v470_v13  ;;  %v539_v53 = vor.u32 1.1754944e-38, %v538_v10 }
 0x2a9   :  { %v4253_v18 = vpop.eup %4252  ;;  %v486_v32 = vadd.f32 %v4554_v58, %v485_v15 }
 0x2aa   :  { %v475_v27 = vsel %vm474_vm15, %v4249_v56, %v471_v17  ;;  %v498_v28 = vmul.f32 %v4253_v18, %v415_v61  ;;  %v4255_v29 = vpop.eup %4254  ;;  %vm503_vm8 = vweird.f32 %v4253_v18 }
 0x2ab   :  { %v480_v31 = vsel %vm477_vm13, %v479_v20, %v475_v27  ;;  %v3933_v30 = vpop.permute.xlu2 %3932  ;;  %v528_v39 = vmul.f32 %v4255_v29, %v4562_v3  ;;  %v490_v45 = vsel %vm4590_vm7, %v4554_v58, %v486_v32  ;;  %vm533_vm10 = vweird.f32 %v4255_v29  ;;  %vm504_vm11 = vmor %vm502_vm5, %vm503_vm8 }
 0x2ac   :  { %v481_v36 = vmul.f32 %v4519_v16, %v480_v31  ;;  %v499_v37 = vsub.f32 1.0, %v498_v28  ;;  %v3935_v40 = vunpack.i.h.bf16 %v3933_v30  ;;  %v3934_v41 = vunpack.i.l.bf16 %v3933_v30  ;;  %vm534_vm12 = vmor %vm532_vm6, %vm533_vm10 }
 0x2ad   :  { %v529_v44 = vsub.f32 1.0, %v528_v39  ;;  %v495_v57 = vsel %vm4571_vm3, %v494_v24, %v490_v45  ;;  %vm537_vm13 = vcmp.eq.f32.partialorder %v536_v49, 8.507059e+37  ;;  %v636_v27 = vunpack.c.l.b16 %v548_v1 }
 0x2ae   :  { %v545_v42 = vpack.c.bf16 %v481_v36, %v481_v36  ;;  %v500_v16 = vmul.f32 %v4253_v18, %v499_v37  ;;  %v223_v47 = vpack.c.bf16 %v3935_v40, %v3935_v40  ;;  %v222_v48 = vpack.c.bf16 %v3934_v41, %v3934_v41 }
 0x2af   :  { %v530_v51 = vmul.f32 %v4255_v29, %v529_v44  ;;  %v496_v7 = vmul.f32 %v4521_v19, %v495_v57 }
 0x2b0   :  { %v501_v50 = vadd.f32 %v4253_v18, %v500_v16  ;;  %v586_v54 = vunpack.c.l.b16 %v223_v47  ;;  %v585_v55 = vunpack.c.l.b16 %v222_v48  ;;  %v581_v56 = vunpack.c.l.b16 %v545_v42 }
 0x2b1   :  { %v531_v59 = vadd.f32 %v4255_v29, %v530_v51  ;;  %v546_v19 = vpack.c.bf16 %v496_v7, %v496_v7 }
 0x2b2   :  { %v505_v58 = vsel %vm504_vm11, %v4253_v18, %v501_v50  ;;  %v3928_v60 = vpop.permute.xlu1 %3927  ;;  %v587_v63 = vpack.c.b16 %v586_v54, %v585_v55  ;;  %v582_v15 = vpack.c.b16 %v581_v56, %v4575_v25 }
 0x2b3   :  { %v510_v62 = vsel %vm4597_vm9, %v509_v52, %v505_v58  ;;  %v3930_v61 = vunpack.i.h.bf16 %v3928_v60  ;;  %v3929_v0 = vunpack.i.l.bf16 %v3928_v60  ;;  %v535_v2 = vsel %vm534_vm12, %v4255_v29, %v531_v59 }
 0x2b4   :  { %v511_v6 = vmul.f32 %v4529_v23, %v510_v62  ;;  %v540_v8 = vsel %vm537_vm13, %v539_v53, %v535_v2  ;;  %599 = vmatpush.bf16.msra.mxu0 %v587_v63  ;;  %v608_v30 = vunpack.c.l.b16 %v546_v19  ;;  %vm690_vm9 = vcmask 195584  }
 0x2b5   :  { %v227_v9 = vpack.c.bf16 %v3930_v61, %v3930_v61  ;;  %v226_v11 = vpack.c.bf16 %v3929_v0, %v3929_v0  ;;  %v3938_v12 = vpop.permute.xlu0 %3937  ;;  %v541_v3 = vmul.f32 %v4527_v22, %v540_v8 }
 0x2b6   :  { %v3940_v13 = vunpack.i.h.bf16 %v3938_v12  ;;  %v3939_v14 = vunpack.i.l.bf16 %v3938_v12  ;;  %v547_v20 = vpack.c.bf16 %v511_v6, %v511_v6 }
 0x2b7   :  { %v642_v17 = vunpack.c.l.b16 %v227_v9  ;;  %v641_v18 = vunpack.c.l.b16 %v226_v11  ;;  %v549_v21 = vpack.c.bf16 %v541_v3, %v541_v3  ;;  %3640 = vmatmul.msk.bf16.vlgmr.msra.gmra.mxu0 %vm349_vm2, %v582_v15  ;;  %v3849_v9 = vld [vmem:[%s5572_s4 + $0x38] sm:$0xff]  ;;  %v3848_v11 = vld [vmem:[%s5572_s4 + $0x30] sm:$0xff] }
 0x2b8   :  { %v225_v24 = vpack.c.bf16 %v3940_v13, %v3940_v13  ;;  %v224_v26 = vpack.c.bf16 %v3939_v14, %v3939_v14  ;;  %v609_v22 = vunpack.c.l.b16 %v547_v20  ;;  %716 = vmatpush.bf16.msra.mxu3 %v3849_v9 }
 0x2b9   :  { %v643_v23 = vpack.c.b16 %v642_v17, %v641_v18  ;;  %v637_v28 = vunpack.c.l.b16 %v549_v21 }
 0x2ba   :  { %v614_v29 = vunpack.c.l.b16 %v225_v24  ;;  %v613_v31 = vunpack.c.l.b16 %v224_v26  ;;  %v610_v25 = vpack.c.b16 %v609_v22, %v608_v30 }
 0x2bb   :  { %655 = vmatpush.bf16.msra.mxu2 %v643_v23  ;;  %v638_v35 = vpack.c.b16 %v637_v28, %v636_v27 }
 0x2bc   :  { %v615_v32 = vpack.c.b16 %v614_v29, %v613_v31  ;;  %717 = vmatpush.bf16.msra.mxu3 %v3848_v11 }
 0x2be   :  { %627 = vmatpush.bf16.msra.mxu1 %v615_v32  ;;  %3642 = vmatmul.msk.bf16.vlgmr.msra.gmra.mxu2 %vm349_vm2, %v638_v35  ;;  %v4199_v32 = vld [vmem:[%s5574_s5 + $0x3] ss:$0 sm:$0xff] }
 0x2c1   :  { %3641 = vmatmul.msk.bf16.vlgmr.msra.gmra.mxu1 %vm349_vm2, %v610_v25 }
 0x2dd   :  { %v400_v36 = vpop.xlane.xlu1 %399 }
 0x2de   :  { %4256 = vrcp.f32 %v400_v36  ;;  %v433_v41 = vand.u32 2147483648, %v400_v36  ;;  %v431_v16 = vand.u32 2147483647, %v400_v36  ;;  %vm427_vm15 = vweird.f32 %v400_v36 }
 0x2e0   :  { %v403_v37 = vpop.xlane.xlu0 %402  ;;  %v434_v47 = vor.u32 1.1754944e-38, %v433_v41  ;;  %vm432_vm5 = vcmp.eq.f32.partialorder %v431_v16, 8.507059e+37 }
 0x2e1   :  { %4258 = vrcp.f32 %v403_v37  ;;  %v448_v46 = vand.u32 2147483648, %v403_v37  ;;  %v446_v50 = vand.u32 2147483647, %v403_v37  ;;  %vm442_vm6 = vweird.f32 %v403_v37 }
 0x2e3   :  { %v449_v53 = vor.u32 1.1754944e-38, %v448_v46  ;;  %vm447_vm8 = vcmp.eq.f32.partialorder %v446_v50, 8.507059e+37 }
 0x2e4   :  { %v4257_v38 = vpop.eup %4256 }
 0x2e5   :  { %v423_v39 = vmul.f32 %v4257_v38, %v400_v36  ;;  %vm428_vm14 = vweird.f32 %v4257_v38 }
 0x2e6   :  { %vm429_vm3 = vmor %vm427_vm15, %vm428_vm14 }
 0x2e7   :  { %v4259_v10 = vpop.eup %4258  ;;  %v424_v40 = vsub.f32 1.0, %v423_v39 }
 0x2e8   :  { %v438_v42 = vmul.f32 %v4259_v10, %v403_v37  ;;  %vm443_vm4 = vweird.f32 %v4259_v10 }
 0x2e9   :  { %v425_v43 = vmul.f32 %v4257_v38, %v424_v40  ;;  %vm444_vm7 = vmor %vm442_vm6, %vm443_vm4  ;;  %v4392_v40 = vmov 32.0  }
 0x2ea   :  { %v439_v44 = vsub.f32 1.0, %v438_v42  ;;  %4260 = vrcp.f32 %v4392_v40 }
 0x2eb   :  { %v426_v45 = vadd.f32 %v4257_v38, %v425_v43  ;;  %v3853_v43 = vld [vmem:[%s5572_s4 + $0x58] sm:$0xff] }
 0x2ec   :  { %v440_v48 = vmul.f32 %v4259_v10, %v439_v44  ;;  %851 = vmatpush.bf16.msrb.mxu1 %v3853_v43  ;;  %v29_v44 = vld [vmem:[%s5576_s1 + $0x8] sm:$0xff] }
 0x2ed   :  { %v430_v51 = vsel %vm429_vm3, %v4257_v38, %v426_v45 }
 0x2ee   :  { %v435_v49 = vsel %vm432_vm5, %v434_v47, %v430_v51  ;;  %v441_v52 = vadd.f32 %v4259_v10, %v440_v48 }
 0x2ef   :  { %v436_v54 = vmul.f32 %v4542_v33, %v435_v49  ;;  %v30_v49 = vld [vmem:[%s5576_s1 + $0x10] sm:$0xff] }
 0x2f0   :  { %v445_v55 = vsel %vm444_vm7, %v4259_v10, %v441_v52  ;;  %v4261_v41 = vpop.eup %4260  ;;  %v31_v52 = vld [vmem:[%s5576_s1 + $0x18] sm:$0xff] }
 0x2f1   :  { %v450_v56 = vsel %vm447_vm8, %v449_v53, %v445_v55  ;;  %v542_v58 = vpack.c.bf16 %v436_v54, %v436_v54  ;;  %v735_v42 = vmul.f32 32.0, %v4261_v41  ;;  %vm739_vm10 = vweird.f32 %v4261_v41 }
 0x2f2   :  { %v451_v57 = vmul.f32 %v4544_v34, %v450_v56  ;;  %v4669_v55 = vpack.c.bf16 %v31_v52, %v30_v49 }
 0x2f3   :  { %v552_v60 = vunpack.c.l.b16 %v542_v58  ;;  %v736_v16 = vsub.f32 1.0, %v735_v42 }
 0x2f4   :  { %v543_v59 = vpack.c.bf16 %v451_v57, %v451_v57 }
 0x2f5   :  { %v737_v46 = vmul.f32 %v4261_v41, %v736_v16 }
 0x2f6   :  { %v553_v62 = vunpack.c.l.b16 %v543_v59 }
 0x2f7   :  { %v738_v47 = vadd.f32 %v4261_v41, %v737_v46 }
 0x2f8   :  { %v554_v63 = vpack.c.b16 %v553_v62, %v552_v60 }
 0x2f9   :  { %v4660_v48 = vsel %vm739_vm10, %v4261_v41, %v738_v47 }
 0x2fa   :  { %3639 = vmatmul.msk.bf16.vlgmr.msrb.gmra.mxu3 %vm349_vm2, %v554_v63 }
 0x334   :  { %v601_v61 = vpop.f32.mrf.mxu0 }
 0x33c   :  { %v603_v0 = vpop.f32.mrf.mxu0 }
 0x33d   :  { %v3941_v1 = vpack.i.bf16 %v603_v0, %v601_v61  ;;  %v3851_v0 = vld [vmem:[%s5572_s4 + $0x48] sm:$0xff] }
 0x33e   :  { %v629_v2 = vpop.f32.mrf.mxu1  ;;  %813 = vmatpush.bf16.msrb.mxu0 %v3851_v0 }
 0x33f   :  { %3942 = vrot.lane.b32.xlu2 %v3941_v1, %s4389_s29 }
 0x341   :  { %v657_v33 = vpop.f32.mrf.mxu2 }
 0x346   :  { %v631_v6 = vpop.f32.mrf.mxu1 }
 0x347   :  { %v3946_v7 = vpack.i.bf16 %v631_v6, %v629_v2  ;;  %v3850_v2 = vld [vmem:[%s5572_s4 + $0x40] sm:$0xff] }
 0x348   :  { %814 = vmatpush.bf16.msrb.mxu0 %v3850_v2 }
 0x349   :  { %3947 = vrot.lane.b32.xlu2 %v3946_v7, %s4390_s30  ;;  %v659_v34 = vpop.f32.mrf.mxu2 }
 0x34a   :  { %v3951_v8 = vpack.i.bf16 %v659_v34, %v657_v33 }
 0x351   :  { %3952 = vrot.lane.b32.xlu2 %v3951_v8, %s4391_s8 }
 0x37d   :  { %v573_v3 = vpop.f32.mrf.mxu3 }
 0x385   :  { %v575_v20 = vpop.f32.mrf.mxu3 }
 0x399   :  { %v3943_v12 = vpop.permute.xlu2 %3942 }
 0x39a   :  { %v3945_v14 = vunpack.i.h.bf16 %v3943_v12  ;;  %v3944_v15 = vunpack.i.l.bf16 %v3943_v12  ;;  %v4202_v12 = vld [vmem:[%s5574_s5 + $0x5] ss:$0 sm:$0xff] }
 0x39c   :  { %v687_v24 = vsel %vm238_vm1, %v575_v20, %v3945_v14  ;;  %v686_v26 = vsel %vm238_vm1, %v573_v3, %v3944_v15 }
 0x3a3   :  { %v3948_v13 = vpop.permute.xlu2 %3947 }
 0x3a4   :  { %v3950_v17 = vunpack.i.h.bf16 %v3948_v13  ;;  %v3949_v18 = vunpack.i.l.bf16 %v3948_v13 }
 0x3a6   :  { %v688_v27 = vsel %vm349_vm2, %v686_v26, %v3949_v18  ;;  %v689_v28 = vsel %vm349_vm2, %v687_v24, %v3950_v17 }
 0x3ab   :  { %v3953_v21 = vpop.permute.xlu2 %3952 }
 0x3ac   :  { %v3955_v19 = vunpack.i.h.bf16 %v3953_v21  ;;  %v3954_v23 = vunpack.i.l.bf16 %v3953_v21 }
 0x3ae   :  { %v691_v29 = vsel %vm690_vm9, %v688_v27, %v3954_v23  ;;  %v692_v31 = vsel %vm690_vm9, %v689_v28, %v3955_v19 }
 0x3af   :  { %v693_v22 = vpack.c.bf16 %v692_v31, %v691_v29  ;;  %v4200_v29 = vld [vmem:[%s5574_s5 + $0xa] ss:$0 sm:$0xff] }
 0x3b1   :  { %3651 = vmatmul.msk.bf16.vlgmr.msra.gmra.mxu3 %vm57_vm0, %v693_v22 }
 0x434   :  { %v719_v35 = vpop.f32.mrf.mxu3 }
 0x435   :  { %v720_v30 = vadd.f32 %v4199_v32, %v719_v35 }
 0x437   :  { %v724_v25 = vadd.f32 %v720_v30, %v4451_v4  ;;  %v3852_v4 = vld [vmem:[%s5572_s4 + $0x50] sm:$0xff] }
 0x438   :  { %852 = vmatpush.bf16.msrb.mxu1 %v3852_v4 }
 0x439   :  { %v728_v36 = vsel %vm57_vm0, %v724_v25, 0.0 }
 0x43a   :  { %729 = vadd.xlane.f32.xlu2 %v728_v36 }
 0x43c   :  { %v721_v37 = vpop.f32.mrf.mxu3 }
 0x43d   :  { %v722_v38 = vadd.f32 %v4199_v32, %v721_v37 }
 0x43f   :  { %v725_v39 = vadd.f32 %v722_v38, %v4456_v5  ;;  %v28_v5 = vld [vmem:[%s5576_s1] sm:$0xff] }
 0x440   :  { %v4656_v45 = vpack.c.bf16 %v29_v44, %v28_v5 }
 0x441   :  { %v731_v10 = vsel %vm57_vm0, %v725_v39, 0.0 }
 0x442   :  { %732 = vadd.xlane.f32.xlu1 %v731_v10  ;;  %3669 = vmatmul.msk.bf16.vlgmr.msrb.gmra.mxu1 %vm57_vm0, %v4656_v45 }
 0x452   :  { %3670 = vmatmul.msk.bf16.gmra.mxu1 %vm57_vm0, %v4669_v55 }
 0x4ad   :  { %v730_v50 = vpop.xlane.xlu2 %729 }
 0x4ae   :  { %v741_v51 = vmul.f32 %v4660_v48, %v730_v50 }
 0x4b0   :  { %v743_v53 = vsub.f32 %v724_v25, %v741_v51  ;;  %v4201_v25 = vld [vmem:[%s5574_s5 + $0xb] ss:$0 sm:$0xff] }
 0x4b2   :  { %v745_v54 = vmul.f32 %v743_v53, %v743_v53 }
 0x4b4   :  { %v747_v56 = vsel %vm57_vm0, %v745_v54, 0.0 }
 0x4b5   :  { %v733_v57 = vpop.xlane.xlu1 %732  ;;  %748 = vadd.xlane.f32.xlu0 %v747_v56 }
 0x4b6   :  { %v742_v58 = vmul.f32 %v4660_v48, %v733_v57 }
 0x4b8   :  { %v744_v59 = vsub.f32 %v725_v39, %v742_v58 }
 0x4ba   :  { %v746_v60 = vmul.f32 %v744_v59, %v744_v59 }
 0x4bc   :  { %v750_v62 = vsel %vm57_vm0, %v746_v60, 0.0 }
 0x4bd   :  { %751 = vadd.xlane.f32.xlu1 %v750_v62 }
 0x4bf   :  { %v854_v33 = vpop.f32.mrf.mxu1 }
 0x4c0   :  { %v855_v14 = vadd.f32 %v4202_v12, %v854_v33 }
 0x4c2   :  { %v974_v40 = vpack.c.bf16 %v855_v14, %v855_v14 }
 0x4c4   :  { %v1055_v50 = vunpack.c.l.b16 %v974_v40 }
 0x4c7   :  { %v856_v3 = vpop.f32.mrf.mxu1 }
 0x4c8   :  { %v857_v15 = vadd.f32 %v4202_v12, %v856_v3 }
 0x4ca   :  { %v3966_v24 = vpack.i.bf16 %v857_v15, %v855_v14  ;;  %v975_v41 = vpack.c.bf16 %v857_v15, %v857_v15 }
 0x4cc   :  { %3967 = vrot.lane.b32.xlu2 %v3966_v24, %s4386_s0  ;;  %v1056_v51 = vunpack.c.l.b16 %v975_v41 }
 0x4ce   :  { %v1059_v52 = vpack.c.b16 %v1056_v51, %v1055_v50 }
 0x4cf   :  { %v859_v19 = vpop.f32.mrf.mxu1 }
 0x4d0   :  { %v860_v32 = vadd.f32 %v4202_v12, %v859_v19 }
 0x4d2   :  { %v976_v30 = vpack.c.bf16 %v860_v32, %v860_v32 }
 0x4d4   :  { %v1057_v16 = vunpack.c.l.b16 %v976_v30 }
 0x4d7   :  { %v861_v38 = vpop.f32.mrf.mxu1 }
 0x4d8   :  { %v862_v39 = vadd.f32 %v4202_v12, %v861_v38 }
 0x4da   :  { %v3956_v42 = vpack.i.bf16 %v862_v39, %v860_v32  ;;  %v977_v43 = vpack.c.bf16 %v862_v39, %v862_v39 }
 0x4dc   :  { %3957 = vrot.lane.b32.xlu0 %v3956_v42, %s4386_s0  ;;  %3962 = vrot.lane.b32.xlu1 %v3956_v42, %s4388_s18  ;;  %v1058_v44 = vunpack.c.l.b16 %v977_v43 }
 0x4de   :  { %v1060_v47 = vpack.c.b16 %v1058_v44, %v1057_v16 }
 0x4e0   :  { %v1068_v49 = vsel %vm238_vm1, %v1060_v47, 0 }
 0x4e1   :  { %1076 = vmatpush.bf16.xpose.msrb.mxu3 %v1068_v49 }
 0x4e4   :  { %3977 = vrot.lane.b32.xlu1 %v3956_v42, %s4387_s17  ;;  %3972 = vrot.lane.b32.xlu0 %v3966_v24, %s4388_s18 }
 0x4ec   :  { %3992 = vrot.lane.b32.xlu1 %v3966_v24, %s4387_s17 }
 0x526   :  { %v3968_v56 = vpop.permute.xlu2 %3967 }
 0x527   :  { %v3969_v60 = vunpack.i.l.bf16 %v3968_v56 }
 0x528   :  { %v749_v63 = vpop.xlane.xlu0 %748 }
 0x529   :  { %v753_v61 = vmul.f32 %v749_v63, %v4660_v48  ;;  %v978_v33 = vpack.c.bf16 %v3969_v60, %v3969_v60 }
 0x52b   :  { %v755_v1 = vadd.f32 1e-05, %v753_v61 }
 0x52d   :  { %4262 = vrsqrt.f32 %v755_v1  ;;  %vm763_vm12 = vweird.f32 %v755_v1 }
 0x530   :  { %v752_v6 = vpop.xlane.xlu1 %751 }
 0x531   :  { %v754_v7 = vmul.f32 %v752_v6, %v4660_v48 }
 0x533   :  { %v4263_v34 = vpop.eup %4262  ;;  %v756_v8 = vadd.f32 1e-05, %v754_v7 }
 0x534   :  { %v758_v9 = vmul.f32 %v4263_v34, %v755_v1  ;;  %vm764_vm11 = vweird.f32 %v4263_v34 }
 0x535   :  { %4264 = vrsqrt.f32 %v756_v8  ;;  %vm765_vm13 = vmor %vm763_vm12, %vm764_vm11  ;;  %vm773_vm15 = vweird.f32 %v756_v8 }
 0x536   :  { %v759_v11 = vmul.f32 %v4263_v34, %v758_v9 }
 0x538   :  { %v760_v13 = vmul.f32 0.5, %v759_v11 }
 0x53a   :  { %v761_v17 = vsub.f32 1.5, %v760_v13  ;;  %v1093_v13 = vunpack.c.l.b16 %v978_v33  ;;  %v3854_v33 = vld [vmem:[%s5572_s4 + $0x60] sm:$0xff] }
 0x53b   :  { %v4265_v18 = vpop.eup %4264 }
 0x53c   :  { %v762_v20 = vmul.f32 %v4263_v34, %v761_v17  ;;  %v768_v21 = vmul.f32 %v4265_v18, %v756_v8  ;;  %vm774_vm14 = vweird.f32 %v4265_v18 }
 0x53d   :  { %vm775_vm3 = vmor %vm773_vm15, %vm774_vm14 }
 0x53e   :  { %v769_v26 = vmul.f32 %v4265_v18, %v768_v21  ;;  %v766_v23 = vsel %vm765_vm13, %v4263_v34, %v762_v20 }
 0x53f   :  { %v777_v31 = vmul.f32 %v766_v23, %v743_v53  ;;  %v1065_v53 = vsel %vm238_vm1, %v1059_v52, 0 }
 0x540   :  { %v770_v27 = vmul.f32 0.5, %v769_v26  ;;  %1077 = vmatpush.bf16.xpose.msrb.mxu3 %v1065_v53 }
 0x541   :  { %v780_v36 = vmul.f32 %v4200_v29, %v777_v31  ;;  %v4203_v31 = vld [vmem:[%s5574_s5 + $0x4] ss:$0 sm:$0xff] }
 0x542   :  { %v771_v28 = vsub.f32 1.5, %v770_v27 }
 0x543   :  { %v4694_v4 = vadd.f32 %v4201_v25, %v780_v36 }
 0x544   :  { %v772_v22 = vmul.f32 %v4265_v18, %v771_v28 }
 0x546   :  { %v776_v35 = vsel %vm775_vm3, %v4265_v18, %v772_v22 }
 0x547   :  { %v778_v37 = vmul.f32 %v776_v35, %v744_v59  ;;  %v3970_v59 = vunpack.i.h.bf16 %v3968_v56 }
 0x549   :  { %v781_v10 = vmul.f32 %v4200_v29, %v778_v37  ;;  %v979_v2 = vpack.c.bf16 %v3970_v59, %v3970_v59 }
 0x54b   :  { %v4696_v5 = vadd.f32 %v4201_v25, %v781_v10  ;;  %v1094_v3 = vunpack.c.l.b16 %v979_v2 }
 0x54d   :  { %v785_v46 = vpack.c.bf16 %v4696_v5, %v4694_v4  ;;  %v1097_v27 = vpack.c.b16 %v1094_v3, %v1093_v13 }
 0x54e   :  { %v3958_v54 = vpop.permute.xlu0 %3957  ;;  %v3963_v62 = vpop.permute.xlu1 %3962 }
 0x54f   :  { %3660 = vmatmul.msk.bf16.vlgmr.msrb.gmra.mxu0 %vm57_vm0, %v785_v46  ;;  %v3960_v57 = vunpack.i.h.bf16 %v3958_v54  ;;  %v3959_v58 = vunpack.i.l.bf16 %v3958_v54  ;;  %v3965_v63 = vunpack.i.h.bf16 %v3963_v62  ;;  %v3964_v61 = vunpack.i.l.bf16 %v3963_v62 }
 0x550   :  { %v1103_v37 = vsel %vm238_vm1, %v1097_v27, 0 }
 0x551   :  { %v981_v0 = vpack.c.bf16 %v3960_v57, %v3960_v57  ;;  %v980_v1 = vpack.c.bf16 %v3959_v58, %v3959_v58  ;;  %v985_v6 = vpack.c.bf16 %v3965_v63, %v3965_v63  ;;  %v984_v7 = vpack.c.bf16 %v3964_v61, %v3964_v61 }
 0x553   :  { %v1096_v34 = vunpack.c.l.b16 %v981_v0  ;;  %v1095_v8 = vunpack.c.l.b16 %v980_v1  ;;  %v1134_v9 = vunpack.c.l.b16 %v985_v6  ;;  %v1133_v11 = vunpack.c.l.b16 %v984_v7  ;;  %v3855_v0 = vld [vmem:[%s5572_s4 + $0x68] sm:$0xff] }
 0x554   :  { %888 = vmatpush.bf16.msrb.mxu2 %v3855_v0 }
 0x555   :  { %v1098_v12 = vpack.c.b16 %v1096_v34, %v1095_v8  ;;  %v1136_v14 = vpack.c.b16 %v1134_v9, %v1133_v11 }
 0x556   :  { %v3973_v15 = vpop.permute.xlu0 %3972  ;;  %v3978_v18 = vpop.permute.xlu1 %3977 }
 0x557   :  { %v1106_v17 = vsel %vm238_vm1, %v1098_v12, 0  ;;  %v3975_v20 = vunpack.i.h.bf16 %v3973_v15  ;;  %v3974_v21 = vunpack.i.l.bf16 %v3973_v15  ;;  %v3980_v24 = vunpack.i.h.bf16 %v3978_v18 }
 0x558   :  { %1114 = vmatpush.bf16.xpose.msra.mxu0 %v1106_v17  ;;  %v3979_v26 = vunpack.i.l.bf16 %v3978_v18  ;;  %v1144_v19 = vsel %vm238_vm1, %v1136_v14, 0  ;;  %889 = vmatpush.bf16.msrb.mxu2 %v3854_v33 }
 0x559   :  { %v983_v28 = vpack.c.bf16 %v3975_v20, %v3975_v20  ;;  %v982_v29 = vpack.c.bf16 %v3974_v21, %v3974_v21  ;;  %1152 = vmatpush.bf16.xpose.msra.mxu3 %v1144_v19  ;;  %v989_v22 = vpack.c.bf16 %v3980_v24, %v3980_v24 }
 0x55a   :  { %v988_v32 = vpack.c.bf16 %v3979_v26, %v3979_v26 }
 0x55b   :  { %v1132_v35 = vunpack.c.l.b16 %v983_v28  ;;  %v1131_v30 = vunpack.c.l.b16 %v982_v29  ;;  %v1172_v25 = vunpack.c.l.b16 %v989_v22  ;;  %3679 = vmatmul.msk.bf16.vlgmr.msrb.gmra.mxu2 %vm57_vm0, %v4656_v45  ;;  %v37_v22 = vld [vmem:[%s5577_s3 + $0x8] sm:$0xff] }
 0x55c   :  { %v1171_v36 = vunpack.c.l.b16 %v988_v32 }
 0x55d   :  { %v1135_v38 = vpack.c.b16 %v1132_v35, %v1131_v30 }
 0x55e   :  { %v1174_v10 = vpack.c.b16 %v1172_v25, %v1171_v36  ;;  %v3993_v40 = vpop.permute.xlu1 %3992 }
 0x55f   :  { %v1141_v41 = vsel %vm238_vm1, %v1135_v38, 0  ;;  %v3995_v42 = vunpack.i.h.bf16 %v3993_v40  ;;  %v3994_v43 = vunpack.i.l.bf16 %v3993_v40 }
 0x560   :  { %1115 = vmatpush.bf16.xpose.msra.mxu0 %v1103_v37  ;;  %v1182_v16 = vsel %vm238_vm1, %v1174_v10, 0 }
 0x561   :  { %1153 = vmatpush.bf16.xpose.msra.mxu3 %v1141_v41  ;;  %v987_v50 = vpack.c.bf16 %v3995_v42, %v3995_v42  ;;  %v986_v51 = vpack.c.bf16 %v3994_v43, %v3994_v43 }
 0x563   :  { %v1170_v53 = vunpack.c.l.b16 %v987_v50  ;;  %v1169_v54 = vunpack.c.l.b16 %v986_v51  ;;  %v4204_v51 = vld [vmem:[%s5574_s5 + $0x6] ss:$0 sm:$0xff] }
 0x565   :  { %v1173_v58 = vpack.c.b16 %v1170_v53, %v1169_v54 }
 0x567   :  { %v1179_v60 = vsel %vm238_vm1, %v1173_v58, 0 }
 0x568   :  { %1190 = vmatpush.bf16.xpose.msrb.mxu0 %v1182_v16 }
 0x56b   :  { %3680 = vmatmul.msk.bf16.gmra.mxu2 %vm57_vm0, %v4669_v55 }
 0x570   :  { %1191 = vmatpush.bf16.xpose.msrb.mxu0 %v1179_v60 }
 0x5cc   :  { %v816_v23 = vpop.f32.mrf.mxu0 }
 0x5cd   :  { %v817_v39 = vadd.f32 %v4203_v31, %v816_v23  ;;  %v36_v23 = vld [vmem:[%s5577_s3] sm:$0xff] }
 0x5cf   :  { %v926_v46 = vpack.c.bf16 %v817_v39, %v817_v39 }
 0x5d1   :  { %v1048_v56 = vunpack.c.l.b16 %v926_v46 }
 0x5d4   :  { %v818_v44 = vpop.f32.mrf.mxu0 }
 0x5d5   :  { %v819_v47 = vadd.f32 %v4203_v31, %v818_v44 }
 0x5d7   :  { %v927_v49 = vpack.c.bf16 %v819_v47, %v819_v47  ;;  %v3996_v52 = vpack.i.bf16 %v819_v47, %v817_v39 }
 0x5d9   :  { %v1049_v57 = vunpack.c.l.b16 %v927_v49  ;;  %3997 = vrot.lane.b32.xlu2 %v3996_v52, %s4387_s17  ;;  %3982 = vrot.lane.b32.xlu0 %v3996_v52, %s4386_s0 }
 0x5db   :  { %v1050_v59 = vpack.c.b16 %v1049_v57, %v1048_v56 }
 0x5dd   :  { %3681 = vmatmul.msk.bf16.vlgmr.msrb.gmra.mxu3 %vm238_vm1, %v1050_v59 }
 0x5de   :  { %v891_v38 = vpop.f32.mrf.mxu2 }
 0x5df   :  { %v892_v59 = vadd.f32 %v4204_v51, %v891_v38 }
 0x5e1   :  { %3987 = vrot.lane.b32.xlu0 %v3996_v52, %s4388_s18  ;;  %v1030_v0 = vpack.c.bf16 %v892_v59, %v892_v59 }
 0x5e6   :  { %v893_v43 = vpop.f32.mrf.mxu2 }
 0x5e7   :  { %v894_v60 = vadd.f32 %v4204_v51, %v893_v43 }
 0x5ee   :  { %v896_v52 = vpop.f32.mrf.mxu2 }
 0x5ef   :  { %v897_v57 = vadd.f32 %v4204_v51, %v896_v52 }
 0x633   :  { %v3998_v8 = vpop.permute.xlu2 %3997 }
 0x634   :  { %v4000_v3 = vunpack.i.h.bf16 %v3998_v8  ;;  %v3999_v13 = vunpack.i.l.bf16 %v3998_v8 }
 0x636   :  { %v933_v20 = vpack.c.bf16 %v4000_v3, %v4000_v3  ;;  %v932_v21 = vpack.c.bf16 %v3999_v13, %v3999_v13 }
 0x638   :  { %v1163_v26 = vunpack.c.l.b16 %v933_v20  ;;  %v1162_v19 = vunpack.c.l.b16 %v932_v21 }
 0x63a   :  { %v1164_v29 = vpack.c.b16 %v1163_v26, %v1162_v19 }
 0x64b   :  { %v3983_v62 = vpop.permute.xlu0 %3982 }
 0x64c   :  { %v3985_v63 = vunpack.i.h.bf16 %v3983_v62  ;;  %v3984_v61 = vunpack.i.l.bf16 %v3983_v62  ;;  %v1032_v62 = vpack.c.bf16 %v897_v57, %v897_v57 }
 0x64e   :  { %v929_v1 = vpack.c.bf16 %v3985_v63, %v3985_v63  ;;  %v928_v2 = vpack.c.bf16 %v3984_v61, %v3984_v61  ;;  %v898_v63 = vpop.f32.mrf.mxu2 }
 0x64f   :  { %v899_v61 = vadd.f32 %v4204_v51, %v898_v63 }
 0x650   :  { %v1087_v6 = vunpack.c.l.b16 %v929_v1  ;;  %v1086_v7 = vunpack.c.l.b16 %v928_v2  ;;  %v1031_v1 = vpack.c.bf16 %v894_v60, %v894_v60  ;;  %v1409_v2 = vunpack.c.l.b16 %v1032_v62 }
 0x651   :  { %v1033_v33 = vpack.c.bf16 %v899_v61, %v899_v61 }
 0x652   :  { %v1088_v34 = vpack.c.b16 %v1087_v6, %v1086_v7  ;;  %v1407_v7 = vunpack.c.l.b16 %v1030_v0 }
 0x653   :  { %v3988_v9 = vpop.permute.xlu0 %3987  ;;  %v1410_v6 = vunpack.c.l.b16 %v1033_v33 }
 0x654   :  { %v3990_v11 = vunpack.i.h.bf16 %v3988_v9  ;;  %v3989_v12 = vunpack.i.l.bf16 %v3988_v9  ;;  %3682 = vmatmul.msk.bf16.vlgmr.msra.gmra.mxu0 %vm238_vm1, %v1088_v34  ;;  %v1408_v34 = vunpack.c.l.b16 %v1031_v1 }
 0x655   :  { %v1412_v8 = vpack.c.b16 %v1410_v6, %v1409_v2 }
 0x656   :  { %v931_v14 = vpack.c.bf16 %v3990_v11, %v3990_v11  ;;  %v930_v15 = vpack.c.bf16 %v3989_v12, %v3989_v12  ;;  %v1411_v9 = vpack.c.b16 %v1408_v34, %v1407_v7  ;;  %v4757_v11 = vpack.i.bf16 %v894_v60, %v892_v59 }
 0x657   :  { %1424 = vmatpush.bf16.msra.mxu1 %v1412_v8  ;;  %v4759_v12 = vpack.i.bf16 %v899_v61, %v897_v57 }
 0x658   :  { %v1125_v17 = vunpack.c.l.b16 %v931_v14  ;;  %v1124_v18 = vunpack.c.l.b16 %v930_v15 }
 0x65a   :  { %v1126_v24 = vpack.c.b16 %v1125_v17, %v1124_v18 }
 0x65b   :  { %1425 = vmatpush.bf16.msra.mxu1 %v1411_v9 }
 0x65c   :  { %3683 = vmatmul.msk.bf16.vlgmr.msra.gmra.mxu3 %vm238_vm1, %v1126_v24 }
 0x660   :  { %v1079_v27 = vpop.f32.mrf.mxu3 }
 0x661   :  { %v4734_v28 = vadd.f32 %v1079_v27, %v36_v23 }
 0x663   :  { %v1198_v31 = vsel %vm57_vm0, %v4734_v28, -inf }
 0x664   :  { %1199 = vmax.xlane.f32.xlu0 %v1198_v31  ;;  %3684 = vmatmul.msk.bf16.vlgmr.msrb.gmra.mxu0 %vm238_vm1, %v1164_v29 }
 0x668   :  { %v1081_v32 = vpop.f32.mrf.mxu3 }
 0x669   :  { %v4744_v35 = vadd.f32 %v1081_v32, %v37_v22 }
 0x66b   :  { %v1201_v30 = vsel %vm57_vm0, %v4744_v35, -inf }
 0x66c   :  { %1202 = vmax.xlane.f32.xlu1 %v1201_v30 }
 0x6d1   :  { %v1117_v25 = vpop.f32.mrf.mxu0 }
 0x6d2   :  { %v1118_v36 = vadd.f32 %v1117_v25, %v36_v23 }
 0x6d4   :  { %v1204_v37 = vsel %vm57_vm0, %v1118_v36, -inf }
 0x6d5   :  { %1205 = vmax.xlane.f32.xlu0 %v1204_v37 }
 0x6d7   :  { %v4767_v3 = vpop.xlane.xlu0 %1199 }
 0x6d9   :  { %v1119_v39 = vpop.f32.mrf.mxu0 }
 0x6da   :  { %v1120_v10 = vadd.f32 %v1119_v39, %v37_v22 }
 0x6dc   :  { %v1207_v40 = vsel %vm57_vm0, %v1120_v10, -inf }
 0x6dd   :  { %1208 = vmax.xlane.f32.xlu1 %v1207_v40 }
 0x6df   :  { %v1155_v41 = vpop.f32.mrf.mxu3  ;;  %v4769_v13 = vpop.xlane.xlu1 %1202 }
 0x6e0   :  { %v1156_v42 = vadd.f32 %v1155_v41, %v36_v23 }
 0x6e1   :  { %v1193_v16 = vpop.f32.mrf.mxu0 }
 0x6e2   :  { %v1194_v44 = vadd.f32 %v1193_v16, %v36_v23  ;;  %v1210_v46 = vsel %vm57_vm0, %v1156_v42, -inf }
 0x6e3   :  { %1211 = vmax.xlane.f32.xlu2 %v1210_v46 }
 0x6e4   :  { %v1216_v47 = vsel %vm57_vm0, %v1194_v44, -inf }
 0x6e5   :  { %1217 = vmax.xlane.f32.xlu1 %v1216_v47 }
 0x6e7   :  { %v1157_v50 = vpop.f32.mrf.mxu3 }
 0x6e8   :  { %v1158_v49 = vadd.f32 %v1157_v50, %v37_v22 }
 0x6e9   :  { %v1195_v53 = vpop.f32.mrf.mxu0 }
 0x6ea   :  { %v1196_v54 = vadd.f32 %v1195_v53, %v37_v22  ;;  %v1213_v56 = vsel %vm57_vm0, %v1158_v49, -inf }
 0x6eb   :  { %1214 = vmax.xlane.f32.xlu0 %v1213_v56 }
 0x6ec   :  { %v1219_v58 = vsel %vm57_vm0, %v1196_v54, -inf }
 0x6ed   :  { %1220 = vmax.xlane.f32.xlu2 %v1219_v58 }
 0x6fe   :  { %4012 = vrot.lane.b32.xlu1 %v4757_v11, %s4386_s0 }
 0x6ff   :  { %4007 = vrot.lane.b32.xlu0 %v4759_v12, %s4388_s18 }
 0x705   :  { %4002 = vrot.lane.b32.xlu2 %v4759_v12, %s4386_s0 }
 0x748   :  { %v1206_v14 = vpop.xlane.xlu0 %1205 }
 0x749   :  { %v1224_v15 = vsub.f32 %v1118_v36, %v1206_v14 }
 0x74b   :  { %v1234_v17 = vmul.f32 1.442695, %v1224_v15  ;;  %v1222_v15 = vsub.f32 %v4734_v28, %v4767_v3 }
 0x74d   :  { %4266 = vpow2.f32 %v1234_v17  ;;  %v1230_v17 = vmul.f32 1.442695, %v1222_v15 }
 0x750   :  { %v1209_v18 = vpop.xlane.xlu1 %1208 }
 0x751   :  { %v1225_v20 = vsub.f32 %v1120_v10, %v1209_v18  ;;  %v1223_v18 = vsub.f32 %v4744_v35, %v4769_v13 }
 0x753   :  { %v4771_v21 = vpop.eup %4266  ;;  %v1236_v24 = vmul.f32 1.442695, %v1225_v20  ;;  %v1232_v20 = vmul.f32 1.442695, %v1223_v18 }
 0x754   :  { %v1252_v26 = vsel %vm57_vm0, %v4771_v21, 0.0 }
 0x755   :  { %4268 = vpow2.f32 %v1236_v24  ;;  %1253 = vadd.xlane.f32.xlu2 %v1252_v26 }
 0x756   :  { %v1212_v19 = vpop.xlane.xlu2 %1211 }
 0x757   :  { %v1226_v23 = vsub.f32 %v1156_v42, %v1212_v19 }
 0x758   :  { %v1218_v27 = vpop.xlane.xlu1 %1217 }
 0x759   :  { %v1238_v29 = vmul.f32 1.442695, %v1226_v23  ;;  %v1228_v31 = vsub.f32 %v1194_v44, %v1218_v27 }
 0x75b   :  { %v4775_v22 = vpop.eup %4268  ;;  %4270 = vpow2.f32 %v1238_v29  ;;  %v1242_v32 = vmul.f32 1.442695, %v1228_v31 }
 0x75c   :  { %v1255_v30 = vsel %vm57_vm0, %v4775_v22, 0.0 }
 0x75d   :  { %4272 = vpow2.f32 %v1242_v32  ;;  %1256 = vadd.xlane.f32.xlu0 %v1255_v30 }
 0x75e   :  { %v1215_v25 = vpop.xlane.xlu0 %1214 }
 0x75f   :  { %v1227_v36 = vsub.f32 %v1158_v49, %v1215_v25 }
 0x760   :  { %v1221_v37 = vpop.xlane.xlu2 %1220 }
 0x761   :  { %v4779_v38 = vpop.eup %4270  ;;  %v1240_v39 = vmul.f32 1.442695, %v1227_v36  ;;  %v1229_v10 = vsub.f32 %v1196_v54, %v1221_v37 }
 0x762   :  { %v1258_v40 = vsel %vm57_vm0, %v4779_v38, 0.0 }
 0x763   :  { %v4783_v41 = vpop.eup %4272  ;;  %4274 = vpow2.f32 %v1240_v39  ;;  %v1244_v42 = vmul.f32 1.442695, %v1229_v10  ;;  %1259 = vadd.xlane.f32.xlu1 %v1258_v40 }
 0x764   :  { %v1264_v43 = vsel %vm57_vm0, %v4783_v41, 0.0 }
 0x765   :  { %4276 = vpow2.f32 %v1244_v42  ;;  %1265 = vadd.xlane.f32.xlu0 %v1264_v43 }
 0x766   :  { %4278 = vpow2.f32 %v1230_v17 }
 0x767   :  { %4280 = vpow2.f32 %v1232_v20 }
 0x768   :  { %v4003_v16 = vpop.permute.xlu2 %4002 }
 0x769   :  { %v4787_v44 = vpop.eup %4274  ;;  %v4005_v46 = vunpack.i.h.bf16 %v4003_v16  ;;  %v4004_v47 = vunpack.i.l.bf16 %v4003_v16 }
 0x76a   :  { %v1261_v50 = vsel %vm57_vm0, %v4787_v44, 0.0 }
 0x76b   :  { %v4791_v51 = vpop.eup %4276  ;;  %1262 = vadd.xlane.f32.xlu2 %v1261_v50  ;;  %v1037_v49 = vpack.c.bf16 %v4005_v46, %v4005_v46  ;;  %v1036_v52 = vpack.c.bf16 %v4004_v47, %v4004_v47 }
 0x76c   :  { %v1267_v53 = vsel %vm57_vm0, %v4791_v51, 0.0  ;;  %v4805_v24 = vpop.eup %4278 }
 0x76d   :  { %1268 = vadd.xlane.f32.xlu1 %v1267_v53  ;;  %v1444_v54 = vunpack.c.l.b16 %v1037_v49  ;;  %v1443_v56 = vunpack.c.l.b16 %v1036_v52  ;;  %v1246_v26 = vsel %vm57_vm0, %v4805_v24, 0.0 }
 0x76f   :  { %v1446_v57 = vpack.c.b16 %v1444_v54, %v1443_v56 }
 0x770   :  { %v4013_v58 = vpop.permute.xlu1 %4012 }
 0x771   :  { %v4015_v59 = vunpack.i.h.bf16 %v4013_v58  ;;  %v4014_v60 = vunpack.i.l.bf16 %v4013_v58  ;;  %1458 = vmatpush.bf16.msra.mxu2 %v1446_v57  ;;  %v4008_v62 = vpop.permute.xlu0 %4007 }
 0x772   :  { %v4010_v63 = vunpack.i.h.bf16 %v4008_v62  ;;  %v4009_v61 = vunpack.i.l.bf16 %v4008_v62 }
 0x773   :  { %v1035_v0 = vpack.c.bf16 %v4015_v59, %v4015_v59  ;;  %v1034_v1 = vpack.c.bf16 %v4014_v60, %v4014_v60 }
 0x774   :  { %v1041_v2 = vpack.c.bf16 %v4010_v63, %v4010_v63  ;;  %v1040_v33 = vpack.c.bf16 %v4009_v61, %v4009_v61 }
 0x775   :  { %v1442_v6 = vunpack.c.l.b16 %v1035_v0  ;;  %v1441_v7 = vunpack.c.l.b16 %v1034_v1 }
 0x776   :  { %v1478_v34 = vunpack.c.l.b16 %v1041_v2  ;;  %v1477_v8 = vunpack.c.l.b16 %v1040_v33 }
 0x777   :  { %v1445_v9 = vpack.c.b16 %v1442_v6, %v1441_v7 }
 0x778   :  { %v1480_v14 = vpack.c.b16 %v1478_v34, %v1477_v8 }
 0x779   :  { %4017 = vrot.lane.b32.xlu0 %v4757_v11, %s4388_s18  ;;  %1459 = vmatpush.bf16.msra.mxu2 %v1445_v9 }
 0x77a   :  { %1492 = vmatpush.bf16.msrb.mxu3 %v1480_v14 }
 0x783   :  { %4022 = vrot.lane.b32.xlu2 %v4759_v12, %s4387_s17  ;;  %v4809_v12 = vpop.eup %4280 }
 0x786   :  { %4027 = vrot.lane.b32.xlu1 %v4757_v11, %s4387_s17  ;;  %v1249_v11 = vsel %vm57_vm0, %v4809_v12, 0.0 }
 0x7a3   :  { %1247 = vadd.xlane.f32.xlu0 %v1246_v26 }
 0x7ac   :  { %1250 = vadd.xlane.f32.xlu2 %v1249_v11 }
 0x7c8   :  { %v1254_v28 = vpop.xlane.xlu2 %1253 }
 0x7c9   :  { %4282 = vrcp.f32 %v1254_v28  ;;  %v1311_v27 = vand.u32 2147483648, %v1254_v28  ;;  %v1309_v29 = vand.u32 2147483647, %v1254_v28  ;;  %vm1305_vm5 = vweird.f32 %v1254_v28 }
 0x7cb   :  { %v1312_v36 = vor.u32 1.1754944e-38, %v1311_v27  ;;  %vm1310_vm7 = vcmp.eq.f32.partialorder %v1309_v29, 8.507059e+37 }
 0x7cf   :  { %v4283_v3 = vpop.eup %4282 }
 0x7d0   :  { %v1301_v19 = vmul.f32 %v4283_v3, %v1254_v28  ;;  %v1257_v23 = vpop.xlane.xlu0 %1256  ;;  %vm1306_vm4 = vweird.f32 %v4283_v3 }
 0x7d1   :  { %4284 = vrcp.f32 %v1257_v23  ;;  %vm1307_vm6 = vmor %vm1305_vm5, %vm1306_vm4  ;;  %v1326_v42 = vand.u32 2147483648, %v1257_v23  ;;  %v1324_v16 = vand.u32 2147483647, %v1257_v23  ;;  %vm1320_vm10 = vweird.f32 %v1257_v23 }
 0x7d2   :  { %v1302_v35 = vsub.f32 1.0, %v1301_v19 }
 0x7d3   :  { %v1327_v54 = vor.u32 1.1754944e-38, %v1326_v42  ;;  %vm1325_vm12 = vcmp.eq.f32.partialorder %v1324_v16, 8.507059e+37 }
 0x7d4   :  { %v1303_v13 = vmul.f32 %v4283_v3, %v1302_v35 }
 0x7d6   :  { %v1304_v31 = vadd.f32 %v4283_v3, %v1303_v13  ;;  %v1260_v32 = vpop.xlane.xlu1 %1259 }
 0x7d7   :  { %v4285_v30 = vpop.eup %4284  ;;  %4286 = vrcp.f32 %v1260_v32  ;;  %v1339_v58 = vand.u32 2147483647, %v1260_v32  ;;  %v1341_v62 = vand.u32 2147483648, %v1260_v32  ;;  %vm1335_vm14 = vweird.f32 %v1260_v32 }
 0x7d8   :  { %v1308_v25 = vsel %vm1307_vm6, %v4283_v3, %v1304_v31  ;;  %v1316_v37 = vmul.f32 %v4285_v30, %v1257_v23  ;;  %v4813_v39 = vpop.xlane.xlu0 %1265  ;;  %vm1321_vm8 = vweird.f32 %v4285_v30 }
 0x7d9   :  { %4288 = vrcp.f32 %v4813_v39  ;;  %v1313_v10 = vsel %vm1310_vm7, %v1312_v36, %v1308_v25  ;;  %vm1322_vm11 = vmor %vm1320_vm10, %vm1321_vm8  ;;  %vm1340_vm3 = vcmp.eq.f32.partialorder %v1339_v58, 8.507059e+37  ;;  %v1342_v34 = vor.u32 1.1754944e-38, %v1341_v62 }
 0x7da   :  { %v1317_v40 = vsub.f32 1.0, %v1316_v37  ;;  %v4817_v47 = vmul.f32 %v4771_v21, %v1313_v10  ;;  %vm1365_vm6 = vweird.f32 %v4813_v39  ;;  %v1369_v58 = vand.u32 2147483647, %v4813_v39 }
 0x7dc   :  { %v1318_v43 = vmul.f32 %v4285_v30, %v1317_v40  ;;  %v1392_v60 = vpack.c.bf16 %v4817_v47, %v4817_v47 }
 0x7dd   :  { %v4287_v46 = vpop.eup %4286 }
 0x7de   :  { %v1319_v50 = vadd.f32 %v4285_v30, %v1318_v43  ;;  %v1331_v49 = vmul.f32 %v4287_v46, %v1260_v32  ;;  %v1263_v52 = vpop.xlane.xlu2 %1262  ;;  %vm1336_vm13 = vweird.f32 %v4287_v46  ;;  %v1434_v8 = vunpack.c.l.b16 %v1392_v60 }
 0x7df   :  { %v4819_v53 = vpop.eup %4288  ;;  %4290 = vrcp.f32 %v1263_v52  ;;  %v1354_v33 = vand.u32 2147483647, %v1263_v52  ;;  %vm4833_vm15 = vmor %vm1335_vm14, %vm1336_vm13  ;;  %vm1350_vm4 = vweird.f32 %v1263_v52  ;;  %v1371_v60 = vand.u32 2147483648, %v4813_v39 }
 0x7e0   :  { %v1323_v56 = vsel %vm1322_vm11, %v4285_v30, %v1319_v50  ;;  %v1332_v57 = vsub.f32 1.0, %v1331_v49  ;;  %v4821_v59 = vpop.xlane.xlu1 %1268  ;;  %v1361_v0 = vmul.f32 %v4819_v53, %v4813_v39  ;;  %vm1366_vm5 = vweird.f32 %v4819_v53 }
 0x7e1   :  { %v1328_v21 = vsel %vm1325_vm12, %v1327_v54, %v1323_v56  ;;  %4292 = vrcp.f32 %v4821_v59  ;;  %vm4841_vm7 = vcmp.eq.f32.partialorder %v1354_v33, 8.507059e+37  ;;  %vm1380_vm8 = vweird.f32 %v4821_v59  ;;  %vm1367_vm14 = vmor %vm1365_vm6, %vm1366_vm5 }
 0x7e2   :  { %v4827_v63 = vmul.f32 %v4775_v22, %v1328_v21  ;;  %v1333_v61 = vmul.f32 %v4287_v46, %v1332_v57  ;;  %v1356_v22 = vand.u32 2147483648, %v1263_v52  ;;  %v1362_v14 = vsub.f32 1.0, %v1361_v0 }
 0x7e3   :  { %v1384_v16 = vand.u32 2147483647, %v4821_v59  ;;  %v1372_v7 = vor.u32 1.1754944e-38, %v1371_v60 }
 0x7e4   :  { %v1393_v1 = vpack.c.bf16 %v4827_v63, %v4827_v63  ;;  %v1334_v2 = vadd.f32 %v4287_v46, %v1333_v61  ;;  %v1357_v35 = vor.u32 1.1754944e-38, %v1356_v22  ;;  %v1363_v29 = vmul.f32 %v4819_v53, %v1362_v14 }
 0x7e5   :  { %v4291_v6 = vpop.eup %4290 }
 0x7e6   :  { %v1338_v9 = vsel %vm4833_vm15, %v4287_v46, %v1334_v2  ;;  %v1346_v15 = vmul.f32 %v4291_v6, %v1263_v52  ;;  %v4023_v17 = vpop.permute.xlu2 %4022  ;;  %v1435_v11 = vunpack.c.l.b16 %v1393_v1  ;;  %vm1351_vm10 = vweird.f32 %v4291_v6 }
 0x7e7   :  { %v4293_v18 = vpop.eup %4292  ;;  %v4025_v20 = vunpack.i.h.bf16 %v4023_v17  ;;  %v4024_v26 = vunpack.i.l.bf16 %v4023_v17  ;;  %v1343_v28 = vsel %vm1340_vm3, %v1342_v34, %v1338_v9  ;;  %vm1352_vm12 = vmor %vm1350_vm4, %vm1351_vm10  ;;  %v1386_v46 = vand.u32 2147483648, %v4821_v59 }
 0x7e8   :  { %v1347_v3 = vsub.f32 1.0, %v1346_v15  ;;  %v1376_v23 = vmul.f32 %v4293_v18, %v4821_v59  ;;  %v4849_v30 = vmul.f32 %v4779_v38, %v1343_v28  ;;  %v1436_v37 = vpack.c.b16 %v1435_v11, %v1434_v8 }
 0x7e9   :  { %v1045_v13 = vpack.c.bf16 %v4025_v20, %v4025_v20  ;;  %v1044_v27 = vpack.c.bf16 %v4024_v26, %v4024_v26  ;;  %vm1381_vm11 = vweird.f32 %v4293_v18  ;;  %v1364_v38 = vadd.f32 %v4819_v53, %v1363_v29 }
 0x7ea   :  { %v1348_v31 = vmul.f32 %v4291_v6, %v1347_v3  ;;  %v1377_v32 = vsub.f32 1.0, %v1376_v23  ;;  %3686 = vmatmul.msk.bf16.vlgmr.msra.gmra.mxu2 %vm57_vm0, %v1436_v37  ;;  %vm1382_vm13 = vmor %vm1380_vm8, %vm1381_vm11  ;;  %v1394_v62 = vpack.c.bf16 %v4849_v30, %v4849_v30  ;;  %v1387_v2 = vor.u32 1.1754944e-38, %v1386_v46 }
 0x7eb   :  { %v1512_v25 = vunpack.c.l.b16 %v1045_v13  ;;  %v1511_v36 = vunpack.c.l.b16 %v1044_v27  ;;  %v4018_v10 = vpop.permute.xlu0 %4017  ;;  %v1368_v59 = vsel %vm1367_vm14, %v4819_v53, %v1364_v38  ;;  %vm1385_vm15 = vcmp.eq.f32.partialorder %v1384_v16, 8.507059e+37 }
 0x7ec   :  { %v1349_v40 = vadd.f32 %v4291_v6, %v1348_v31  ;;  %v1378_v42 = vmul.f32 %v4293_v18, %v1377_v32  ;;  %v4020_v43 = vunpack.i.h.bf16 %v4018_v10  ;;  %v4019_v49 = vunpack.i.l.bf16 %v4018_v10 }
 0x7ed   :  { %v1514_v50 = vpack.c.b16 %v1512_v25, %v1511_v36  ;;  %vm1370_vm3 = vcmp.eq.f32.partialorder %v1369_v58, 8.507059e+37 }
 0x7ee   :  { %v1353_v54 = vsel %vm1352_vm12, %v4291_v6, %v1349_v40  ;;  %v1379_v56 = vadd.f32 %v4293_v18, %v1378_v42  ;;  %v1039_v57 = vpack.c.bf16 %v4020_v43, %v4020_v43  ;;  %v1038_v21 = vpack.c.bf16 %v4019_v49, %v4019_v49 }
 0x7ef   :  { %v1358_v52 = vsel %vm4841_vm7, %v1357_v35, %v1353_v54  ;;  %1526 = vmatpush.bf16.msra.mxu0 %v1514_v50  ;;  %v1373_v9 = vsel %vm1370_vm3, %v1372_v7, %v1368_v59 }
 0x7f0   :  { %v4866_v61 = vmul.f32 %v4787_v44, %v1358_v52  ;;  %v1383_v0 = vsel %vm1382_vm13, %v4293_v18, %v1379_v56  ;;  %v1476_v1 = vunpack.c.l.b16 %v1039_v57  ;;  %v1475_v33 = vunpack.c.l.b16 %v1038_v21 }
 0x7f1   :  { %v1388_v34 = vsel %vm1385_vm15, %v1387_v2, %v1383_v0  ;;  %v1468_v44 = vunpack.c.l.b16 %v1394_v62  ;;  %v4879_v15 = vmul.f32 %v4783_v41, %v1373_v9  ;;  %v3857_v9 = vld [vmem:[%s5572_s4 + $0x78] sm:$0xff] }
 0x7f2   :  { %v1395_v6 = vpack.c.bf16 %v4866_v61, %v4866_v61  ;;  %v1479_v22 = vpack.c.b16 %v1476_v1, %v1475_v33  ;;  %v4876_v14 = vmul.f32 %v4791_v51, %v1388_v34  ;;  %1587 = vmatpush.bf16.msrb.mxu1 %v3857_v9 }
 0x7f3   :  { %v1396_v28 = vpack.c.bf16 %v4879_v15, %v4879_v15 }
 0x7f4   :  { %v1469_v8 = vunpack.c.l.b16 %v1395_v6  ;;  %1493 = vmatpush.bf16.msrb.mxu3 %v1479_v22  ;;  %v1397_v20 = vpack.c.bf16 %v4876_v14, %v4876_v14 }
 0x7f5   :  { %v1502_v35 = vunpack.c.l.b16 %v1396_v28 }
 0x7f6   :  { %v1470_v39 = vpack.c.b16 %v1469_v8, %v1468_v44  ;;  %v1503_v19 = vunpack.c.l.b16 %v1397_v20 }
 0x7f8   :  { %v4028_v53 = vpop.permute.xlu1 %4027  ;;  %3687 = vmatmul.msk.bf16.vlgmr.msrb.gmra.mxu3 %vm57_vm0, %v1470_v39  ;;  %v1504_v41 = vpack.c.b16 %v1503_v19, %v1502_v35  ;;  %v3856_v39 = vld [vmem:[%s5572_s4 + $0x70] sm:$0xff] }
 0x7f9   :  { %v4030_v17 = vunpack.i.h.bf16 %v4028_v53  ;;  %v4029_v18 = vunpack.i.l.bf16 %v4028_v53  ;;  %1588 = vmatpush.bf16.msrb.mxu1 %v3856_v39 }
 0x7fb   :  { %v1043_v26 = vpack.c.bf16 %v4030_v17, %v4030_v17  ;;  %v1042_v11 = vpack.c.bf16 %v4029_v18, %v4029_v18 }
 0x7fd   :  { %v1510_v3 = vunpack.c.l.b16 %v1043_v26  ;;  %v1509_v51 = vunpack.c.l.b16 %v1042_v11 }
 0x7ff   :  { %v1513_v23 = vpack.c.b16 %v1510_v3, %v1509_v51 }
 0x801   :  { %1527 = vmatpush.bf16.msra.mxu0 %v1513_v23 }
 0x804   :  { %3688 = vmatmul.msk.bf16.vlgmr.msra.gmra.mxu0 %vm57_vm0, %v1504_v41 }
 0x816   :  { %v1248_v13 = vpop.xlane.xlu0 %1247 }
 0x817   :  { %4294 = vrcp.f32 %v1248_v13  ;;  %v1281_v37 = vand.u32 2147483648, %v1248_v13  ;;  %vm1275_vm5 = vweird.f32 %v1248_v13  ;;  %v1279_v10 = vand.u32 2147483647, %v1248_v13 }
 0x819   :  { %v1282_v16 = vor.u32 1.1754944e-38, %v1281_v37  ;;  %vm1280_vm7 = vcmp.eq.f32.partialorder %v1279_v10, 8.507059e+37 }
 0x81d   :  { %v4295_v27 = vpop.eup %4294 }
 0x81e   :  { %v1271_v29 = vmul.f32 %v4295_v27, %v1248_v13  ;;  %vm1276_vm4 = vweird.f32 %v4295_v27 }
 0x81f   :  { %v1251_v31 = vpop.xlane.xlu2 %1250  ;;  %vm1277_vm6 = vmor %vm1275_vm5, %vm1276_vm4 }
 0x820   :  { %v1272_v32 = vsub.f32 1.0, %v1271_v29  ;;  %4296 = vrcp.f32 %v1251_v31  ;;  %v1296_v49 = vand.u32 2147483648, %v1251_v31  ;;  %v1294_v54 = vand.u32 2147483647, %v1251_v31 }
 0x821   :  { %vm1290_vm10 = vweird.f32 %v1251_v31 }
 0x822   :  { %v1273_v25 = vmul.f32 %v4295_v27, %v1272_v32  ;;  %v1297_v58 = vor.u32 1.1754944e-38, %v1296_v49  ;;  %vm1295_vm12 = vcmp.eq.f32.partialorder %v1294_v54, 8.507059e+37 }
 0x824   :  { %v1274_v36 = vadd.f32 %v4295_v27, %v1273_v25  ;;  %v4205_v25 = vld [vmem:[%s5574_s5 + $0x7] ss:$0 sm:$0xff] }
 0x826   :  { %v4297_v40 = vpop.eup %4296  ;;  %v1278_v42 = vsel %vm1277_vm6, %v4295_v27, %v1274_v36  ;;  %vm5580_vm6 = vcmask 523264  }
 0x827   :  { %v1286_v43 = vmul.f32 %v4297_v40, %v1251_v31  ;;  %v1283_v50 = vsel %vm1280_vm7, %v1282_v16, %v1278_v42  ;;  %vm1291_vm8 = vweird.f32 %v4297_v40 }
 0x828   :  { %v4888_v56 = vmul.f32 %v4805_v24, %v1283_v50  ;;  %vm1292_vm11 = vmor %vm1290_vm10, %vm1291_vm8 }
 0x829   :  { %v1287_v46 = vsub.f32 1.0, %v1286_v43 }
 0x82a   :  { %v1390_v21 = vpack.c.bf16 %v4888_v56, %v4888_v56 }
 0x82b   :  { %v1288_v38 = vmul.f32 %v4297_v40, %v1287_v46 }
 0x82c   :  { %v1400_v1 = vunpack.c.l.b16 %v1390_v21 }
 0x82d   :  { %v1289_v57 = vadd.f32 %v4297_v40, %v1288_v38 }
 0x82f   :  { %v1293_v60 = vsel %vm1292_vm11, %v4297_v40, %v1289_v57 }
 0x830   :  { %v1298_v52 = vsel %vm1295_vm12, %v1297_v58, %v1293_v60 }
 0x831   :  { %v4893_v62 = vmul.f32 %v4809_v12, %v1298_v52 }
 0x833   :  { %v1391_v0 = vpack.c.bf16 %v4893_v62, %v4893_v62 }
 0x835   :  { %v1401_v2 = vunpack.c.l.b16 %v1391_v0 }
 0x837   :  { %v1402_v24 = vpack.c.b16 %v1401_v2, %v1400_v1  ;;  %v3859_v1 = vld [vmem:[%s5572_s4 + $0x88] sm:$0xff] }
 0x838   :  { %1711 = vmatpush.bf16.msrb.mxu2 %v3859_v1 }
 0x839   :  { %3685 = vmatmul.msk.bf16.vlgmr.msra.gmra.mxu1 %vm57_vm0, %v1402_v24  ;;  %v3858_v24 = vld [vmem:[%s5572_s4 + $0x80] sm:$0xff] }
 0x83c   :  { %1712 = vmatpush.bf16.msrb.mxu2 %v3858_v24 }
 0x86d   :  { %v1461_v33 = vpop.f32.mrf.mxu2 }
 0x875   :  { %v1463_v59 = vpop.f32.mrf.mxu2 }
 0x876   :  { %v4031_v6 = vpack.i.bf16 %v1463_v59, %v1461_v33 }
 0x878   :  { %4032 = vrot.lane.b32.xlu1 %v4031_v6, %s4389_s29 }
 0x87b   :  { %v1495_v7 = vpop.f32.mrf.mxu3 }
 0x881   :  { %v1529_v34 = vpop.f32.mrf.mxu0 }
 0x883   :  { %v1497_v22 = vpop.f32.mrf.mxu3 }
 0x884   :  { %v4036_v44 = vpack.i.bf16 %v1497_v22, %v1495_v7 }
 0x886   :  { %4037 = vrot.lane.b32.xlu1 %v4036_v44, %s4390_s30 }
 0x889   :  { %v1531_v12 = vpop.f32.mrf.mxu0 }
 0x88a   :  { %v4041_v8 = vpack.i.bf16 %v1531_v12, %v1529_v34 }
 0x88e   :  { %4042 = vrot.lane.b32.xlu1 %v4041_v8, %s4391_s8 }
 0x8b6   :  { %v1427_v17 = vpop.f32.mrf.mxu1 }
 0x8be   :  { %v1429_v3 = vpop.f32.mrf.mxu1 }
 0x8ea   :  { %v4033_v53 = vpop.permute.xlu1 %4032 }
 0x8eb   :  { %v4035_v20 = vunpack.i.h.bf16 %v4033_v53  ;;  %v4034_v26 = vunpack.i.l.bf16 %v4033_v53 }
 0x8ed   :  { %v1558_v19 = vsel %vm238_vm1, %v1427_v17, %v4034_v26  ;;  %v1559_v23 = vsel %vm238_vm1, %v1429_v3, %v4035_v20  ;;  %v4206_v26 = vld [vmem:[%s5574_s5 + $0xc] ss:$0 sm:$0xff] }
 0x8f8   :  { %v4038_v18 = vpop.permute.xlu1 %4037 }
 0x8f9   :  { %v4040_v11 = vunpack.i.h.bf16 %v4038_v18  ;;  %v4039_v28 = vunpack.i.l.bf16 %v4038_v18 }
 0x8fb   :  { %v1561_v13 = vsel %vm349_vm2, %v1559_v23, %v4040_v11  ;;  %v1560_v27 = vsel %vm349_vm2, %v1558_v19, %v4039_v28 }
 0x900   :  { %v4043_v51 = vpop.permute.xlu1 %4042 }
 0x901   :  { %v4045_v35 = vunpack.i.h.bf16 %v4043_v51  ;;  %v4044_v41 = vunpack.i.l.bf16 %v4043_v51  ;;  %v4207_v51 = vld [vmem:[%s5574_s5 + $0xd] ss:$0 sm:$0xff] }
 0x903   :  { %v1562_v29 = vsel %vm690_vm9, %v1560_v27, %v4044_v41  ;;  %v1563_v31 = vsel %vm690_vm9, %v1561_v13, %v4045_v35 }
 0x904   :  { %v1564_v32 = vpack.c.bf16 %v1563_v31, %v1562_v29  ;;  %v3863_v29 = vld [vmem:[%s5572_s4 + $0xa8] sm:$0xff]  ;;  %v3862_v31 = vld [vmem:[%s5572_s4 + $0xa0] sm:$0xff] }
 0x905   :  { %1763 = vmatpush.bf16.msra.mxu3 %v3863_v29 }
 0x906   :  { %3697 = vmatmul.msk.bf16.vlgmr.msrb.gmra.mxu1 %vm57_vm0, %v1564_v32  ;;  %v3861_v32 = vld [vmem:[%s5572_s4 + $0x98] sm:$0xff] }
 0x909   :  { %1764 = vmatpush.bf16.msra.mxu3 %v3862_v31 }
 0x90d   :  { %1765 = vmatpush.bf16.msra.mxu3 %v3861_v32  ;;  %v4210_v32 = vld [vmem:[%s5574_s5 + $0xe] ss:$0 sm:$0xff] }
 0x983   :  { %v1590_v36 = vpop.f32.mrf.mxu1 }
 0x984   :  { %v1591_v37 = vadd.f32 %v4205_v25, %v1590_v36 }
 0x986   :  { %v1629_v10 = vadd.f32 %v1591_v37, %v4694_v4  ;;  %v4208_v37 = vld [vmem:[%s5574_s5 + $0x8] ss:$0 sm:$0xff] }
 0x988   :  { %v1633_v40 = vsel %vm57_vm0, %v1629_v10, 0.0 }
 0x989   :  { %1634 = vadd.xlane.f32.xlu1 %v1633_v40 }
 0x98b   :  { %v1592_v42 = vpop.f32.mrf.mxu1 }
 0x98c   :  { %v1593_v43 = vadd.f32 %v4205_v25, %v1592_v42  ;;  %v3860_v25 = vld [vmem:[%s5572_s4 + $0x90] sm:$0xff] }
 0x98d   :  { %1766 = vmatpush.bf16.msra.mxu3 %v3860_v25 }
 0x98e   :  { %v1630_v16 = vadd.f32 %v1593_v43, %v4696_v5 }
 0x990   :  { %v1636_v46 = vsel %vm57_vm0, %v1630_v16, 0.0 }
 0x991   :  { %1637 = vadd.xlane.f32.xlu0 %v1636_v46 }
 0x9fc   :  { %v1635_v50 = vpop.xlane.xlu1 %1634 }
 0x9fd   :  { %v1639_v49 = vmul.f32 %v1635_v50, %v4660_v48  ;;  %v4209_v50 = vld [vmem:[%s5574_s5 + $0x9] ss:$0 sm:$0xff] }
 0x9ff   :  { %v1641_v38 = vsub.f32 %v1629_v10, %v1639_v49 }
 0xa01   :  { %v1643_v54 = vmul.f32 %v1641_v38, %v1641_v38 }
 0xa03   :  { %v1645_v57 = vsel %vm57_vm0, %v1643_v54, 0.0 }
 0xa04   :  { %v1638_v58 = vpop.xlane.xlu0 %1637  ;;  %1646 = vadd.xlane.f32.xlu2 %v1645_v57 }
 0xa05   :  { %v1640_v4 = vmul.f32 %v1638_v58, %v4660_v48 }
 0xa07   :  { %v1642_v60 = vsub.f32 %v1630_v16, %v1640_v4 }
 0xa09   :  { %v1644_v52 = vmul.f32 %v1642_v60, %v1642_v60 }
 0xa0b   :  { %v1648_v21 = vsel %vm57_vm0, %v1644_v52, 0.0 }
 0xa0c   :  { %1649 = vadd.xlane.f32.xlu0 %v1648_v21 }
 0xa77   :  { %v1647_v5 = vpop.xlane.xlu2 %1646 }
 0xa78   :  { %v1651_v0 = vmul.f32 %v1647_v5, %v4660_v48 }
 0xa7a   :  { %v1653_v2 = vadd.f32 1e-05, %v1651_v0 }
 0xa7c   :  { %4298 = vrsqrt.f32 %v1653_v2  ;;  %vm1661_vm14 = vweird.f32 %v1653_v2 }
 0xa7f   :  { %v1650_v33 = vpop.xlane.xlu0 %1649 }
 0xa80   :  { %v1652_v59 = vmul.f32 %v1650_v33, %v4660_v48 }
 0xa82   :  { %v4299_v6 = vpop.eup %4298  ;;  %v1654_v7 = vadd.f32 1e-05, %v1652_v59 }
 0xa83   :  { %v1656_v34 = vmul.f32 %v4299_v6, %v1653_v2  ;;  %vm1662_vm13 = vweird.f32 %v4299_v6 }
 0xa84   :  { %4300 = vrsqrt.f32 %v1654_v7  ;;  %vm1663_vm15 = vmor %vm1661_vm14, %vm1662_vm13  ;;  %vm1671_vm4 = vweird.f32 %v1654_v7 }
 0xa85   :  { %v1657_v22 = vmul.f32 %v4299_v6, %v1656_v34 }
 0xa87   :  { %v1658_v44 = vmul.f32 0.5, %v1657_v22 }
 0xa89   :  { %v1659_v12 = vsub.f32 1.5, %v1658_v44  ;;  %v3865_v44 = vld [vmem:[%s5572_s4 + $0xb8] sm:$0xff] }
 0xa8a   :  { %v4301_v8 = vpop.eup %4300  ;;  %1855 = vmatpush.bf16.msrb.mxu0 %v3865_v44 }
 0xa8b   :  { %v1660_v9 = vmul.f32 %v4299_v6, %v1659_v12  ;;  %v1666_v39 = vmul.f32 %v4301_v8, %v1654_v7  ;;  %vm1672_vm3 = vweird.f32 %v4301_v8  ;;  %v3867_v12 = vld [vmem:[%s5572_s4 + $0xc8] sm:$0xff] }
 0xa8c   :  { %vm1673_vm5 = vmor %vm1671_vm4, %vm1672_vm3  ;;  %1887 = vmatpush.bf16.msra.mxu1 %v3867_v12 }
 0xa8d   :  { %v1667_v53 = vmul.f32 %v4301_v8, %v1666_v39  ;;  %v1664_v17 = vsel %vm1663_vm15, %v4299_v6, %v1660_v9  ;;  %v3864_v39 = vld [vmem:[%s5572_s4 + $0xb0] sm:$0xff] }
 0xa8e   :  { %v1675_v11 = vmul.f32 %v1664_v17, %v1641_v38  ;;  %v3868_v17 = vld [vmem:[%s5572_s4 + $0xd0] sm:$0xff]  ;;  %1856 = vmatpush.bf16.msrb.mxu0 %v3864_v39 }
 0xa8f   :  { %v1668_v18 = vmul.f32 0.5, %v1667_v53  ;;  %v3866_v53 = vld [vmem:[%s5572_s4 + $0xc0] sm:$0xff] }
 0xa90   :  { %v1678_v19 = vmul.f32 %v4206_v26, %v1675_v11  ;;  %1888 = vmatpush.bf16.msra.mxu1 %v3866_v53 }
 0xa91   :  { %v1669_v20 = vsub.f32 1.5, %v1668_v18 }
 0xa92   :  { %v1681_v41 = vadd.f32 %v4207_v51, %v1678_v19 }
 0xa93   :  { %v1670_v28 = vmul.f32 %v4301_v8, %v1669_v20 }
 0xa95   :  { %v1674_v3 = vsel %vm1673_vm5, %v4301_v8, %v1670_v28  ;;  %v3869_v8 = vld [vmem:[%s5572_s4 + $0xd8] sm:$0xff] }
 0xa96   :  { %v1676_v23 = vmul.f32 %v1674_v3, %v1642_v60  ;;  %1919 = vmatpush.bf16.msra.mxu2 %v3869_v8 }
 0xa98   :  { %v1679_v35 = vmul.f32 %v4206_v26, %v1676_v23 }
 0xa9a   :  { %v1682_v13 = vadd.f32 %v4207_v51, %v1679_v35  ;;  %1920 = vmatpush.bf16.msra.mxu2 %v3868_v17 }
 0xa9c   :  { %v1683_v27 = vpack.c.bf16 %v1682_v13, %v1681_v41 }
 0xa9e   :  { %3706 = vmatmul.msk.bf16.vlgmr.msrb.gmra.mxu2 %vm57_vm0, %v1683_v27 }
 0xb21   :  { %v1714_v36 = vpop.f32.mrf.mxu2 }
 0xb22   :  { %v1715_v10 = vadd.f32 %v4208_v37, %v1714_v36 }
 0xb24   :  { %v1719_v43 = vmax.f32 %v1715_v10, 0.0  ;;  %v4211_v10 = vld [vmem:[%s5574_s5 + $0xf] ss:$0 sm:$0xff] }
 0xb29   :  { %v1716_v40 = vpop.f32.mrf.mxu2 }
 0xb2a   :  { %v1717_v42 = vadd.f32 %v4208_v37, %v1716_v40 }
 0xb2c   :  { %v1720_v16 = vmax.f32 %v1717_v42, 0.0 }
 0xb2e   :  { %v1721_v46 = vpack.c.bf16 %v1720_v16, %v1719_v43 }
 0xb30   :  { %3723 = vmatmul.msk.bf16.vlgmr.msra.gmra.mxu3 %vm5580_vm6, %v1721_v46 }
 0xbb3   :  { %v1768_v49 = vpop.f32.mrf.mxu3 }
 0xbb4   :  { %v1769_v38 = vadd.f32 %v4209_v50, %v1768_v49 }
 0xbb6   :  { %v1773_v54 = vadd.f32 %v1769_v38, %v1681_v41 }
 0xbb8   :  { %v1777_v57 = vsel %vm57_vm0, %v1773_v54, 0.0 }
 0xbb9   :  { %1778 = vadd.xlane.f32.xlu2 %v1777_v57  ;;  %v4212_v57 = vld [vmem:[%s5574_s5 + $0x10] ss:$0 sm:$0xff] }
 0xbbb   :  { %v1770_v58 = vpop.f32.mrf.mxu3 }
 0xbbc   :  { %v1771_v4 = vadd.f32 %v4209_v50, %v1770_v58 }
 0xbbe   :  { %v1774_v60 = vadd.f32 %v1771_v4, %v1682_v13 }
 0xbc0   :  { %v1780_v52 = vsel %vm57_vm0, %v1774_v60, 0.0 }
 0xbc1   :  { %1781 = vadd.xlane.f32.xlu0 %v1780_v52 }
 0xc2c   :  { %v1779_v21 = vpop.xlane.xlu2 %1778 }
 0xc2d   :  { %v1783_v5 = vmul.f32 %v1779_v21, %v4660_v48 }
 0xc2f   :  { %v1785_v0 = vsub.f32 %v1773_v54, %v1783_v5  ;;  %v4213_v54 = vld [vmem:[%s5574_s5 + $0x11] ss:$0 sm:$0xff] }
 0xc31   :  { %v1787_v1 = vmul.f32 %v1785_v0, %v1785_v0 }
 0xc33   :  { %v1789_v2 = vsel %vm57_vm0, %v1787_v1, 0.0 }
 0xc34   :  { %v1782_v24 = vpop.xlane.xlu0 %1781  ;;  %1790 = vadd.xlane.f32.xlu2 %v1789_v2 }
 0xc35   :  { %v1784_v33 = vmul.f32 %v1782_v24, %v4660_v48 }
 0xc37   :  { %v1786_v59 = vsub.f32 %v1774_v60, %v1784_v33  ;;  %v4214_v60 = vld [vmem:[%s5574_s5 + $0x12] ss:$0 sm:$0xff] }
 0xc39   :  { %v1788_v6 = vmul.f32 %v1786_v59, %v1786_v59 }
 0xc3b   :  { %v1792_v7 = vsel %vm57_vm0, %v1788_v6, 0.0 }
 0xc3c   :  { %1793 = vadd.xlane.f32.xlu0 %v1792_v7 }
 0xca7   :  { %v1791_v34 = vpop.xlane.xlu2 %1790 }
 0xca8   :  { %v1795_v22 = vmul.f32 %v1791_v34, %v4660_v48 }
 0xcaa   :  { %v1797_v9 = vadd.f32 1e-05, %v1795_v22 }
 0xcac   :  { %4302 = vrsqrt.f32 %v1797_v9  ;;  %vm1805_vm8 = vweird.f32 %v1797_v9 }
 0xcaf   :  { %v1794_v18 = vpop.xlane.xlu0 %1793 }
 0xcb0   :  { %v1796_v20 = vmul.f32 %v1794_v18, %v4660_v48 }
 0xcb2   :  { %v4303_v26 = vpop.eup %4302  ;;  %v1798_v11 = vadd.f32 1e-05, %v1796_v20 }
 0xcb3   :  { %v1800_v28 = vmul.f32 %v4303_v26, %v1797_v9  ;;  %vm1806_vm7 = vweird.f32 %v4303_v26 }
 0xcb4   :  { %4304 = vrsqrt.f32 %v1798_v11  ;;  %vm1807_vm10 = vmor %vm1805_vm8, %vm1806_vm7  ;;  %vm1815_vm12 = vweird.f32 %v1798_v11 }
 0xcb5   :  { %v1801_v3 = vmul.f32 %v4303_v26, %v1800_v28 }
 0xcb7   :  { %v1802_v51 = vmul.f32 0.5, %v1801_v3 }
 0xcb9   :  { %v1803_v19 = vsub.f32 1.5, %v1802_v51 }
 0xcba   :  { %v4305_v23 = vpop.eup %4304 }
 0xcbb   :  { %v1804_v35 = vmul.f32 %v4303_v26, %v1803_v19  ;;  %v1810_v41 = vmul.f32 %v4305_v23, %v1798_v11  ;;  %vm1816_vm11 = vweird.f32 %v4305_v23 }
 0xcbc   :  { %vm1817_vm13 = vmor %vm1815_vm12, %vm1816_vm11 }
 0xcbd   :  { %v1811_v13 = vmul.f32 %v4305_v23, %v1810_v41  ;;  %v1808_v27 = vsel %vm1807_vm10, %v4303_v26, %v1804_v35 }
 0xcbe   :  { %v1819_v25 = vmul.f32 %v1808_v27, %v1785_v0 }
 0xcbf   :  { %v1812_v29 = vmul.f32 0.5, %v1811_v13 }
 0xcc0   :  { %v1822_v40 = vmul.f32 %v4210_v32, %v1819_v25 }
 0xcc1   :  { %v1813_v31 = vsub.f32 1.5, %v1812_v29 }
 0xcc2   :  { %v4991_v16 = vadd.f32 %v4211_v10, %v1822_v40 }
 0xcc3   :  { %v1814_v36 = vmul.f32 %v4305_v23, %v1813_v31 }
 0xcc5   :  { %v1818_v37 = vsel %vm1817_vm13, %v4305_v23, %v1814_v36 }
 0xcc6   :  { %v1820_v42 = vmul.f32 %v1818_v37, %v1786_v59 }
 0xcc8   :  { %v1823_v43 = vmul.f32 %v4210_v32, %v1820_v42 }
 0xcca   :  { %v4993_v46 = vadd.f32 %v4211_v10, %v1823_v43 }
 0xccc   :  { %v1827_v50 = vpack.c.bf16 %v4993_v46, %v4991_v16 }
 0xcce   :  { %3732 = vmatmul.msk.bf16.vlgmr.msrb.gmra.mxu0 %vm57_vm0, %v1827_v50  ;;  %3741 = vmatmul.msk.bf16.vlgmr.msra.gmra.mxu1 %vm57_vm0, %v1827_v50 }
 0xccf   :  { %3750 = vmatmul.msk.bf16.vlgmr.msra.gmra.mxu2 %vm57_vm0, %v1827_v50 }
 0xd4b   :  { %v1858_v49 = vpop.f32.mrf.mxu0  ;;  %v1890_v38 = vpop.f32.mrf.mxu1 }
 0xd4c   :  { %v1891_v58 = vadd.f32 %v4213_v54, %v1890_v38  ;;  %v1859_v5 = vadd.f32 %v4212_v57, %v1858_v49 }
 0xd4e   :  { %v1980_v2 = vpack.c.bf16 %v1891_v58, %v1891_v58  ;;  %v1952_v39 = vpack.c.bf16 %v1859_v5, %v1859_v5 }
 0xd50   :  { %v2023_v7 = vunpack.c.l.b16 %v1980_v2  ;;  %v2018_v28 = vunpack.c.l.b16 %v1952_v39 }
 0xd52   :  { %v1922_v4 = vpop.f32.mrf.mxu2 }
 0xd53   :  { %v1860_v52 = vpop.f32.mrf.mxu0  ;;  %v1892_v21 = vpop.f32.mrf.mxu1  ;;  %v1923_v59 = vadd.f32 %v4214_v60, %v1922_v4 }
 0xd54   :  { %v1861_v0 = vadd.f32 %v4212_v57, %v1860_v52  ;;  %v1893_v1 = vadd.f32 %v4213_v54, %v1892_v21 }
 0xd55   :  { %v2008_v44 = vpack.c.bf16 %v1923_v59, %v1923_v59 }
 0xd56   :  { %v4056_v24 = vpack.i.bf16 %v1893_v1, %v1891_v58  ;;  %v4051_v33 = vpack.i.bf16 %v1861_v0, %v1859_v5  ;;  %v1981_v6 = vpack.c.bf16 %v1893_v1, %v1893_v1  ;;  %v1953_v12 = vpack.c.bf16 %v1861_v0, %v1861_v0 }
 0xd57   :  { %v2343_v20 = vunpack.c.l.b16 %v2008_v44 }
 0xd58   :  { %4057 = vrot.lane.b32.xlu0 %v4056_v24, %s4386_s0  ;;  %4047 = vrot.lane.b32.xlu2 %v4056_v24, %s4387_s17  ;;  %v2024_v34 = vunpack.c.l.b16 %v1981_v6  ;;  %v2019_v26 = vunpack.c.l.b16 %v1953_v12 }
 0xd59   :  { %4052 = vrot.lane.b32.xlu1 %v4051_v33, %s4387_s17 }
 0xd5a   :  { %v1924_v22 = vpop.f32.mrf.mxu2  ;;  %v2025_v9 = vpack.c.b16 %v2024_v34, %v2023_v7  ;;  %v2020_v51 = vpack.c.b16 %v2019_v26, %v2018_v28 }
 0xd5b   :  { %v1925_v8 = vadd.f32 %v4214_v60, %v1924_v22 }
 0xd5c   :  { %v2030_v17 = vsel %vm238_vm1, %v2025_v9, 0 }
 0xd5d   :  { %v2009_v53 = vpack.c.bf16 %v1925_v8, %v1925_v8  ;;  %v5013_v18 = vpack.i.bf16 %v1925_v8, %v1923_v59  ;;  %2039 = vmatpush.bf16.xpose.msrb.mxu3 %v2030_v17 }
 0xd5f   :  { %v2344_v11 = vunpack.c.l.b16 %v2009_v53 }
 0xd60   :  { %4062 = vrot.lane.b32.xlu2 %v4056_v24, %s4388_s18  ;;  %4067 = vrot.lane.b32.xlu0 %v4051_v33, %s4386_s0 }
 0xd61   :  { %4072 = vrot.lane.b32.xlu1 %v4051_v33, %s4388_s18  ;;  %v2345_v3 = vpack.c.b16 %v2344_v11, %v2343_v20 }
 0xd64   :  { %3751 = vmatmul.msk.bf16.vlgmr.msrb.gmra.mxu3 %vm238_vm1, %v2020_v51 }
 0xd65   :  { %2357 = vmatpush.bf16.msra.mxu3 %v2345_v3 }
 0xdb2   :  { %v4048_v19 = vpop.permute.xlu2 %4047 }
 0xdb3   :  { %v4050_v23 = vunpack.i.h.bf16 %v4048_v19  ;;  %v4049_v35 = vunpack.i.l.bf16 %v4048_v19 }
 0xdb5   :  { %v1987_v41 = vpack.c.bf16 %v4050_v23, %v4050_v23  ;;  %v1986_v13 = vpack.c.bf16 %v4049_v35, %v4049_v35  ;;  %v4382_v35 = vld [vmem:[%s5575_s2] sm:$0xff] }
 0xdb7   :  { %v2114_v27 = vunpack.c.l.b16 %v1987_v41  ;;  %v2113_v29 = vunpack.c.l.b16 %v1986_v13 }
 0xdb9   :  { %v2115_v31 = vpack.c.b16 %v2114_v27, %v2113_v29 }
 0xdba   :  { %v4063_v32 = vpop.permute.xlu2 %4062 }
 0xdbb   :  { %v4065_v25 = vunpack.i.h.bf16 %v4063_v32  ;;  %v4064_v36 = vunpack.i.l.bf16 %v4063_v32  ;;  %v2120_v37 = vsel %vm238_vm1, %v2115_v31, 0 }
 0xdbc   :  { %2129 = vmatpush.bf16.xpose.msrb.mxu2 %v2120_v37 }
 0xdbd   :  { %v1985_v10 = vpack.c.bf16 %v4065_v25, %v4065_v25  ;;  %v1984_v40 = vpack.c.bf16 %v4064_v36, %v4064_v36 }
 0xdbf   :  { %v2084_v42 = vunpack.c.l.b16 %v1985_v10  ;;  %v2083_v43 = vunpack.c.l.b16 %v1984_v40  ;;  %v4383_v10 = vld [vmem:[%s5575_s2 + $0x8] sm:$0xff] }
 0xdc1   :  { %v2085_v50 = vpack.c.b16 %v2084_v42, %v2083_v43 }
 0xdc3   :  { %v2090_v49 = vsel %vm238_vm1, %v2085_v50, 0 }
 0xdc4   :  { %2099 = vmatpush.bf16.xpose.msrb.mxu1 %v2090_v49 }
 0xdca   :  { %v4058_v38 = vpop.permute.xlu0 %4057 }
 0xdcb   :  { %v4060_v54 = vunpack.i.h.bf16 %v4058_v38  ;;  %v4059_v57 = vunpack.i.l.bf16 %v4058_v38  ;;  %v4053_v58 = vpop.permute.xlu1 %4052 }
 0xdcc   :  { %v4055_v4 = vunpack.i.h.bf16 %v4053_v58  ;;  %v4054_v60 = vunpack.i.l.bf16 %v4053_v58 }
 0xdcd   :  { %v1983_v52 = vpack.c.bf16 %v4060_v54, %v4060_v54  ;;  %v1982_v21 = vpack.c.bf16 %v4059_v57, %v4059_v57 }
 0xdce   :  { %v1959_v5 = vpack.c.bf16 %v4055_v4, %v4055_v4  ;;  %v1958_v0 = vpack.c.bf16 %v4054_v60, %v4054_v60 }
 0xdcf   :  { %v2054_v1 = vunpack.c.l.b16 %v1983_v52  ;;  %v2053_v2 = vunpack.c.l.b16 %v1982_v21 }
 0xdd0   :  { %v2109_v24 = vunpack.c.l.b16 %v1959_v5  ;;  %v2108_v33 = vunpack.c.l.b16 %v1958_v0 }
 0xdd1   :  { %v2055_v59 = vpack.c.b16 %v2054_v1, %v2053_v2 }
 0xdd2   :  { %v2110_v6 = vpack.c.b16 %v2109_v24, %v2108_v33  ;;  %v4068_v7 = vpop.permute.xlu0 %4067 }
 0xdd3   :  { %v4070_v34 = vunpack.i.h.bf16 %v4068_v7  ;;  %v4069_v22 = vunpack.i.l.bf16 %v4068_v7  ;;  %v4073_v44 = vpop.permute.xlu1 %4072  ;;  %v2060_v12 = vsel %vm238_vm1, %v2055_v59, 0 }
 0xdd4   :  { %v4075_v8 = vunpack.i.h.bf16 %v4073_v44  ;;  %v4074_v9 = vunpack.i.l.bf16 %v4073_v44  ;;  %3754 = vmatmul.msk.bf16.vlgmr.msrb.gmra.mxu2 %vm238_vm1, %v2110_v6  ;;  %2069 = vmatpush.bf16.xpose.msra.mxu0 %v2060_v12 }
 0xdd5   :  { %v1955_v39 = vpack.c.bf16 %v4070_v34, %v4070_v34  ;;  %v1954_v53 = vpack.c.bf16 %v4069_v22, %v4069_v22 }
 0xdd6   :  { %v1957_v17 = vpack.c.bf16 %v4075_v8, %v4075_v8  ;;  %v1956_v20 = vpack.c.bf16 %v4074_v9, %v4074_v9 }
 0xdd7   :  { %v2049_v26 = vunpack.c.l.b16 %v1955_v39  ;;  %v2048_v11 = vunpack.c.l.b16 %v1954_v53 }
 0xdd8   :  { %v2079_v28 = vunpack.c.l.b16 %v1957_v17  ;;  %v2078_v3 = vunpack.c.l.b16 %v1956_v20 }
 0xdd9   :  { %v2050_v51 = vpack.c.b16 %v2049_v26, %v2048_v11 }
 0xdda   :  { %v2080_v19 = vpack.c.b16 %v2079_v28, %v2078_v3 }
 0xddb   :  { %3752 = vmatmul.msk.bf16.vlgmr.msra.gmra.mxu0 %vm238_vm1, %v2050_v51 }
 0xddc   :  { %3753 = vmatmul.msk.bf16.vlgmr.msrb.gmra.mxu1 %vm238_vm1, %v2080_v19 }
 0xde7   :  { %v2041_v25 = vpop.f32.mrf.mxu3 }
 0xde8   :  { %v5030_v36 = vadd.f32 %v4382_v35, %v2041_v25 }
 0xdea   :  { %v2136_v38 = vsel %vm349_vm2, %v5030_v36, -inf }
 0xdef   :  { %v2043_v60 = vpop.f32.mrf.mxu3 }
 0xdf0   :  { %v2044_v21 = vadd.f32 %v4383_v10, %v2043_v60 }
 0xdf2   :  { %v2139_v5 = vsel %vm349_vm2, %v2044_v21, -inf }
 0xe57   :  { %v2131_v23 = vpop.f32.mrf.mxu2 }
 0xe58   :  { %v2132_v41 = vadd.f32 %v4382_v35, %v2131_v23  ;;  %v2071_v13 = vpop.f32.mrf.mxu0 }
 0xe59   :  { %v2072_v27 = vadd.f32 %v4382_v35, %v2071_v13  ;;  %v2101_v29 = vpop.f32.mrf.mxu1 }
 0xe5a   :  { %v2154_v31 = vsel %vm349_vm2, %v2132_v41, -inf  ;;  %v2102_v57 = vadd.f32 %v4382_v35, %v2101_v29 }
 0xe5b   :  { %2155 = vmax.xlane.f32.xlu2 %v2154_v31  ;;  %v2142_v32 = vsel %vm349_vm2, %v2072_v27, -inf }
 0xe5c   :  { %2143 = vmax.xlane.f32.xlu1 %v2142_v32  ;;  %v2148_v4 = vsel %vm349_vm2, %v2102_v57, -inf }
 0xe5f   :  { %v2133_v37 = vpop.f32.mrf.mxu2 }
 0xe60   :  { %v2134_v40 = vadd.f32 %v4383_v10, %v2133_v37  ;;  %v2073_v42 = vpop.f32.mrf.mxu0 }
 0xe61   :  { %v2074_v43 = vadd.f32 %v4383_v10, %v2073_v42  ;;  %v2103_v54 = vpop.f32.mrf.mxu1 }
 0xe62   :  { %v2157_v50 = vsel %vm349_vm2, %v2134_v40, -inf  ;;  %v2104_v58 = vadd.f32 %v4383_v10, %v2103_v54 }
 0xe63   :  { %2158 = vmax.xlane.f32.xlu0 %v2157_v50  ;;  %v2145_v49 = vsel %vm349_vm2, %v2074_v43, -inf }
 0xe64   :  { %2146 = vmax.xlane.f32.xlu2 %v2145_v49  ;;  %2137 = vmax.xlane.f32.xlu1 %v2136_v38  ;;  %v2151_v52 = vsel %vm349_vm2, %v2104_v58, -inf }
 0xe6b   :  { %2149 = vmax.xlane.f32.xlu0 %v2148_v4 }
 0xe6c   :  { %2152 = vmax.xlane.f32.xlu2 %v2151_v52 }
 0xe73   :  { %2140 = vmax.xlane.f32.xlu0 %v2139_v5 }
 0xece   :  { %v2156_v0 = vpop.xlane.xlu2 %2155 }
 0xecf   :  { %v2166_v1 = vsub.f32 %v2132_v41, %v2156_v0  ;;  %v2144_v2 = vpop.xlane.xlu1 %2143 }
 0xed0   :  { %v2162_v24 = vsub.f32 %v2072_v27, %v2144_v2 }
 0xed1   :  { %v2180_v33 = vmul.f32 1.442695, %v2166_v1 }
 0xed2   :  { %v2172_v59 = vmul.f32 1.442695, %v2162_v24 }
 0xed3   :  { %4306 = vpow2.f32 %v2180_v33 }
 0xed4   :  { %4308 = vpow2.f32 %v2172_v59 }
 0xed6   :  { %v2159_v6 = vpop.xlane.xlu0 %2158 }
 0xed7   :  { %v2147_v7 = vpop.xlane.xlu2 %2146  ;;  %v2167_v26 = vsub.f32 %v2134_v40, %v2159_v6  ;;  %v2138_v31 = vpop.xlane.xlu1 %2137 }
 0xed8   :  { %v2163_v34 = vsub.f32 %v2074_v43, %v2147_v7  ;;  %v2160_v32 = vsub.f32 %v5030_v36, %v2138_v31 }
 0xed9   :  { %v5042_v22 = vpop.eup %4306  ;;  %v2182_v19 = vmul.f32 1.442695, %v2167_v26 }
 0xeda   :  { %v5044_v44 = vpop.eup %4308  ;;  %v2174_v12 = vmul.f32 1.442695, %v2163_v34  ;;  %v2202_v8 = vsel %vm349_vm2, %v5042_v22, 0.0  ;;  %v2168_v37 = vmul.f32 1.442695, %v2160_v32 }
 0xedb   :  { %2203 = vadd.xlane.f32.xlu2 %v2202_v8  ;;  %v2190_v9 = vsel %vm349_vm2, %v5044_v44, 0.0 }
 0xedc   :  { %4310 = vpow2.f32 %v2174_v12  ;;  %2191 = vadd.xlane.f32.xlu0 %v2190_v9 }
 0xede   :  { %v2150_v39 = vpop.xlane.xlu0 %2149 }
 0xedf   :  { %v2164_v53 = vsub.f32 %v2102_v57, %v2150_v39  ;;  %v2153_v17 = vpop.xlane.xlu2 %2152 }
 0xee0   :  { %v2165_v20 = vsub.f32 %v2104_v58, %v2153_v17 }
 0xee1   :  { %v2176_v11 = vmul.f32 1.442695, %v2164_v53 }
 0xee2   :  { %v5050_v28 = vpop.eup %4310  ;;  %v2178_v3 = vmul.f32 1.442695, %v2165_v20 }
 0xee3   :  { %4312 = vpow2.f32 %v2176_v11  ;;  %v2193_v51 = vsel %vm349_vm2, %v5050_v28, 0.0 }
 0xee4   :  { %4314 = vpow2.f32 %v2178_v3  ;;  %2194 = vadd.xlane.f32.xlu2 %v2193_v51 }
 0xee5   :  { %4316 = vpow2.f32 %v2182_v19 }
 0xee6   :  { %v2141_v25 = vpop.xlane.xlu0 %2140  ;;  %4318 = vpow2.f32 %v2168_v37 }
 0xee7   :  { %v2161_v10 = vsub.f32 %v2044_v21, %v2141_v25 }
 0xee9   :  { %v5054_v23 = vpop.eup %4312  ;;  %v2170_v40 = vmul.f32 1.442695, %v2161_v10 }
 0xeea   :  { %v5056_v35 = vpop.eup %4314  ;;  %v2196_v41 = vsel %vm349_vm2, %v5054_v23, 0.0 }
 0xeeb   :  { %2197 = vadd.xlane.f32.xlu1 %v2196_v41  ;;  %v2199_v13 = vsel %vm349_vm2, %v5056_v35, 0.0  ;;  %v5062_v27 = vpop.eup %4316  ;;  %4320 = vpow2.f32 %v2170_v40 }
 0xeec   :  { %2200 = vadd.xlane.f32.xlu0 %v2199_v13  ;;  %v2205_v29 = vsel %vm349_vm2, %v5062_v27, 0.0  ;;  %v5073_v42 = vpop.eup %4318 }
 0xeed   :  { %v2184_v43 = vsel %vm349_vm2, %v5073_v42, 0.0 }
 0xef1   :  { %v5077_v50 = vpop.eup %4320 }
 0xef3   :  { %2206 = vadd.xlane.f32.xlu1 %v2205_v29 }
 0xefc   :  { %4077 = vrot.lane.b32.xlu2 %v5013_v18, %s4387_s17 }
 0xf00   :  { %4087 = vrot.lane.b32.xlu0 %v5013_v18, %s4388_s18 }
 0xf0c   :  { %4082 = vrot.lane.b32.xlu1 %v5013_v18, %s4386_s0  ;;  %v2187_v18 = vsel %vm349_vm2, %v5077_v50, 0.0 }
 0xf25   :  { %2185 = vadd.xlane.f32.xlu2 %v2184_v43 }
 0xf2a   :  { %2188 = vadd.xlane.f32.xlu0 %v2187_v18 }
 0xf4e   :  { %v2204_v49 = vpop.xlane.xlu2 %2203 }
 0xf4f   :  { %4322 = vrcp.f32 %v2204_v49  ;;  %v5081_v36 = vpop.xlane.xlu0 %2191  ;;  %v2307_v6 = vand.u32 2147483647, %v2204_v49  ;;  %v2309_v34 = vand.u32 2147483648, %v2204_v49  ;;  %vm2303_vm14 = vweird.f32 %v2204_v49 }
 0xf50   :  { %v2249_v53 = vand.u32 2147483648, %v5081_v36  ;;  %v2247_v19 = vand.u32 2147483647, %v5081_v36  ;;  %vm2243_vm12 = vweird.f32 %v5081_v36 }
 0xf51   :  { %vm5108_vm3 = vcmp.eq.f32.partialorder %v2307_v6, 8.507059e+37  ;;  %v2310_v29 = vor.u32 1.1754944e-38, %v2309_v34 }
 0xf52   :  { %v5121_v10 = vor.u32 1.1754944e-38, %v2249_v53 }
 0xf55   :  { %v5085_v54 = vpop.eup %4322 }
 0xf56   :  { %v2299_v57 = vmul.f32 %v5085_v54, %v2204_v49  ;;  %vm2304_vm15 = vweird.f32 %v5085_v54 }
 0xf57   :  { %v5083_v38 = vpop.xlane.xlu2 %2194  ;;  %vm5117_vm4 = vmor %vm2303_vm14, %vm2304_vm15 }
 0xf58   :  { %4324 = vrcp.f32 %v5083_v38  ;;  %v2300_v52 = vsub.f32 1.0, %v2299_v57  ;;  %vm2258_vm8 = vweird.f32 %v5083_v38 }
 0xf59   :  { %4326 = vrcp.f32 %v5081_v36 }
 0xf5a   :  { %v2301_v2 = vmul.f32 %v5085_v54, %v2300_v52 }
 0xf5c   :  { %v2302_v26 = vadd.f32 %v5085_v54, %v2301_v2 }
 0xf5e   :  { %v2198_v58 = vpop.xlane.xlu1 %2197  ;;  %v5092_v21 = vpop.eup %4324  ;;  %v2306_v18 = vsel %vm5117_vm4, %v5085_v54, %v2302_v26  ;;  %v2264_v54 = vand.u32 2147483648, %v5083_v38 }
 0xf5f   :  { %v4078_v4 = vpop.permute.xlu2 %4077  ;;  %v5090_v60 = vpop.xlane.xlu0 %2200  ;;  %4328 = vrcp.f32 %v2198_v58  ;;  %v2254_v24 = vmul.f32 %v5092_v21, %v5083_v38  ;;  %v2277_v32 = vand.u32 2147483647, %v2198_v58  ;;  %v2279_v25 = vand.u32 2147483648, %v2198_v58 }
 0xf60   :  { %v4080_v5 = vunpack.i.h.bf16 %v4078_v4  ;;  %v4079_v0 = vunpack.i.l.bf16 %v4078_v4  ;;  %4330 = vrcp.f32 %v5090_v60  ;;  %v5095_v1 = vpop.eup %4326  ;;  %vm2273_vm10 = vweird.f32 %v2198_v58 }
 0xf61   :  { %v2239_v12 = vmul.f32 %v5095_v1, %v5081_v36  ;;  %v2255_v11 = vsub.f32 1.0, %v2254_v24  ;;  %vm2244_vm7 = vweird.f32 %v5095_v1  ;;  %v2294_v49 = vand.u32 2147483648, %v5090_v60 }
 0xf62   :  { %v2015_v33 = vpack.c.bf16 %v4080_v5, %v4080_v5  ;;  %v2014_v59 = vpack.c.bf16 %v4079_v0, %v4079_v0  ;;  %v2292_v5 = vand.u32 2147483647, %v5090_v60  ;;  %vm2278_vm14 = vcmp.eq.f32.partialorder %v2277_v32, 8.507059e+37 }
 0xf63   :  { %v2240_v31 = vsub.f32 1.0, %v2239_v12  ;;  %v2256_v57 = vmul.f32 %v5092_v21, %v2255_v11  ;;  %v2280_v24 = vor.u32 1.1754944e-38, %v2279_v25  ;;  %vm2288_vm15 = vweird.f32 %v5090_v60 }
 0xf64   :  { %v2428_v8 = vunpack.c.l.b16 %v2015_v33  ;;  %v2427_v9 = vunpack.c.l.b16 %v2014_v59  ;;  %v2311_v6 = vsel %vm5108_vm3, %v2310_v29, %v2306_v18  ;;  %vm2259_vm4 = vweird.f32 %v5092_v21 }
 0xf65   :  { %v4329_v7 = vpop.eup %4328  ;;  %v2241_v2 = vmul.f32 %v5095_v1, %v2240_v31  ;;  %v2295_v12 = vor.u32 1.1754944e-38, %v2294_v49  ;;  %v2265_v37 = vor.u32 1.1754944e-38, %v2264_v54 }
 0xf66   :  { %v5102_v39 = vpop.xlane.xlu1 %2206  ;;  %v2269_v17 = vmul.f32 %v4329_v7, %v2198_v58  ;;  %v4331_v20 = vpop.eup %4330  ;;  %v2429_v3 = vpack.c.b16 %v2428_v8, %v2427_v9  ;;  %vm2274_vm5 = vweird.f32 %v4329_v7  ;;  %v2257_v8 = vadd.f32 %v5092_v21, %v2256_v57 }
 0xf67   :  { %4332 = vrcp.f32 %v5102_v39  ;;  %v2284_v13 = vmul.f32 %v4331_v20, %v5090_v60  ;;  %vm2289_vm11 = vweird.f32 %v4331_v20  ;;  %vm2275_vm13 = vmor %vm2273_vm10, %vm2274_vm5  ;;  %vm2293_vm5 = vcmp.eq.f32.partialorder %v2292_v5, 8.507059e+37 }
 0xf68   :  { %v2270_v41 = vsub.f32 1.0, %v2269_v17  ;;  %2441 = vmatpush.bf16.msra.mxu2 %v2429_v3  ;;  %vm2290_vm6 = vmor %vm2288_vm15, %vm2289_vm11  ;;  %v2322_v60 = vand.u32 2147483647, %v5102_v39  ;;  %v2324_v17 = vand.u32 2147483648, %v5102_v39  ;;  %v2242_v29 = vadd.f32 %v5095_v1, %v2241_v2 }
 0xf69   :  { %v2285_v43 = vsub.f32 1.0, %v2284_v13  ;;  %v2312_v13 = vmul.f32 %v5042_v22, %v2311_v6  ;;  %vm2318_vm3 = vweird.f32 %v5102_v39 }
 0xf6a   :  { %v2271_v40 = vmul.f32 %v4329_v7, %v2270_v41 }
 0xf6b   :  { %v2286_v52 = vmul.f32 %v4331_v20, %v2285_v43 }
 0xf6c   :  { %v2272_v4 = vadd.f32 %v4329_v7, %v2271_v40  ;;  %v2325_v40 = vor.u32 1.1754944e-38, %v2324_v17 }
 0xf6d   :  { %v4333_v0 = vpop.eup %4332  ;;  %v2287_v58 = vadd.f32 %v4331_v20, %v2286_v52  ;;  %v2334_v52 = vpack.c.bf16 %v2312_v13, %v2312_v13 }
 0xf6e   :  { %v2276_v33 = vsel %vm2275_vm13, %v4329_v7, %v2272_v4  ;;  %v2314_v59 = vmul.f32 %v4333_v0, %v5102_v39  ;;  %vm2319_vm10 = vweird.f32 %v4333_v0  ;;  %vm2323_vm13 = vcmp.eq.f32.partialorder %v2322_v60, 8.507059e+37 }
 0xf6f   :  { %v2281_v34 = vsel %vm2278_vm14, %v2280_v24, %v2276_v33  ;;  %v2291_v9 = vsel %vm2290_vm6, %v4331_v20, %v2287_v58  ;;  %v2262_v20 = vand.u32 2147483647, %v5083_v38  ;;  %vm5153_vm6 = vmor %vm2258_vm8, %vm2259_vm4 }
 0xf70   :  { %v2315_v53 = vsub.f32 1.0, %v2314_v59  ;;  %v2296_v7 = vsel %vm2293_vm5, %v2295_v12, %v2291_v9  ;;  %v2282_v11 = vmul.f32 %v5054_v23, %v2281_v34  ;;  %v2261_v22 = vsel %vm5153_vm6, %v5092_v21, %v2257_v8  ;;  %vm2320_vm11 = vmor %vm2318_vm3, %vm2319_vm10 }
 0xf71   :  { %v2297_v3 = vmul.f32 %v5056_v35, %v2296_v7  ;;  %vm5166_vm8 = vmor %vm2243_vm12, %vm2244_vm7  ;;  %vm2263_vm14 = vcmp.eq.f32.partialorder %v2262_v20, 8.507059e+37  ;;  %vm2248_vm7 = vcmp.eq.f32.partialorder %v2247_v19, 8.507059e+37 }
 0xf72   :  { %v4088_v26 = vpop.permute.xlu0 %4087  ;;  %v2316_v51 = vmul.f32 %v4333_v0, %v2315_v53  ;;  %v2332_v18 = vpack.c.bf16 %v2282_v11, %v2282_v11  ;;  %v2246_v21 = vsel %vm5166_vm8, %v5095_v1, %v2242_v29  ;;  %v2266_v5 = vsel %vm2263_vm14, %v2265_v37, %v2261_v22 }
 0xf73   :  { %v4090_v41 = vunpack.i.h.bf16 %v4088_v26  ;;  %v4089_v31 = vunpack.i.l.bf16 %v4088_v26  ;;  %v2333_v23 = vpack.c.bf16 %v2297_v3, %v2297_v3  ;;  %v2267_v59 = vmul.f32 %v5050_v28, %v2266_v5 }
 0xf74   :  { %v2317_v25 = vadd.f32 %v4333_v0, %v2316_v51  ;;  %v2394_v33 = vunpack.c.l.b16 %v2332_v18  ;;  %v2422_v1 = vunpack.c.l.b16 %v2334_v52 }
 0xf75   :  { %v2013_v35 = vpack.c.bf16 %v4090_v41, %v4090_v41  ;;  %v2012_v43 = vpack.c.bf16 %v4089_v31, %v4089_v31  ;;  %v2395_v2 = vunpack.c.l.b16 %v2333_v23  ;;  %v2331_v36 = vpack.c.bf16 %v2267_v59, %v2267_v59 }
 0xf76   :  { %v2321_v39 = vsel %vm2320_vm11, %v4333_v0, %v2317_v25  ;;  %v2251_v0 = vsel %vm2248_vm7, %v5121_v10, %v2246_v21 }
 0xf77   :  { %v2400_v57 = vunpack.c.l.b16 %v2013_v35  ;;  %v2326_v49 = vsel %vm2323_vm13, %v2325_v40, %v2321_v39  ;;  %v2399_v4 = vunpack.c.l.b16 %v2012_v43  ;;  %v2396_v34 = vpack.c.b16 %v2395_v2, %v2394_v33 }
 0xf78   :  { %v2327_v54 = vmul.f32 %v5062_v27, %v2326_v49  ;;  %v2252_v12 = vmul.f32 %v5044_v44, %v2251_v0  ;;  %v2367_v17 = vunpack.c.l.b16 %v2331_v36 }
 0xf79   :  { %v2401_v24 = vpack.c.b16 %v2400_v57, %v2399_v4 }
 0xf7a   :  { %v2335_v58 = vpack.c.bf16 %v2327_v54, %v2327_v54  ;;  %v2330_v10 = vpack.c.bf16 %v2252_v12, %v2252_v12 }
 0xf7b   :  { %2413 = vmatpush.bf16.msra.mxu1 %v2401_v24 }
 0xf7c   :  { %v2423_v6 = vunpack.c.l.b16 %v2335_v58  ;;  %v2366_v11 = vunpack.c.l.b16 %v2330_v10 }
 0xf7e   :  { %v4083_v8 = vpop.permute.xlu1 %4082  ;;  %3757 = vmatmul.msk.bf16.vlgmr.msra.gmra.mxu1 %vm349_vm2, %v2396_v34  ;;  %v2424_v27 = vpack.c.b16 %v2423_v6, %v2422_v1  ;;  %v2368_v3 = vpack.c.b16 %v2367_v17, %v2366_v11 }
 0xf7f   :  { %v4085_v9 = vunpack.i.h.bf16 %v4083_v8  ;;  %v4084_v53 = vunpack.i.l.bf16 %v4083_v8 }
 0xf80   :  { %3758 = vmatmul.msk.bf16.vlgmr.msra.gmra.mxu2 %vm349_vm2, %v2424_v27 }
 0xf81   :  { %v2011_v19 = vpack.c.bf16 %v4085_v9, %v4085_v9  ;;  %v2010_v7 = vpack.c.bf16 %v4084_v53, %v4084_v53  ;;  %v3870_v53 = vld [vmem:[%s5572_s4 + $0xe0] sm:$0xff] }
 0xf83   :  { %v2372_v60 = vunpack.c.l.b16 %v2011_v19  ;;  %v2371_v28 = vunpack.c.l.b16 %v2010_v7 }
 0xf85   :  { %v2373_v26 = vpack.c.b16 %v2372_v60, %v2371_v28 }
 0xf87   :  { %2385 = vmatpush.bf16.msrb.mxu0 %v2373_v26 }
 0xf8a   :  { %3756 = vmatmul.msk.bf16.vlgmr.msrb.gmra.mxu0 %vm349_vm2, %v2368_v3 }
 0xf98   :  { %v2186_v44 = vpop.xlane.xlu2 %2185 }
 0xf99   :  { %4334 = vrcp.f32 %v2186_v44  ;;  %v2219_v20 = vand.u32 2147483648, %v2186_v44  ;;  %v2217_v23 = vand.u32 2147483647, %v2186_v44  ;;  %vm2213_vm15 = vweird.f32 %v2186_v44 }
 0xf9b   :  { %v2220_v22 = vor.u32 1.1754944e-38, %v2219_v20  ;;  %vm2218_vm5 = vcmp.eq.f32.partialorder %v2217_v23, 8.507059e+37 }
 0xf9d   :  { %v2189_v51 = vpop.xlane.xlu0 %2188 }
 0xf9e   :  { %4336 = vrcp.f32 %v2189_v51  ;;  %v2234_v43 = vand.u32 2147483648, %v2189_v51  ;;  %v2232_v39 = vand.u32 2147483647, %v2189_v51  ;;  %vm2228_vm6 = vweird.f32 %v2189_v51 }
 0xf9f   :  { %v4335_v41 = vpop.eup %4334 }
 0xfa0   :  { %v2209_v13 = vmul.f32 %v4335_v41, %v2186_v44  ;;  %vm2214_vm12 = vweird.f32 %v4335_v41  ;;  %v2235_v49 = vor.u32 1.1754944e-38, %v2234_v43  ;;  %vm2233_vm11 = vcmp.eq.f32.partialorder %v2232_v39, 8.507059e+37  ;;  %v3874_v39 = vld [vmem:[%s5572_s4 + $0x100] sm:$0xff] }
 0xfa1   :  { %vm2215_vm4 = vmor %vm2213_vm15, %vm2214_vm12 }
 0xfa2   :  { %v2210_v29 = vsub.f32 1.0, %v2209_v13 }
 0xfa4   :  { %v4337_v31 = vpop.eup %4336  ;;  %v2211_v32 = vmul.f32 %v4335_v41, %v2210_v29 }
 0xfa5   :  { %v2224_v25 = vmul.f32 %v4337_v31, %v2189_v51  ;;  %vm2229_vm10 = vweird.f32 %v4337_v31 }
 0xfa6   :  { %v2212_v35 = vadd.f32 %v4335_v41, %v2211_v32  ;;  %vm2230_vm3 = vmor %vm2228_vm6, %vm2229_vm10  ;;  %v4215_v32 = vld [vmem:[%s5574_s5 + $0x13] ss:$0 sm:$0xff] }
 0xfa7   :  { %v2225_v37 = vsub.f32 1.0, %v2224_v25 }
 0xfa8   :  { %v2216_v40 = vsel %vm2215_vm4, %v4335_v41, %v2212_v35 }
 0xfa9   :  { %v2221_v38 = vsel %vm2218_vm5, %v2220_v22, %v2216_v40  ;;  %v2226_v18 = vmul.f32 %v4337_v31, %v2225_v37 }
 0xfaa   :  { %v2222_v57 = vmul.f32 %v5073_v42, %v2221_v38 }
 0xfab   :  { %v2227_v21 = vadd.f32 %v4337_v31, %v2226_v18  ;;  %v3875_v18 = vld [vmem:[%s5572_s4 + $0x108] sm:$0xff] }
 0xfac   :  { %v2328_v5 = vpack.c.bf16 %v2222_v57, %v2222_v57  ;;  %2623 = vmatpush.bf16.msrb.mxu1 %v3875_v18 }
 0xfad   :  { %v2231_v4 = vsel %vm2230_vm3, %v4337_v31, %v2227_v21 }
 0xfae   :  { %v2236_v52 = vsel %vm2233_vm11, %v2235_v49, %v2231_v4  ;;  %v2338_v24 = vunpack.c.l.b16 %v2328_v5 }
 0xfaf   :  { %v2237_v2 = vmul.f32 %v5077_v50, %v2236_v52  ;;  %v3871_v50 = vld [vmem:[%s5572_s4 + $0xe8] sm:$0xff] }
 0xfb0   :  { %2501 = vmatpush.bf16.msrb.mxu3 %v3871_v50  ;;  %2624 = vmatpush.bf16.msrb.mxu1 %v3874_v39 }
 0xfb1   :  { %v2329_v54 = vpack.c.bf16 %v2237_v2, %v2237_v2 }
 0xfb3   :  { %v2339_v0 = vunpack.c.l.b16 %v2329_v54  ;;  %3785 = vmatmul.msk.bf16.vlgmr.msrb.gmra.mxu1 %vm57_vm0, %v4656_v45 }
 0xfb4   :  { %2502 = vmatpush.bf16.msrb.mxu3 %v3870_v53 }
 0xfb5   :  { %v2340_v33 = vpack.c.b16 %v2339_v0, %v2338_v24 }
 0xfb7   :  { %3755 = vmatmul.msk.bf16.vlgmr.msra.gmra.mxu3 %vm349_vm2, %v2340_v33 }
 0xfc3   :  { %3786 = vmatmul.msk.bf16.gmra.mxu1 %vm57_vm0, %v4669_v55 }
 0xffb   :  { %v2415_v59 = vpop.f32.mrf.mxu1 }
0x1003   :  { %v2443_v6 = vpop.f32.mrf.mxu2  ;;  %v2417_v34 = vpop.f32.mrf.mxu1 }
0x1004   :  { %v4096_v12 = vpack.i.bf16 %v2417_v34, %v2415_v59  ;;  %v3872_v59 = vld [vmem:[%s5572_s4 + $0xf0] sm:$0xff] }
0x1007   :  { %v2387_v58 = vpop.f32.mrf.mxu0 }
0x100b   :  { %v2445_v8 = vpop.f32.mrf.mxu2 }
0x100c   :  { %v4101_v9 = vpack.i.bf16 %v2445_v8, %v2443_v6 }
0x100f   :  { %v2389_v1 = vpop.f32.mrf.mxu0 }
0x1010   :  { %v4091_v42 = vpack.i.bf16 %v2389_v1, %v2387_v58  ;;  %v3873_v58 = vld [vmem:[%s5572_s4 + $0xf8] sm:$0xff] }
0x1011   :  { %2591 = vmatpush.bf16.msra.mxu0 %v3873_v58 }
0x1012   :  { %4092 = vrot.lane.b32.xlu1 %v4091_v42, %s4389_s29 }
0x1015   :  { %2592 = vmatpush.bf16.msra.mxu0 %v3872_v59 }
0x101a   :  { %4097 = vrot.lane.b32.xlu1 %v4096_v12, %s4390_s30 }
0x1022   :  { %4102 = vrot.lane.b32.xlu1 %v4101_v9, %s4391_s8  ;;  %v4218_v9 = vld [vmem:[%s5574_s5 + $0x15] ss:$0 sm:$0xff] }
0x1030   :  { %v2626_v1 = vpop.f32.mrf.mxu1 }
0x1031   :  { %v2627_v53 = vadd.f32 %v4218_v9, %v2626_v1 }
0x103a   :  { %v2359_v36 = vpop.f32.mrf.mxu3 }
0x1042   :  { %v2361_v17 = vpop.f32.mrf.mxu3 }
0x1084   :  { %v4093_v27 = vpop.permute.xlu1 %4092 }
0x1085   :  { %v4095_v7 = vunpack.i.h.bf16 %v4093_v27  ;;  %v4094_v10 = vunpack.i.l.bf16 %v4093_v27  ;;  %v2628_v27 = vpop.f32.mrf.mxu1 }
0x1087   :  { %v2473_v11 = vsel %vm238_vm1, %v2361_v17, %v4095_v7  ;;  %v2472_v3 = vsel %vm238_vm1, %v2359_v36, %v4094_v10 }
0x108c   :  { %v4098_v19 = vpop.permute.xlu1 %4097 }
0x108d   :  { %v4100_v60 = vunpack.i.h.bf16 %v4098_v19  ;;  %v4099_v28 = vunpack.i.l.bf16 %v4098_v19  ;;  %v2629_v19 = vadd.f32 %v4218_v9, %v2628_v27 }
0x108f   :  { %v2474_v41 = vsel %vm349_vm2, %v2472_v3, %v4099_v28  ;;  %v2475_v13 = vsel %vm349_vm2, %v2473_v11, %v4100_v60  ;;  %v4116_v10 = vpack.i.bf16 %v2629_v19, %v2627_v53  ;;  %v2631_v11 = vpop.f32.mrf.mxu1 }
0x1094   :  { %v4103_v26 = vpop.permute.xlu1 %4102 }
0x1095   :  { %v4105_v44 = vunpack.i.h.bf16 %v4103_v26  ;;  %v4104_v51 = vunpack.i.l.bf16 %v4103_v26 }
0x1097   :  { %v2476_v29 = vsel %vm690_vm9, %v2474_v41, %v4104_v51  ;;  %v2477_v20 = vsel %vm690_vm9, %v2475_v13, %v4105_v44  ;;  %v4216_v41 = vld [vmem:[%s5574_s5 + $0x1a] ss:$0 sm:$0xff] }
0x1098   :  { %v2478_v31 = vpack.c.bf16 %v2477_v20, %v2476_v29  ;;  %v2632_v20 = vadd.f32 %v4218_v9, %v2631_v11 }
0x109a   :  { %3767 = vmatmul.msk.bf16.vlgmr.msrb.gmra.mxu3 %vm57_vm0, %v2478_v31 }
0x111d   :  { %v2504_v23 = vpop.f32.mrf.mxu3 }
0x111e   :  { %v2505_v25 = vadd.f32 %v4215_v32, %v2504_v23  ;;  %v4217_v23 = vld [vmem:[%s5574_s5 + $0x1b] ss:$0 sm:$0xff] }
0x1120   :  { %v2509_v35 = vadd.f32 %v2505_v25, %v4991_v16 }
0x1122   :  { %v2513_v22 = vsel %vm57_vm0, %v2509_v35, 0.0 }
0x1123   :  { %2514 = vadd.xlane.f32.xlu1 %v2513_v22  ;;  %v2633_v22 = vpop.f32.mrf.mxu1 }
0x1125   :  { %v2506_v37 = vpop.f32.mrf.mxu3 }
0x1126   :  { %v2507_v40 = vadd.f32 %v4215_v32, %v2506_v37  ;;  %v2748_v32 = vpack.c.bf16 %v2632_v20, %v2632_v20  ;;  %v2634_v37 = vadd.f32 %v4218_v9, %v2633_v22 }
0x1128   :  { %v2510_v43 = vadd.f32 %v2507_v40, %v4993_v46  ;;  %v4106_v18 = vpack.i.bf16 %v2634_v37, %v2632_v20  ;;  %v2749_v39 = vpack.c.bf16 %v2634_v37, %v2634_v37  ;;  %v4219_v37 = vld [vmem:[%s5574_s5 + $0x14] ss:$0 sm:$0xff] }
0x112a   :  { %v2516_v38 = vsel %vm57_vm0, %v2510_v43, 0.0 }
0x112b   :  { %2517 = vadd.xlane.f32.xlu2 %v2516_v38  ;;  %v2747_v38 = vpack.c.bf16 %v2629_v19, %v2629_v19 }
0x113c   :  { %4117 = vrot.lane.b32.xlu1 %v4116_v10, %s4386_s0 }
0x1196   :  { %v2515_v16 = vpop.xlane.xlu1 %2514 }
0x1197   :  { %v2519_v57 = vmul.f32 %v2515_v16, %v4660_v48  ;;  %v2829_v16 = vunpack.c.l.b16 %v2748_v32 }
0x1199   :  { %v2521_v46 = vsub.f32 %v2509_v35, %v2519_v57 }
0x119b   :  { %v2523_v21 = vmul.f32 %v2521_v46, %v2521_v46 }
0x119d   :  { %v2525_v49 = vsel %vm57_vm0, %v2523_v21, 0.0  ;;  %v2830_v21 = vunpack.c.l.b16 %v2749_v39 }
0x119e   :  { %v2518_v4 = vpop.xlane.xlu2 %2517  ;;  %2526 = vadd.xlane.f32.xlu0 %v2525_v49 }
0x119f   :  { %v2520_v52 = vmul.f32 %v2518_v4, %v4660_v48  ;;  %v2832_v4 = vpack.c.b16 %v2830_v21, %v2829_v16 }
0x11a1   :  { %v2522_v5 = vsub.f32 %v2510_v43, %v2520_v52  ;;  %v2746_v43 = vpack.c.bf16 %v2627_v53, %v2627_v53 }
0x11a3   :  { %v2524_v2 = vmul.f32 %v2522_v5, %v2522_v5  ;;  %v2827_v52 = vunpack.c.l.b16 %v2746_v43 }
0x11a5   :  { %v2528_v54 = vsel %vm57_vm0, %v2524_v2, 0.0  ;;  %v2840_v2 = vsel %vm238_vm1, %v2832_v4, 0 }
0x11a6   :  { %2529 = vadd.xlane.f32.xlu2 %v2528_v54  ;;  %2848 = vmatpush.bf16.xpose.msra.mxu3 %v2840_v2 }
0x11b2   :  { %4107 = vrot.lane.b32.xlu0 %v4106_v18, %s4386_s0 }
0x11ba   :  { %4122 = vrot.lane.b32.xlu0 %v4116_v10, %s4388_s18 }
0x11be   :  { %4112 = vrot.lane.b32.xlu2 %v4106_v18, %s4388_s18 }
0x11c6   :  { %4127 = vrot.lane.b32.xlu2 %v4106_v18, %s4387_s17 }
0x11ce   :  { %4142 = vrot.lane.b32.xlu2 %v4116_v10, %s4387_s17 }
0x1211   :  { %v2527_v24 = vpop.xlane.xlu0 %2526 }
0x1212   :  { %v2531_v0 = vmul.f32 %v2527_v24, %v4660_v48 }
0x1214   :  { %v2533_v33 = vadd.f32 1e-05, %v2531_v0 }
0x1216   :  { %4338 = vrsqrt.f32 %v2533_v33  ;;  %vm2541_vm13 = vweird.f32 %v2533_v33 }
0x1219   :  { %v2530_v42 = vpop.xlane.xlu2 %2529 }
0x121a   :  { %v2532_v6 = vmul.f32 %v2530_v42, %v4660_v48 }
0x121c   :  { %v4339_v34 = vpop.eup %4338  ;;  %v2534_v12 = vadd.f32 1e-05, %v2532_v6  ;;  %v4118_v6 = vpop.permute.xlu1 %4117 }
0x121d   :  { %v2536_v8 = vmul.f32 %v4339_v34, %v2533_v33  ;;  %vm2542_vm8 = vweird.f32 %v4339_v34 }
0x121e   :  { %4340 = vrsqrt.f32 %v2534_v12  ;;  %vm2543_vm14 = vmor %vm2541_vm13, %vm2542_vm8  ;;  %vm2551_vm12 = vweird.f32 %v2534_v12 }
0x121f   :  { %v2537_v50 = vmul.f32 %v4339_v34, %v2536_v8 }
0x1221   :  { %v2538_v36 = vmul.f32 0.5, %v2537_v50  ;;  %v4113_v33 = vpop.permute.xlu2 %4112 }
0x1222   :  { %v4115_v1 = vunpack.i.h.bf16 %v4113_v33  ;;  %v4114_v42 = vunpack.i.l.bf16 %v4113_v33 }
0x1223   :  { %v2539_v7 = vsub.f32 1.5, %v2538_v36 }
0x1224   :  { %v4341_v60 = vpop.eup %4340  ;;  %v4108_v0 = vpop.permute.xlu0 %4107  ;;  %v2757_v50 = vpack.c.bf16 %v4115_v1, %v4115_v1  ;;  %v2756_v53 = vpack.c.bf16 %v4114_v42, %v4114_v42 }
0x1225   :  { %v2540_v28 = vmul.f32 %v4339_v34, %v2539_v7  ;;  %v2546_v17 = vmul.f32 %v4341_v60, %v2534_v12  ;;  %vm2552_vm7 = vweird.f32 %v4341_v60  ;;  %v4110_v58 = vunpack.i.h.bf16 %v4108_v0 }
0x1226   :  { %vm2553_vm15 = vmor %vm2551_vm12, %vm2552_vm7  ;;  %v4109_v59 = vunpack.i.l.bf16 %v4108_v0  ;;  %v4119_v12 = vunpack.i.l.bf16 %v4118_v6 }
0x1227   :  { %v2547_v26 = vmul.f32 %v4341_v60, %v2546_v17  ;;  %v2544_v3 = vsel %vm2543_vm14, %v4339_v34, %v2540_v28  ;;  %v4120_v34 = vunpack.i.h.bf16 %v4118_v6  ;;  %v2753_v8 = vpack.c.bf16 %v4110_v58, %v4110_v58 }
0x1228   :  { %v2555_v13 = vmul.f32 %v2544_v3, %v2521_v46  ;;  %v2752_v9 = vpack.c.bf16 %v4109_v59, %v4109_v59  ;;  %v2750_v36 = vpack.c.bf16 %v4119_v12, %v4119_v12  ;;  %v2905_v28 = vunpack.c.l.b16 %v2756_v53 }
0x1229   :  { %v2548_v44 = vmul.f32 0.5, %v2547_v26  ;;  %v2751_v27 = vpack.c.bf16 %v4120_v34, %v4120_v34  ;;  %v2868_v19 = vunpack.c.l.b16 %v2753_v8  ;;  %v4128_v3 = vpop.permute.xlu2 %4127 }
0x122a   :  { %v2558_v25 = vmul.f32 %v4216_v41, %v2555_v13  ;;  %v2867_v7 = vunpack.c.l.b16 %v2752_v9  ;;  %v2865_v11 = vunpack.c.l.b16 %v2750_v36  ;;  %v3877_v36 = vld [vmem:[%s5572_s4 + $0x118] sm:$0xff] }
0x122b   :  { %v2549_v51 = vsub.f32 1.5, %v2548_v44  ;;  %v2866_v26 = vunpack.c.l.b16 %v2751_v27  ;;  %2660 = vmatpush.bf16.msrb.mxu2 %v3877_v36 }
0x122c   :  { %v5240_v57 = vadd.f32 %v4217_v23, %v2558_v25  ;;  %v2870_v10 = vpack.c.b16 %v2868_v19, %v2867_v7  ;;  %v4123_v44 = vpop.permute.xlu0 %4122  ;;  %v3876_v19 = vld [vmem:[%s5572_s4 + $0x110] sm:$0xff] }
0x122d   :  { %v2550_v29 = vmul.f32 %v4341_v60, %v2549_v51  ;;  %v4130_v51 = vunpack.i.h.bf16 %v4128_v3  ;;  %v4124_v20 = vunpack.i.l.bf16 %v4123_v44 }
0x122e   :  { %v2878_v13 = vsel %vm238_vm1, %v2870_v10, 0 }
0x122f   :  { %v2554_v31 = vsel %vm2553_vm15, %v4341_v60, %v2550_v29  ;;  %v2906_v60 = vunpack.c.l.b16 %v2757_v50  ;;  %v4125_v29 = vunpack.i.h.bf16 %v4123_v44  ;;  %2886 = vmatpush.bf16.xpose.msrb.mxu0 %v2878_v13  ;;  %2661 = vmatpush.bf16.msrb.mxu2 %v3876_v19 }
0x1230   :  { %v2556_v35 = vmul.f32 %v2554_v31, %v2522_v5  ;;  %v2828_v5 = vunpack.c.l.b16 %v2747_v38 }
0x1231   :  { %v2908_v17 = vpack.c.b16 %v2906_v60, %v2905_v28  ;;  %v2755_v22 = vpack.c.bf16 %v4125_v29, %v4125_v29  ;;  %v4143_v4 = vpop.permute.xlu2 %4142 }
0x1232   :  { %v2559_v40 = vmul.f32 %v4216_v41, %v2556_v35  ;;  %v2831_v54 = vpack.c.b16 %v2828_v5, %v2827_v52  ;;  %v4129_v41 = vunpack.i.l.bf16 %v4128_v3  ;;  %v2869_v35 = vpack.c.b16 %v2866_v26, %v2865_v11  ;;  %3795 = vmatmul.msk.bf16.vlgmr.msrb.gmra.mxu2 %vm57_vm0, %v4656_v45 }
0x1233   :  { %v2916_v31 = vsel %vm238_vm1, %v2908_v17, 0  ;;  %v2904_v18 = vunpack.c.l.b16 %v2755_v22  ;;  %v4145_v5 = vunpack.i.h.bf16 %v4143_v4  ;;  %v4144_v2 = vunpack.i.l.bf16 %v4143_v4 }
0x1234   :  { %v5242_v46 = vadd.f32 %v4217_v23, %v2559_v40  ;;  %v2837_v24 = vsel %vm238_vm1, %v2831_v54, 0  ;;  %v2761_v23 = vpack.c.bf16 %v4130_v51, %v4130_v51  ;;  %v2760_v25 = vpack.c.bf16 %v4129_v41, %v4129_v41 }
0x1235   :  { %2849 = vmatpush.bf16.xpose.msra.mxu3 %v2837_v24  ;;  %v2754_v40 = vpack.c.bf16 %v4124_v20, %v4124_v20  ;;  %v2875_v21 = vsel %vm238_vm1, %v2869_v35, 0  ;;  %v2759_v33 = vpack.c.bf16 %v4145_v5, %v4145_v5  ;;  %v2758_v58 = vpack.c.bf16 %v4144_v2, %v4144_v2 }
0x1236   :  { %v2563_v49 = vpack.c.bf16 %v5242_v46, %v5240_v57  ;;  %v2944_v43 = vunpack.c.l.b16 %v2761_v23  ;;  %v2943_v38 = vunpack.c.l.b16 %v2760_v25 }
0x1237   :  { %v2903_v39 = vunpack.c.l.b16 %v2754_v40  ;;  %2887 = vmatpush.bf16.xpose.msrb.mxu0 %v2875_v21  ;;  %v2942_v42 = vunpack.c.l.b16 %v2759_v33  ;;  %v2941_v6 = vunpack.c.l.b16 %v2758_v58 }
0x1238   :  { %3776 = vmatmul.msk.bf16.vlgmr.msra.gmra.mxu0 %vm57_vm0, %v2563_v49  ;;  %v2946_v16 = vpack.c.b16 %v2944_v43, %v2943_v38  ;;  %v4384_v38 = vld [vmem:[%s5577_s3] sm:$0xff] }
0x1239   :  { %v2907_v52 = vpack.c.b16 %v2904_v18, %v2903_v39  ;;  %v2945_v8 = vpack.c.b16 %v2942_v42, %v2941_v6 }
0x123a   :  { %v2954_v54 = vsel %vm238_vm1, %v2946_v16, 0 }
0x123b   :  { %v2913_v24 = vsel %vm238_vm1, %v2907_v52, 0  ;;  %v2951_v53 = vsel %vm238_vm1, %v2945_v8, 0 }
0x123d   :  { %2924 = vmatpush.bf16.xpose.msrb.mxu3 %v2916_v31 }
0x123f   :  { %2962 = vmatpush.bf16.xpose.msra.mxu0 %v2954_v54 }
0x1242   :  { %3796 = vmatmul.msk.bf16.gmra.mxu2 %vm57_vm0, %v4669_v55  ;;  %v4385_v55 = vld [vmem:[%s5577_s3 + $0x8] sm:$0xff] }
0x1245   :  { %2925 = vmatpush.bf16.xpose.msrb.mxu3 %v2913_v24 }
0x1247   :  { %2963 = vmatpush.bf16.xpose.msra.mxu0 %v2951_v53 }
0x12b5   :  { %v2594_v32 = vpop.f32.mrf.mxu0  ;;  %v2663_v52 = vpop.f32.mrf.mxu2 }
0x12b6   :  { %v2595_v49 = vadd.f32 %v4219_v37, %v2594_v32 }
0x12b8   :  { %v2698_v59 = vpack.c.bf16 %v2595_v49, %v2595_v49 }
0x12ba   :  { %v2820_v9 = vunpack.c.l.b16 %v2698_v59 }
0x12bd   :  { %v2596_v0 = vpop.f32.mrf.mxu0  ;;  %v2665_v24 = vpop.f32.mrf.mxu2 }
0x12be   :  { %v2597_v1 = vadd.f32 %v4219_v37, %v2596_v0 }
0x12c0   :  { %v2699_v34 = vpack.c.bf16 %v2597_v1, %v2597_v1  ;;  %v4146_v12 = vpack.i.bf16 %v2597_v1, %v2595_v49  ;;  %v4220_v1 = vld [vmem:[%s5574_s5 + $0x16] ss:$0 sm:$0xff] }
0x12c2   :  { %v2821_v50 = vunpack.c.l.b16 %v2699_v34  ;;  %4147 = vrot.lane.b32.xlu1 %v4146_v12, %s4387_s17  ;;  %4132 = vrot.lane.b32.xlu0 %v4146_v12, %s4386_s0 }
0x12c4   :  { %v2822_v27 = vpack.c.b16 %v2821_v50, %v2820_v9  ;;  %v2666_v50 = vadd.f32 %v4220_v1, %v2665_v24 }
0x12c5   :  { %v2668_v59 = vpop.f32.mrf.mxu2 }
0x12c6   :  { %3797 = vmatmul.msk.bf16.vlgmr.msra.gmra.mxu3 %vm238_vm1, %v2822_v27  ;;  %v2669_v53 = vadd.f32 %v4220_v1, %v2668_v59 }
0x12c8   :  { %v2804_v36 = vpack.c.bf16 %v2669_v53, %v2669_v53 }
0x12ca   :  { %4137 = vrot.lane.b32.xlu0 %v4146_v12, %s4388_s18  ;;  %v2664_v12 = vadd.f32 %v4220_v1, %v2663_v52 }
0x12cd   :  { %v2670_v19 = vpop.f32.mrf.mxu2 }
0x1334   :  { %v4133_v7 = vpop.permute.xlu0 %4132  ;;  %v4148_v44 = vpop.permute.xlu1 %4147 }
0x1335   :  { %v4135_v60 = vunpack.i.h.bf16 %v4133_v7  ;;  %v4134_v28 = vunpack.i.l.bf16 %v4133_v7  ;;  %v4150_v29 = vunpack.i.h.bf16 %v4148_v44  ;;  %v4149_v20 = vunpack.i.l.bf16 %v4148_v44 }
0x1336   :  { %v2671_v7 = vadd.f32 %v4220_v1, %v2670_v19 }
0x1337   :  { %v2701_v10 = vpack.c.bf16 %v4135_v60, %v4135_v60  ;;  %v2700_v17 = vpack.c.bf16 %v4134_v28, %v4134_v28  ;;  %v2705_v25 = vpack.c.bf16 %v4150_v29, %v4150_v29  ;;  %v2704_v35 = vpack.c.bf16 %v4149_v20, %v4149_v20 }
0x1338   :  { %v2802_v60 = vpack.c.bf16 %v2664_v12, %v2664_v12  ;;  %v2803_v28 = vpack.c.bf16 %v2666_v50, %v2666_v50 }
0x1339   :  { %v2859_v26 = vunpack.c.l.b16 %v2701_v10  ;;  %v2858_v11 = vunpack.c.l.b16 %v2700_v17  ;;  %v2935_v37 = vunpack.c.l.b16 %v2705_v25  ;;  %v2934_v40 = vunpack.c.l.b16 %v2704_v35 }
0x133a   :  { %v3179_v44 = vunpack.c.l.b16 %v2802_v60  ;;  %v3180_v29 = vunpack.c.l.b16 %v2803_v28 }
0x133b   :  { %v2860_v3 = vpack.c.b16 %v2859_v26, %v2858_v11  ;;  %v2936_v39 = vpack.c.b16 %v2935_v37, %v2934_v40  ;;  %v3181_v26 = vunpack.c.l.b16 %v2804_v36  ;;  %v2805_v11 = vpack.c.bf16 %v2671_v7, %v2671_v7 }
0x133c   :  { %v4138_v51 = vpop.permute.xlu0 %4137 }
0x133d   :  { %v4140_v41 = vunpack.i.h.bf16 %v4138_v51  ;;  %v4139_v13 = vunpack.i.l.bf16 %v4138_v51  ;;  %3798 = vmatmul.msk.bf16.vlgmr.msrb.gmra.mxu0 %vm238_vm1, %v2860_v3 }
0x133f   :  { %v2703_v31 = vpack.c.bf16 %v4140_v41, %v4140_v41  ;;  %v2702_v32 = vpack.c.bf16 %v4139_v13, %v4139_v13  ;;  %v3182_v13 = vunpack.c.l.b16 %v2805_v11 }
0x1341   :  { %v2897_v23 = vunpack.c.l.b16 %v2703_v31  ;;  %v2896_v45 = vunpack.c.l.b16 %v2702_v32  ;;  %v3184_v31 = vpack.c.b16 %v3182_v13, %v3181_v26  ;;  %v3183_v32 = vpack.c.b16 %v3180_v29, %v3179_v44 }
0x1343   :  { %v2898_v22 = vpack.c.b16 %v2897_v23, %v2896_v45  ;;  %3196 = vmatpush.bf16.msra.mxu1 %v3184_v31  ;;  %v5303_v23 = vpack.i.bf16 %v2666_v50, %v2664_v12  ;;  %v5305_v45 = vpack.i.bf16 %v2671_v7, %v2669_v53 }
0x1345   :  { %3799 = vmatmul.msk.bf16.vlgmr.msrb.gmra.mxu3 %vm238_vm1, %v2898_v22 }
0x1347   :  { %3197 = vmatpush.bf16.msra.mxu1 %v3183_v32 }
0x1349   :  { %v2851_v43 = vpop.f32.mrf.mxu3 }
0x134a   :  { %v5282_v18 = vadd.f32 %v4384_v38, %v2851_v43 }
0x134c   :  { %v2970_v16 = vsel %vm57_vm0, %v5282_v18, -inf }
0x134d   :  { %2971 = vmax.xlane.f32.xlu0 %v2970_v16  ;;  %3800 = vmatmul.msk.bf16.vlgmr.msra.gmra.mxu0 %vm238_vm1, %v2936_v39 }
0x1351   :  { %v2853_v21 = vpop.f32.mrf.mxu3 }
0x1352   :  { %v5290_v49 = vadd.f32 %v4385_v55, %v2853_v21 }
0x1354   :  { %v2973_v4 = vsel %vm57_vm0, %v5290_v49, -inf }
0x1355   :  { %2974 = vmax.xlane.f32.xlu2 %v2973_v4 }
0x13ba   :  { %v2889_v5 = vpop.f32.mrf.mxu0 }
0x13bb   :  { %v2890_v2 = vadd.f32 %v4384_v38, %v2889_v5 }
0x13bd   :  { %v2976_v54 = vsel %vm57_vm0, %v2890_v2, -inf }
0x13be   :  { %2977 = vmax.xlane.f32.xlu0 %v2976_v54 }
0x13c0   :  { %v5313_v25 = vpop.xlane.xlu0 %2971 }
0x13c2   :  { %v2891_v0 = vpop.f32.mrf.mxu0 }
0x13c3   :  { %v2892_v33 = vadd.f32 %v4385_v55, %v2891_v0 }
0x13c5   :  { %v2979_v58 = vsel %vm57_vm0, %v2892_v33, -inf }
0x13c6   :  { %2980 = vmax.xlane.f32.xlu2 %v2979_v58 }
0x13c8   :  { %v2927_v42 = vpop.f32.mrf.mxu3  ;;  %v5315_v35 = vpop.xlane.xlu2 %2974 }
0x13c9   :  { %v2928_v6 = vadd.f32 %v4384_v38, %v2927_v42 }
0x13ca   :  { %v2965_v34 = vpop.f32.mrf.mxu0 }
0x13cb   :  { %v2966_v8 = vadd.f32 %v4384_v38, %v2965_v34  ;;  %v2982_v9 = vsel %vm57_vm0, %v2928_v6, -inf }
0x13cc   :  { %2983 = vmax.xlane.f32.xlu1 %v2982_v9 }
0x13cd   :  { %v2988_v27 = vsel %vm57_vm0, %v2966_v8, -inf }
0x13ce   :  { %2989 = vmax.xlane.f32.xlu2 %v2988_v27 }
0x13d0   :  { %v2929_v10 = vpop.f32.mrf.mxu3 }
0x13d1   :  { %v2930_v17 = vadd.f32 %v4385_v55, %v2929_v10 }
0x13d2   :  { %v2967_v3 = vpop.f32.mrf.mxu0 }
0x13d3   :  { %v2968_v51 = vadd.f32 %v4385_v55, %v2967_v3  ;;  %v2985_v41 = vsel %vm57_vm0, %v2930_v17, -inf }
0x13d4   :  { %2986 = vmax.xlane.f32.xlu0 %v2985_v41 }
0x13d5   :  { %v2991_v20 = vsel %vm57_vm0, %v2968_v51, -inf }
0x13d6   :  { %2992 = vmax.xlane.f32.xlu1 %v2991_v20 }
0x13e6   :  { %4162 = vrot.lane.b32.xlu2 %v5303_v23, %s4386_s0 }
0x13e8   :  { %4157 = vrot.lane.b32.xlu0 %v5305_v45, %s4388_s18 }
0x13ef   :  { %4152 = vrot.lane.b32.xlu1 %v5305_v45, %s4386_s0 }
0x1431   :  { %v2978_v22 = vpop.xlane.xlu0 %2977 }
0x1432   :  { %v2996_v37 = vsub.f32 %v2890_v2, %v2978_v22 }
0x1434   :  { %v3006_v40 = vmul.f32 1.442695, %v2996_v37 }
0x1436   :  { %4342 = vpow2.f32 %v3006_v40 }
0x1439   :  { %v2981_v43 = vpop.xlane.xlu2 %2980 }
0x143a   :  { %v2997_v38 = vsub.f32 %v2892_v33, %v2981_v43 }
0x143c   :  { %v5317_v39 = vpop.eup %4342  ;;  %v3008_v16 = vmul.f32 1.442695, %v2997_v38 }
0x143d   :  { %v3024_v21 = vsel %vm57_vm0, %v5317_v39, 0.0 }
0x143e   :  { %4344 = vpow2.f32 %v3008_v16  ;;  %3025 = vadd.xlane.f32.xlu1 %v3024_v21 }
0x143f   :  { %v2984_v55 = vpop.xlane.xlu1 %2983 }
0x1440   :  { %v2998_v4 = vsub.f32 %v2928_v6, %v2984_v55  ;;  %v2994_v55 = vsub.f32 %v5282_v18, %v5313_v25 }
0x1441   :  { %v2990_v52 = vpop.xlane.xlu2 %2989 }
0x1442   :  { %v3010_v5 = vmul.f32 1.442695, %v2998_v4  ;;  %v3000_v54 = vsub.f32 %v2966_v8, %v2990_v52  ;;  %v3002_v4 = vmul.f32 1.442695, %v2994_v55 }
0x1444   :  { %v5321_v24 = vpop.eup %4344  ;;  %4346 = vpow2.f32 %v3010_v5  ;;  %v3014_v2 = vmul.f32 1.442695, %v3000_v54 }
0x1445   :  { %v3027_v0 = vsel %vm57_vm0, %v5321_v24, 0.0 }
0x1446   :  { %4348 = vpow2.f32 %v3014_v2  ;;  %3028 = vadd.xlane.f32.xlu0 %v3027_v0 }
0x1447   :  { %v2987_v33 = vpop.xlane.xlu0 %2986 }
0x1448   :  { %v2999_v58 = vsub.f32 %v2930_v17, %v2987_v33 }
0x1449   :  { %v2993_v59 = vpop.xlane.xlu1 %2992  ;;  %v4163_v19 = vpop.permute.xlu2 %4162 }
0x144a   :  { %v5325_v1 = vpop.eup %4346  ;;  %v3012_v42 = vmul.f32 1.442695, %v2999_v58  ;;  %v3001_v34 = vsub.f32 %v2968_v51, %v2993_v59  ;;  %v4165_v7 = vunpack.i.h.bf16 %v4163_v19  ;;  %v4164_v60 = vunpack.i.l.bf16 %v4163_v19 }
0x144b   :  { %v3030_v6 = vsel %vm57_vm0, %v5325_v1, 0.0 }
0x144c   :  { %v5329_v12 = vpop.eup %4348  ;;  %4350 = vpow2.f32 %v3012_v42  ;;  %v3016_v8 = vmul.f32 1.442695, %v3001_v34  ;;  %3031 = vadd.xlane.f32.xlu2 %v3030_v6  ;;  %v2807_v3 = vpack.c.bf16 %v4165_v7, %v4165_v7  ;;  %v2806_v44 = vpack.c.bf16 %v4164_v60, %v4164_v60 }
0x144d   :  { %v3036_v9 = vsel %vm57_vm0, %v5329_v12, 0.0 }
0x144e   :  { %4352 = vpow2.f32 %v3016_v8  ;;  %3037 = vadd.xlane.f32.xlu0 %v3036_v9  ;;  %v3214_v29 = vunpack.c.l.b16 %v2807_v3  ;;  %v3213_v20 = vunpack.c.l.b16 %v2806_v44 }
0x144f   :  { %4354 = vpow2.f32 %v3002_v4 }
0x1450   :  { %v3217_v31 = vpack.c.b16 %v3214_v29, %v3213_v20 }
0x1452   :  { %v5333_v50 = vpop.eup %4350 }
0x1453   :  { %v3033_v53 = vsel %vm57_vm0, %v5333_v50, 0.0 }
0x1454   :  { %v5337_v27 = vpop.eup %4352  ;;  %3034 = vadd.xlane.f32.xlu1 %v3033_v53 }
0x1455   :  { %v3039_v36 = vsel %vm57_vm0, %v5337_v27, 0.0  ;;  %v5351_v52 = vpop.eup %4354 }
0x1456   :  { %3040 = vadd.xlane.f32.xlu2 %v3039_v36 }
0x145a   :  { %v4158_v32 = vpop.permute.xlu0 %4157 }
0x145b   :  { %v4160_v22 = vunpack.i.h.bf16 %v4158_v32  ;;  %v4159_v37 = vunpack.i.l.bf16 %v4158_v32 }
0x145d   :  { %v2813_v40 = vpack.c.bf16 %v4160_v22, %v4160_v22  ;;  %v2812_v43 = vpack.c.bf16 %v4159_v37, %v4159_v37 }
0x145f   :  { %v3250_v38 = vunpack.c.l.b16 %v2813_v40  ;;  %v3249_v16 = vunpack.c.l.b16 %v2812_v43 }
0x1461   :  { %v4153_v28 = vpop.permute.xlu1 %4152  ;;  %v3252_v21 = vpack.c.b16 %v3250_v38, %v3249_v16 }
0x1462   :  { %4167 = vrot.lane.b32.xlu0 %v5303_v23, %s4388_s18  ;;  %v4155_v10 = vunpack.i.h.bf16 %v4153_v28  ;;  %v4154_v17 = vunpack.i.l.bf16 %v4153_v28 }
0x1463   :  { %3264 = vmatpush.bf16.msra.mxu3 %v3252_v21 }
0x1464   :  { %v2809_v26 = vpack.c.bf16 %v4155_v10, %v4155_v10  ;;  %v2808_v11 = vpack.c.bf16 %v4154_v17, %v4154_v17 }
0x1466   :  { %v3216_v51 = vunpack.c.l.b16 %v2809_v26  ;;  %v3215_v41 = vunpack.c.l.b16 %v2808_v11 }
0x1468   :  { %v3218_v13 = vpack.c.b16 %v3216_v51, %v3215_v41 }
0x146a   :  { %3230 = vmatpush.bf16.msra.mxu2 %v3218_v13 }
0x146d   :  { %4172 = vrot.lane.b32.xlu1 %v5305_v45, %s4387_s17  ;;  %v2995_v45 = vsub.f32 %v5290_v49, %v5315_v35 }
0x146e   :  { %4177 = vrot.lane.b32.xlu2 %v5303_v23, %s4387_s17  ;;  %3231 = vmatpush.bf16.msra.mxu2 %v3217_v31  ;;  %v3018_v23 = vsel %vm57_vm0, %v5351_v52, 0.0 }
0x146f   :  { %v3004_v5 = vmul.f32 1.442695, %v2995_v45 }
0x1471   :  { %4356 = vpow2.f32 %v3004_v5 }
0x1477   :  { %v5355_v54 = vpop.eup %4356 }
0x1478   :  { %v3021_v2 = vsel %vm57_vm0, %v5355_v54, 0.0 }
0x148c   :  { %3019 = vadd.xlane.f32.xlu0 %v3018_v23 }
0x1497   :  { %3022 = vadd.xlane.f32.xlu1 %v3021_v2 }
0x14b1   :  { %v3026_v18 = vpop.xlane.xlu1 %3025 }
0x14b2   :  { %4358 = vrcp.f32 %v3026_v18  ;;  %v3083_v58 = vand.u32 2147483648, %v3026_v18  ;;  %vm3077_vm5 = vweird.f32 %v3026_v18  ;;  %v3081_v42 = vand.u32 2147483647, %v3026_v18 }
0x14b4   :  { %v3084_v36 = vor.u32 1.1754944e-38, %v3083_v58  ;;  %vm3082_vm6 = vcmp.eq.f32.partialorder %v3081_v42, 8.507059e+37 }
0x14b8   :  { %v4359_v25 = vpop.eup %4358 }
0x14b9   :  { %v3073_v0 = vmul.f32 %v4359_v25, %v3026_v18  ;;  %v3029_v33 = vpop.xlane.xlu0 %3028  ;;  %vm3078_vm4 = vweird.f32 %v4359_v25 }
0x14ba   :  { %4360 = vrcp.f32 %v3029_v33  ;;  %vm3079_vm10 = vmor %vm3077_vm5, %vm3078_vm4  ;;  %v3098_v60 = vand.u32 2147483648, %v3029_v33  ;;  %v3096_v10 = vand.u32 2147483647, %v3029_v33  ;;  %vm3092_vm11 = vweird.f32 %v3029_v33 }
0x14bb   :  { %v3074_v49 = vsub.f32 1.0, %v3073_v0 }
0x14bc   :  { %v3099_v51 = vor.u32 1.1754944e-38, %v3098_v60  ;;  %vm3097_vm13 = vcmp.eq.f32.partialorder %v3096_v10, 8.507059e+37 }
0x14bd   :  { %v3075_v35 = vmul.f32 %v4359_v25, %v3074_v49 }
0x14bf   :  { %v3076_v59 = vadd.f32 %v4359_v25, %v3075_v35  ;;  %v3032_v34 = vpop.xlane.xlu2 %3031 }
0x14c0   :  { %v4361_v6 = vpop.eup %4360  ;;  %4362 = vrcp.f32 %v3032_v34  ;;  %v3111_v37 = vand.u32 2147483647, %v3032_v34  ;;  %v3113_v40 = vand.u32 2147483648, %v3032_v34  ;;  %vm3107_vm7 = vweird.f32 %v3032_v34 }
0x14c1   :  { %v3080_v8 = vsel %vm3079_vm10, %v4359_v25, %v3076_v59  ;;  %v3088_v9 = vmul.f32 %v4361_v6, %v3029_v33  ;;  %v5359_v53 = vpop.xlane.xlu0 %3037  ;;  %vm3093_vm3 = vweird.f32 %v4361_v6 }
0x14c2   :  { %v3085_v7 = vsel %vm3082_vm6, %v3084_v36, %v3080_v8  ;;  %4364 = vrcp.f32 %v5359_v53  ;;  %vm3094_vm8 = vmor %vm3092_vm11, %vm3093_vm3  ;;  %vm3112_vm15 = vcmp.eq.f32.partialorder %v3111_v37, 8.507059e+37  ;;  %v3114_v23 = vor.u32 1.1754944e-38, %v3113_v40 }
0x14c3   :  { %v3089_v19 = vsub.f32 1.0, %v3088_v9  ;;  %v5363_v26 = vmul.f32 %v5317_v39, %v3085_v7  ;;  %v3141_v37 = vand.u32 2147483647, %v5359_v53 }
0x14c5   :  { %v3090_v28 = vmul.f32 %v4361_v6, %v3089_v19  ;;  %v3164_v39 = vpack.c.bf16 %v5363_v26, %v5363_v26 }
0x14c6   :  { %v4363_v17 = vpop.eup %4362 }
0x14c7   :  { %v3091_v11 = vadd.f32 %v4361_v6, %v3090_v28  ;;  %v3103_v3 = vmul.f32 %v4363_v17, %v3032_v34  ;;  %v3035_v44 = vpop.xlane.xlu1 %3034  ;;  %vm3108_vm14 = vweird.f32 %v4363_v17  ;;  %v3206_v55 = vunpack.c.l.b16 %v3164_v39 }
0x14c8   :  { %4366 = vrcp.f32 %v3035_v44  ;;  %v5367_v20 = vpop.eup %4364  ;;  %vm3109_vm12 = vmor %vm3107_vm7, %vm3108_vm14  ;;  %v3126_v0 = vand.u32 2147483647, %v3035_v44  ;;  %v3128_v49 = vand.u32 2147483648, %v3035_v44  ;;  %vm3122_vm10 = vweird.f32 %v3035_v44 }
0x14c9   :  { %v3095_v41 = vsel %vm3094_vm8, %v4361_v6, %v3091_v11  ;;  %v3104_v13 = vsub.f32 1.0, %v3103_v3  ;;  %v5365_v29 = vpop.xlane.xlu2 %3040  ;;  %v3133_v16 = vmul.f32 %v5367_v20, %v5359_v53  ;;  %vm3138_vm5 = vweird.f32 %v5367_v20 }
0x14ca   :  { %v3100_v31 = vsel %vm3097_vm13, %v3099_v51, %v3095_v41  ;;  %4368 = vrcp.f32 %v5365_v29  ;;  %vm3127_vm6 = vcmp.eq.f32.partialorder %v3126_v0, 8.507059e+37  ;;  %v3129_v9 = vor.u32 1.1754944e-38, %v3128_v49 }
0x14cb   :  { %v5373_v32 = vmul.f32 %v5321_v24, %v3100_v31  ;;  %v3105_v22 = vmul.f32 %v4363_v17, %v3104_v13  ;;  %v3134_v18 = vsub.f32 1.0, %v3133_v16  ;;  %vm3152_vm11 = vweird.f32 %v5365_v29 }
0x14cc   :  { %v3158_v28 = vand.u32 2147483648, %v5365_v29  ;;  %v3156_v41 = vand.u32 2147483647, %v5365_v29  ;;  %v3143_v13 = vand.u32 2147483648, %v5359_v53  ;;  %vm3137_vm14 = vweird.f32 %v5359_v53 }
0x14cd   :  { %v3165_v43 = vpack.c.bf16 %v5373_v32, %v5373_v32  ;;  %v3106_v38 = vadd.f32 %v4363_v17, %v3105_v22  ;;  %v3135_v6 = vmul.f32 %v5367_v20, %v3134_v18  ;;  %vm5408_vm7 = vmor %vm3137_vm14, %vm3138_vm5 }
0x14ce   :  { %v4367_v21 = vpop.eup %4366 }
0x14cf   :  { %v3207_v4 = vunpack.c.l.b16 %v3165_v43  ;;  %v3110_v45 = vsel %vm3109_vm12, %v4363_v17, %v3106_v38  ;;  %v3118_v5 = vmul.f32 %v4367_v21, %v3035_v44  ;;  %vm3123_vm4 = vweird.f32 %v4367_v21 }
0x14d0   :  { %v4369_v24 = vpop.eup %4368  ;;  %v3115_v33 = vsel %vm3112_vm15, %v3114_v23, %v3110_v45  ;;  %vm3124_vm3 = vmor %vm3122_vm10, %vm3123_vm4  ;;  %v3136_v44 = vadd.f32 %v5367_v20, %v3135_v6  ;;  %v3159_v38 = vor.u32 1.1754944e-38, %v3158_v28  ;;  %vm3157_vm12 = vcmp.eq.f32.partialorder %v3156_v41, 8.507059e+37 }
0x14d1   :  { %v3208_v2 = vpack.c.b16 %v3207_v4, %v3206_v55  ;;  %v3119_v25 = vsub.f32 1.0, %v3118_v5  ;;  %v3148_v35 = vmul.f32 %v4369_v24, %v5365_v29  ;;  %v5383_v34 = vmul.f32 %v5325_v1, %v3115_v33  ;;  %v4178_v43 = vpop.permute.xlu2 %4177 }
0x14d2   :  { %vm3153_vm8 = vweird.f32 %v4369_v24  ;;  %v3140_v53 = vsel %vm5408_vm7, %v5367_v20, %v3136_v44  ;;  %v3144_v4 = vor.u32 1.1754944e-38, %v3143_v13  ;;  %v4180_v5 = vunpack.i.h.bf16 %v4178_v43 }
0x14d3   :  { %v3120_v58 = vmul.f32 %v4367_v21, %v3119_v25  ;;  %3802 = vmatmul.msk.bf16.vlgmr.msra.gmra.mxu2 %vm57_vm0, %v3208_v2  ;;  %v3149_v59 = vsub.f32 1.0, %v3148_v35  ;;  %v3166_v3 = vpack.c.bf16 %v5383_v34, %v5383_v34  ;;  %vm5396_vm13 = vmor %vm3152_vm11, %vm3153_vm8  ;;  %vm3142_vm15 = vcmp.eq.f32.partialorder %v3141_v37, 8.507059e+37 }
0x14d4   :  { %v4168_v42 = vpop.permute.xlu0 %4167  ;;  %v3145_v18 = vsel %vm3142_vm15, %v3144_v4, %v3140_v53  ;;  %v2815_v49 = vpack.c.bf16 %v4180_v5, %v4180_v5 }
0x14d5   :  { %v3121_v8 = vadd.f32 %v4367_v21, %v3120_v58  ;;  %v3150_v36 = vmul.f32 %v4369_v24, %v3149_v59  ;;  %v4170_v19 = vunpack.i.h.bf16 %v4168_v42  ;;  %v4169_v7 = vunpack.i.l.bf16 %v4168_v42 }
0x14d6   :  { %v5420_v59 = vmul.f32 %v5329_v12, %v3145_v18 }
0x14d7   :  { %v3125_v60 = vsel %vm3124_vm3, %v4367_v21, %v3121_v8  ;;  %v3151_v17 = vadd.f32 %v4369_v24, %v3150_v36  ;;  %v2811_v11 = vpack.c.bf16 %v4170_v19, %v4170_v19  ;;  %v2810_v1 = vpack.c.bf16 %v4169_v7, %v4169_v7 }
0x14d8   :  { %v3130_v10 = vsel %vm3127_vm6, %v3129_v9, %v3125_v60  ;;  %v3240_v21 = vunpack.c.l.b16 %v3166_v3  ;;  %v3282_v9 = vunpack.c.l.b16 %v2815_v49 }
0x14d9   :  { %v5392_v51 = vmul.f32 %v5333_v50, %v3130_v10  ;;  %v3248_v39 = vunpack.c.l.b16 %v2811_v11  ;;  %v3247_v22 = vunpack.c.l.b16 %v2810_v1  ;;  %v3155_v50 = vsel %vm5396_vm13, %v4369_v24, %v3151_v17 }
0x14da   :  { %v3160_v45 = vsel %vm3157_vm12, %v3159_v38, %v3155_v50  ;;  %v4179_v24 = vunpack.i.l.bf16 %v4178_v43 }
0x14db   :  { %v3167_v40 = vpack.c.bf16 %v5392_v51, %v5392_v51  ;;  %v3251_v16 = vpack.c.b16 %v3248_v39, %v3247_v22  ;;  %v5416_v33 = vmul.f32 %v5337_v27, %v3160_v45  ;;  %v3168_v27 = vpack.c.bf16 %v5420_v59, %v5420_v59 }
0x14dc   :  { %v2814_v20 = vpack.c.bf16 %v4179_v24, %v4179_v24 }
0x14dd   :  { %v3241_v55 = vunpack.c.l.b16 %v3167_v40  ;;  %3265 = vmatpush.bf16.msra.mxu3 %v3251_v16  ;;  %v3169_v8 = vpack.c.bf16 %v5416_v33, %v5416_v33  ;;  %v3274_v28 = vunpack.c.l.b16 %v3168_v27 }
0x14de   :  { %v3281_v36 = vunpack.c.l.b16 %v2814_v20 }
0x14df   :  { %v3242_v23 = vpack.c.b16 %v3241_v55, %v3240_v21  ;;  %v4173_v2 = vpop.permute.xlu1 %4172  ;;  %v3275_v7 = vunpack.c.l.b16 %v3169_v8  ;;  %v3879_v8 = vld [vmem:[%s5572_s4 + $0x128] sm:$0xff] }
0x14e0   :  { %v4175_v25 = vunpack.i.h.bf16 %v4173_v2  ;;  %v4174_v0 = vunpack.i.l.bf16 %v4173_v2  ;;  %v3285_v60 = vpack.c.b16 %v3282_v9, %v3281_v36  ;;  %3359 = vmatpush.bf16.msrb.mxu1 %v3879_v8  ;;  %v3878_v9 = vld [vmem:[%s5572_s4 + $0x120] sm:$0xff] }
0x14e1   :  { %3803 = vmatmul.msk.bf16.vlgmr.msra.gmra.mxu3 %vm57_vm0, %v3242_v23  ;;  %v3276_v10 = vpack.c.b16 %v3275_v7, %v3274_v28 }
0x14e2   :  { %v2817_v35 = vpack.c.bf16 %v4175_v25, %v4175_v25  ;;  %v2816_v58 = vpack.c.bf16 %v4174_v0, %v4174_v0 }
0x14e4   :  { %v3284_v42 = vunpack.c.l.b16 %v2817_v35  ;;  %v3283_v6 = vunpack.c.l.b16 %v2816_v58  ;;  %3360 = vmatpush.bf16.msrb.mxu1 %v3878_v9 }
0x14e6   :  { %v3286_v19 = vpack.c.b16 %v3284_v42, %v3283_v6 }
0x14e8   :  { %3298 = vmatpush.bf16.msrb.mxu0 %v3286_v19 }
0x14ec   :  { %3299 = vmatpush.bf16.msrb.mxu0 %v3285_v60 }
0x14ef   :  { %3804 = vmatmul.msk.bf16.vlgmr.msrb.gmra.mxu0 %vm57_vm0, %v3276_v10 }
0x14ff   :  { %v3020_v12 = vpop.xlane.xlu0 %3019 }
0x1500   :  { %4370 = vrcp.f32 %v3020_v12  ;;  %v3053_v13 = vand.u32 2147483648, %v3020_v12  ;;  %vm3047_vm5 = vweird.f32 %v3020_v12  ;;  %v3051_v31 = vand.u32 2147483647, %v3020_v12 }
0x1502   :  { %v3054_v40 = vor.u32 1.1754944e-38, %v3053_v13  ;;  %vm3052_vm6 = vcmp.eq.f32.partialorder %v3051_v31, 8.507059e+37 }
0x1506   :  { %v4371_v17 = vpop.eup %4370 }
0x1507   :  { %v3043_v11 = vmul.f32 %v4371_v17, %v3020_v12  ;;  %vm3048_vm4 = vweird.f32 %v4371_v17 }
0x1508   :  { %vm3049_vm10 = vmor %vm3047_vm5, %vm3048_vm4  ;;  %vm1624_vm4 = vcmask 785408  }
0x1509   :  { %v3044_v1 = vsub.f32 1.0, %v3043_v11 }
0x150a   :  { %v3023_v3 = vpop.xlane.xlu1 %3022 }
0x150b   :  { %v3045_v44 = vmul.f32 %v4371_v17, %v3044_v1  ;;  %4372 = vrcp.f32 %v3023_v3  ;;  %v3068_v29 = vand.u32 2147483648, %v3023_v3  ;;  %v3066_v16 = vand.u32 2147483647, %v3023_v3 }
0x150c   :  { %vm3062_vm11 = vweird.f32 %v3023_v3 }
0x150d   :  { %v3046_v41 = vadd.f32 %v4371_v17, %v3045_v44  ;;  %v3069_v55 = vor.u32 1.1754944e-38, %v3068_v29  ;;  %vm3067_vm13 = vcmp.eq.f32.partialorder %v3066_v16, 8.507059e+37 }
0x150f   :  { %v3050_v22 = vsel %vm3049_vm10, %v4371_v17, %v3046_v41 }
0x1510   :  { %v3055_v43 = vsel %vm3052_vm6, %v3054_v40, %v3050_v22 }
0x1511   :  { %v4373_v39 = vpop.eup %4372  ;;  %v5428_v21 = vmul.f32 %v5351_v52, %v3055_v43 }
0x1512   :  { %v3058_v37 = vmul.f32 %v4373_v39, %v3023_v3  ;;  %vm3063_vm3 = vweird.f32 %v4373_v39 }
0x1513   :  { %vm3064_vm8 = vmor %vm3062_vm11, %vm3063_vm3  ;;  %v3162_v5 = vpack.c.bf16 %v5428_v21, %v5428_v21 }
0x1514   :  { %v3059_v50 = vsub.f32 1.0, %v3058_v37  ;;  %v4221_v37 = vld [vmem:[%s5574_s5 + $0x17] ss:$0 sm:$0xff] }
0x1515   :  { %v3172_v2 = vunpack.c.l.b16 %v3162_v5 }
0x1516   :  { %v3060_v38 = vmul.f32 %v4373_v39, %v3059_v50 }
0x1518   :  { %v3061_v53 = vadd.f32 %v4373_v39, %v3060_v38 }
0x151a   :  { %v3065_v4 = vsel %vm3064_vm8, %v4373_v39, %v3061_v53 }
0x151b   :  { %v3070_v45 = vsel %vm3067_vm13, %v3069_v55, %v3065_v4 }
0x151c   :  { %v5433_v24 = vmul.f32 %v5355_v54, %v3070_v45 }
0x151e   :  { %v3163_v23 = vpack.c.bf16 %v5433_v24, %v5433_v24 }
0x1520   :  { %v3173_v18 = vunpack.c.l.b16 %v3163_v23 }
0x1522   :  { %v3174_v52 = vpack.c.b16 %v3173_v18, %v3172_v2 }
0x1524   :  { %3801 = vmatmul.msk.bf16.vlgmr.msra.gmra.mxu1 %vm57_vm0, %v3174_v52 }
0x1556   :  { %v3233_v25 = vpop.f32.mrf.mxu2 }
0x155e   :  { %v3235_v0 = vpop.f32.mrf.mxu2 }
0x155f   :  { %v4181_v49 = vpack.i.bf16 %v3235_v0, %v3233_v25 }
0x1561   :  { %4182 = vrot.lane.b32.xlu2 %v4181_v49, %s4389_s29 }
0x1564   :  { %v3267_v20 = vpop.f32.mrf.mxu3 }
0x156c   :  { %v3269_v35 = vpop.f32.mrf.mxu3  ;;  %v3301_v58 = vpop.f32.mrf.mxu0 }
0x156d   :  { %v4186_v42 = vpack.i.bf16 %v3269_v35, %v3267_v20 }
0x156f   :  { %4187 = vrot.lane.b32.xlu2 %v4186_v42, %s4390_s30 }
0x1574   :  { %v3303_v54 = vpop.f32.mrf.mxu0 }
0x1575   :  { %v4191_v6 = vpack.i.bf16 %v3303_v54, %v3301_v58 }
0x1577   :  { %4192 = vrot.lane.b32.xlu2 %v4191_v6, %s4391_s8  ;;  %s4393_s8 = smov 32  }
0x15a1   :  { %v3199_v19 = vpop.f32.mrf.mxu1 }
0x15a9   :  { %v3201_v12 = vpop.f32.mrf.mxu1 }
0x15bb   :  { %v4183_v36 = vpop.permute.xlu2 %4182 }
0x15bc   :  { %v4185_v7 = vunpack.i.h.bf16 %v4183_v36  ;;  %v4184_v60 = vunpack.i.l.bf16 %v4183_v36 }
0x15be   :  { %v3330_v11 = vsel %vm238_vm1, %v3199_v19, %v4184_v60  ;;  %v3331_v1 = vsel %vm238_vm1, %v3201_v12, %v4185_v7  ;;  %vm5605_vm1 = vcmask 523264  }
0x15bf   :  { %vm5606_vm5 = vmmov %vm5605_vm1 }
0x15c0   :  { %vm5607_vm10 = vmmov %vm5605_vm1 }
0x15c1   :  { %vm5608_vm6 = vmmov %vm5605_vm1 }
0x15c2   :  { %vm5609_vm13 = vmmov %vm5605_vm1 }
0x15c9   :  { %v4188_v27 = vpop.permute.xlu2 %4187 }
0x15ca   :  { %v4190_v28 = vunpack.i.h.bf16 %v4188_v27  ;;  %v4189_v10 = vunpack.i.l.bf16 %v4188_v27 }
0x15cc   :  { %v3333_v41 = vsel %vm349_vm2, %v3331_v1, %v4190_v28  ;;  %v3332_v13 = vsel %vm349_vm2, %v3330_v11, %v4189_v10  ;;  %v4222_v10 = vld [vmem:[%s5574_s5 + $0x1c] ss:$0 sm:$0xff]  ;;  %v4223_v1 = vld [vmem:[%s5574_s5 + $0x1d] ss:$0 sm:$0xff] }
0x15d1   :  { %v4193_v17 = vpop.permute.xlu2 %4192 }
0x15d2   :  { %v4195_v3 = vunpack.i.h.bf16 %v4193_v17  ;;  %v4194_v44 = vunpack.i.l.bf16 %v4193_v17 }
0x15d4   :  { %v3334_v31 = vsel %vm690_vm9, %v3332_v13, %v4194_v44  ;;  %v3335_v39 = vsel %vm690_vm9, %v3333_v41, %v4195_v3 }
0x15d5   :  { %v3336_v22 = vpack.c.bf16 %v3335_v39, %v3334_v31 }
0x15d7   :  { %3813 = vmatmul.msk.bf16.vlgmr.msrb.gmra.mxu1 %vm57_vm0, %v3336_v22 }
0x1654   :  { %v3362_v40 = vpop.f32.mrf.mxu1 }
0x1655   :  { %v3363_v50 = vadd.f32 %v4221_v37, %v3362_v40 }
0x1657   :  { %v3400_v43 = vadd.f32 %v3363_v50, %v5240_v57 }
0x1659   :  { %v3404_v29 = vsel %vm57_vm0, %v3400_v43, 0.0 }
0x165a   :  { %3405 = vadd.xlane.f32.xlu2 %v3404_v29  ;;  %v3884_v29 = vld [vmem:[%s5572_s4 + $0x150] sm:$0xff] }
0x165c   :  { %v3364_v38 = vpop.f32.mrf.mxu1 }
0x165d   :  { %v3365_v16 = vadd.f32 %v4221_v37, %v3364_v38  ;;  %v3883_v38 = vld [vmem:[%s5572_s4 + $0x148] sm:$0xff] }
0x165f   :  { %v3401_v53 = vadd.f32 %v3365_v16, %v5242_v46  ;;  %v3882_v16 = vld [vmem:[%s5572_s4 + $0x140] sm:$0xff] }
0x1661   :  { %v3407_v55 = vsel %vm57_vm0, %v3401_v53, 0.0 }
0x1662   :  { %3408 = vadd.xlane.f32.xlu0 %v3407_v55  ;;  %v4224_v55 = vld [vmem:[%s5574_s5 + $0x18] ss:$0 sm:$0xff] }
0x1672   :  { %1599 = vrot.lane.b32.xlu2 %v4827_v63, %s4393_s8 }
0x167a   :  { %1607 = vrot.lane.b32.xlu2 %v4866_v61, %s4394_s19 }
0x1682   :  { %1613 = vrot.lane.b32.xlu2 %v4879_v15, %s4395_s20 }
0x168a   :  { %3387 = vrot.lane.b32.xlu2 %v5416_v33, %s4395_s20 }
0x16cd   :  { %v3406_v57 = vpop.xlane.xlu2 %3405 }
0x16ce   :  { %v3410_v46 = vmul.f32 %v3406_v57, %v4660_v48 }
0x16d0   :  { %v3412_v4 = vsub.f32 %v3400_v43, %v3410_v46 }
0x16d2   :  { %v3414_v45 = vmul.f32 %v3412_v4, %v3412_v4 }
0x16d4   :  { %v3416_v5 = vsel %vm57_vm0, %v3414_v45, 0.0 }
0x16d5   :  { %v3409_v23 = vpop.xlane.xlu0 %3408  ;;  %3417 = vadd.xlane.f32.xlu1 %v3416_v5  ;;  %v1600_v63 = vpop.permute.xlu2 %1599 }
0x16d6   :  { %v3411_v2 = vmul.f32 %v3409_v23, %v4660_v48  ;;  %v1620_v15 = vsel %vm57_vm0, %v4893_v62, %v1600_v63  ;;  %v3881_v62 = vld [vmem:[%s5572_s4 + $0x138] sm:$0xff] }
0x16d7   :  { %3482 = vmatpush.bf16.msrb.mxu2 %v3881_v62  ;;  %v4225_v63 = vld [vmem:[%s5574_s5 + $0x19] ss:$0 sm:$0xff] }
0x16d8   :  { %v3413_v61 = vsub.f32 %v3401_v53, %v3411_v2 }
0x16da   :  { %v3415_v18 = vmul.f32 %v3413_v61, %v3413_v61 }
0x16dc   :  { %v3419_v52 = vsel %vm57_vm0, %v3415_v18, 0.0 }
0x16dd   :  { %3420 = vadd.xlane.f32.xlu0 %v3419_v52  ;;  %v1608_v33 = vpop.permute.xlu2 %1607 }
0x16de   :  { %v5475_v25 = vsel %vm5605_vm1, %v1620_v15, %v1608_v33 }
0x16e5   :  { %v1614_v31 = vpop.permute.xlu2 %1613 }
0x16ee   :  { %1597 = vrot.lane.b32.xlu1 %v4817_v47, %s4393_s8  ;;  %v3880_v47 = vld [vmem:[%s5572_s4 + $0x130] sm:$0xff] }
0x16ef   :  { %3483 = vmatpush.bf16.msrb.mxu2 %v3880_v47 }
0x16f1   :  { %3369 = vrot.lane.b32.xlu0 %v5363_v26, %s4393_s8 }
0x16f6   :  { %1605 = vrot.lane.b32.xlu1 %v4849_v30, %s4394_s19 }
0x16f9   :  { %3371 = vrot.lane.b32.xlu0 %v5373_v32, %s4393_s8 }
0x1748   :  { %v3418_v0 = vpop.xlane.xlu1 %3417 }
0x1749   :  { %v3422_v49 = vmul.f32 %v3418_v0, %v4660_v48 }
0x174b   :  { %v3424_v20 = vadd.f32 1e-05, %v3422_v49 }
0x174d   :  { %4374 = vrsqrt.f32 %v3424_v20  ;;  %vm3432_vm9 = vweird.f32 %v3424_v20 }
0x1750   :  { %v3421_v26 = vpop.xlane.xlu0 %3420 }
0x1751   :  { %v3423_v35 = vmul.f32 %v3421_v26, %v4660_v48 }
0x1753   :  { %v4375_v30 = vpop.eup %4374  ;;  %v3425_v32 = vadd.f32 1e-05, %v3423_v35 }
0x1754   :  { %v3427_v58 = vmul.f32 %v4375_v30, %v3424_v20  ;;  %vm3433_vm2 = vweird.f32 %v4375_v30 }
0x1755   :  { %4376 = vrsqrt.f32 %v3425_v32  ;;  %vm3434_vm14 = vmor %vm3432_vm9, %vm3433_vm2  ;;  %vm3442_vm12 = vweird.f32 %v3425_v32 }
0x1756   :  { %v3428_v42 = vmul.f32 %v4375_v30, %v3427_v58 }
0x1758   :  { %v3429_v54 = vmul.f32 0.5, %v3428_v42 }
0x175a   :  { %v3430_v6 = vsub.f32 1.5, %v3429_v54 }
0x175b   :  { %v4377_v8 = vpop.eup %4376 }
0x175c   :  { %v3431_v9 = vmul.f32 %v4375_v30, %v3430_v6  ;;  %v3437_v36 = vmul.f32 %v4377_v8, %v3425_v32  ;;  %vm3443_vm7 = vweird.f32 %v4377_v8 }
0x175d   :  { %vm3444_vm15 = vmor %vm3442_vm12, %vm3443_vm7 }
0x175e   :  { %v3438_v19 = vmul.f32 %v4377_v8, %v3437_v36  ;;  %v3435_v27 = vsel %vm3434_vm14, %v4375_v30, %v3431_v9  ;;  %v3388_v9 = vpop.permute.xlu2 %3387 }
0x175f   :  { %v3446_v12 = vmul.f32 %v3435_v27, %v3412_v4 }
0x1760   :  { %v3439_v7 = vmul.f32 0.5, %v3438_v19  ;;  %v1598_v60 = vpop.permute.xlu1 %1597 }
0x1761   :  { %v3449_v3 = vmul.f32 %v4222_v10, %v3446_v12  ;;  %v1619_v41 = vsel %vm57_vm0, %v4888_v56, %v1598_v60  ;;  %v3885_v56 = vld [vmem:[%s5572_s4 + $0x158] sm:$0xff] }
0x1762   :  { %v3440_v28 = vsub.f32 1.5, %v3439_v7  ;;  %3534 = vmatpush.bf16.msrb.mxu3 %v3885_v56 }
0x1763   :  { %v3452_v40 = vadd.f32 %v4223_v1, %v3449_v3  ;;  %v3370_v20 = vpop.permute.xlu0 %3369 }
0x1764   :  { %v3441_v17 = vmul.f32 %v4377_v8, %v3440_v28 }
0x1766   :  { %v3445_v11 = vsel %vm3444_vm15, %v4377_v8, %v3441_v17  ;;  %3535 = vmatpush.bf16.msrb.mxu3 %v3884_v29 }
0x1767   :  { %v3447_v44 = vmul.f32 %v3445_v11, %v3413_v61 }
0x1768   :  { %v1606_v13 = vpop.permute.xlu1 %1605 }
0x1769   :  { %v3450_v39 = vmul.f32 %v4222_v10, %v3447_v44  ;;  %v1622_v22 = vsel %vm5606_vm5, %v1619_v41, %v1606_v13  ;;  %v4226_v13 = vld [vmem:[%s5574_s5 + $0x1e] ss:$0 sm:$0xff] }
0x176a   :  { %v1625_v37 = vsel %vm1624_vm4, %v1622_v22, %v1614_v31  ;;  %3536 = vmatpush.bf16.msrb.mxu3 %v3883_v38  ;;  %v4227_v22 = vld [vmem:[%s5574_s5 + $0x1f] ss:$0 sm:$0xff] }
0x176b   :  { %v3453_v50 = vadd.f32 %v4223_v1, %v3450_v39  ;;  %1627 = vst [vmem:[%s5578_s7] sm:$0xff] %v1625_v37  ;;  %v3372_v62 = vpop.permute.xlu0 %3371 }
0x176d   :  { %v3454_v43 = vpack.c.bf16 %v3453_v50, %v3452_v40 }
0x176e   :  { %3537 = vmatpush.bf16.msrb.mxu3 %v3882_v16 }
0x176f   :  { %3824 = vmatmul.msk.bf16.vlgmr.msrb.gmra.mxu2 %vm57_vm0, %v3454_v43 }
0x17f2   :  { %v3485_v53 = vpop.f32.mrf.mxu2 }
0x17f3   :  { %v3486_v57 = vadd.f32 %v4224_v55, %v3485_v53 }
0x17f5   :  { %v3490_v45 = vmax.f32 %v3486_v57, 0.0 }
0x17fa   :  { %v3487_v46 = vpop.f32.mrf.mxu2 }
0x17fb   :  { %v3488_v4 = vadd.f32 %v4224_v55, %v3487_v46 }
0x17fd   :  { %v3491_v5 = vmax.f32 %v3488_v4, 0.0 }
0x17ff   :  { %v3492_v23 = vpack.c.bf16 %v3491_v5, %v3490_v45 }
0x1801   :  { %3841 = vmatmul.msk.bf16.vlgmr.msrb.gmra.mxu3 %vm5607_vm10, %v3492_v23 }
0x1884   :  { %v3539_v2 = vpop.f32.mrf.mxu3 }
0x1885   :  { %v3540_v61 = vadd.f32 %v4225_v63, %v3539_v2 }
0x1887   :  { %v3544_v18 = vadd.f32 %v3540_v61, %v3452_v40 }
0x1889   :  { %v3548_v52 = vsel %vm57_vm0, %v3544_v18, 0.0 }
0x188a   :  { %3549 = vadd.xlane.f32.xlu1 %v3548_v52 }
0x188c   :  { %v3541_v15 = vpop.f32.mrf.mxu3 }
0x188d   :  { %v3542_v33 = vadd.f32 %v4225_v63, %v3541_v15 }
0x188f   :  { %v3545_v0 = vadd.f32 %v3542_v33, %v3453_v50 }
0x1891   :  { %v3551_v49 = vsel %vm57_vm0, %v3545_v0, 0.0 }
0x1892   :  { %3552 = vadd.xlane.f32.xlu0 %v3551_v49 }
0x18a3   :  { %3379 = vrot.lane.b32.xlu1 %v5392_v51, %s4394_s19 }
0x18a6   :  { %3377 = vrot.lane.b32.xlu0 %v5383_v34, %s4394_s19  ;;  %v3392_v34 = vsel %vm57_vm0, %v5433_v24, %v3372_v62 }
0x18fd   :  { %v3550_v47 = vpop.xlane.xlu1 %3549 }
0x18fe   :  { %v3554_v26 = vmul.f32 %v3550_v47, %v4660_v48 }
0x1900   :  { %v3556_v35 = vsub.f32 %v3544_v18, %v3554_v26 }
0x1902   :  { %v3558_v30 = vmul.f32 %v3556_v35, %v3556_v35 }
0x1904   :  { %v3560_v32 = vsel %vm57_vm0, %v3558_v30, 0.0 }
0x1905   :  { %v3553_v58 = vpop.xlane.xlu0 %3552  ;;  %3561 = vadd.xlane.f32.xlu1 %v3560_v32 }
0x1906   :  { %v3555_v42 = vmul.f32 %v3553_v58, %v4660_v48 }
0x1908   :  { %v3557_v54 = vsub.f32 %v3545_v0, %v3555_v42 }
0x190a   :  { %v3559_v6 = vmul.f32 %v3557_v54, %v3557_v54 }
0x190c   :  { %v3563_v51 = vsel %vm57_vm0, %v3559_v6, 0.0 }
0x190d   :  { %3564 = vadd.xlane.f32.xlu0 %v3563_v51 }
0x1915   :  { %v3380_v8 = vpop.permute.xlu1 %3379 }
0x1916   :  { %v3394_v36 = vsel %vm5608_vm6, %v3392_v34, %v3380_v8 }
0x1917   :  { %v3396_v19 = vsel %vm1624_vm4, %v3394_v36, %v3388_v9 }
0x1918   :  { %3815 = vst [vmem:[%s5578_s7 + $0x18] sm:$0xff] %v3396_v19  ;;  %v3378_v27 = vpop.permute.xlu0 %3377 }
0x191e   :  { %3385 = vrot.lane.b32.xlu1 %v5420_v59, %s4395_s20 }
0x1921   :  { %1615 = vrot.lane.b32.xlu0 %v4876_v14, %s4395_s20 }
0x1978   :  { %v3562_v7 = vpop.xlane.xlu1 %3561 }
0x1979   :  { %v3566_v24 = vmul.f32 %v3562_v7, %v4660_v48 }
0x197b   :  { %v3568_v60 = vadd.f32 1e-05, %v3566_v24 }
0x197d   :  { %4378 = vrsqrt.f32 %v3568_v60  ;;  %vm3576_vm11 = vweird.f32 %v3568_v60 }
0x1980   :  { %v3565_v28 = vpop.xlane.xlu0 %3564 }
0x1981   :  { %v3567_v10 = vmul.f32 %v3565_v28, %v4660_v48  ;;  %v3391_v48 = vsel %vm57_vm0, %v5428_v21, %v3370_v20 }
0x1982   :  { %v3393_v40 = vsel %vm5609_vm13, %v3391_v48, %v3378_v27 }
0x1983   :  { %v4379_v12 = vpop.eup %4378  ;;  %v3569_v17 = vadd.f32 1e-05, %v3567_v10 }
0x1984   :  { %v3571_v11 = vmul.f32 %v4379_v12, %v3568_v60  ;;  %vm3577_vm3 = vweird.f32 %v4379_v12 }
0x1985   :  { %4380 = vrsqrt.f32 %v3569_v17  ;;  %vm3578_vm8 = vmor %vm3576_vm11, %vm3577_vm3  ;;  %vm3586_vm2 = vweird.f32 %v3569_v17 }
0x1986   :  { %v3572_v1 = vmul.f32 %v4379_v12, %v3571_v11 }
0x1988   :  { %v3573_v3 = vmul.f32 0.5, %v3572_v1 }
0x198a   :  { %v3574_v44 = vsub.f32 1.5, %v3573_v3 }
0x198b   :  { %v4381_v59 = vpop.eup %4380 }
0x198c   :  { %v3575_v41 = vmul.f32 %v4379_v12, %v3574_v44  ;;  %v3581_v14 = vmul.f32 %v4381_v59, %v3569_v17  ;;  %vm3587_vm1 = vweird.f32 %v4381_v59 }
0x198d   :  { %vm3588_vm9 = vmor %vm3586_vm2, %vm3587_vm1 }
0x198e   :  { %v3579_v31 = vsel %vm3578_vm8, %v4379_v12, %v3575_v41  ;;  %v3582_v39 = vmul.f32 %v4381_v59, %v3581_v14 }
0x198f   :  { %v3590_v37 = vmul.f32 %v3579_v31, %v3556_v35 }
0x1990   :  { %v3583_v50 = vmul.f32 0.5, %v3582_v39  ;;  %v3386_v43 = vpop.permute.xlu1 %3385 }
0x1991   :  { %v3593_v56 = vmul.f32 %v4226_v13, %v3590_v37  ;;  %v3395_v29 = vsel %vm1624_vm4, %v3393_v40, %v3386_v43 }
0x1992   :  { %v3584_v38 = vsub.f32 1.5, %v3583_v50  ;;  %3814 = vst [vmem:[%s5578_s7 + $0x10] sm:$0xff] %v3395_v29 }
0x1993   :  { %v3596_v16 = vadd.f32 %v4227_v22, %v3593_v56  ;;  %v1616_v21 = vpop.permute.xlu0 %1615 }
0x1994   :  { %v3585_v53 = vmul.f32 %v4381_v59, %v3584_v38  ;;  %v1626_v55 = vsel %vm1624_vm4, %v5475_v25, %v1616_v21 }
0x1995   :  { %3598 = vst.msk [vmem:[%s5579_s6] sm:$0xff] %vm57_vm0, %v3596_v16 }
0x1996   :  { %v3589_v57 = vsel %vm3588_vm9, %v4381_v59, %v3585_v53  ;;  %1628 = vst [vmem:[%s5578_s7 + $0x8] sm:$0xff] %v1626_v55 }
0x1997   :  { %v3591_v46 = vmul.f32 %v3589_v57, %v3557_v54 }
0x1999   :  { %v3594_v4 = vmul.f32 %v4226_v13, %v3591_v46 }
0x199b   :  { %v3597_v45 = vadd.f32 %v4227_v22, %v3594_v4 }
0x199d   :  { %3599 = vst.msk [vmem:[%s5579_s6 + $0x8] sm:$0xff] %vm57_vm0, %v3597_v45 }

</bundles_post_ra>
